<compile_context>
chip_gen: v5e
topology: v5e:2x2
jax: 0.10.0
libtpu: 0.0.40
codegen_flags: <defaults>
</compile_context>

<pallas_src>
import jax
import jax.numpy as jnp
from jax.experimental import pallas as pl
from jax.experimental.pallas import tpu as pltpu


# ------------------------------ fused kernel --------------------------------

def _make_block_kernel(num_layers, Cin, Cb, G, H, W, compute_dtype):
    """Builds the fused dense-block kernel (layer loop unrolled at trace time).

    Kernel refs:
      x_ref        : (H, W, Cin)         input image tile (batch squeezed)
      per layer i  : s1 (1,Ci), b1 (1,Ci), w1 (Ci,Cb), s2 (1,Cb), b2 (1,Cb),
                     w2 (9*Cb, G)        im2col-reshaped 3x3 weight
      o_ref        : (H, W, Ctot)        concat slab (input + all new feats)
      pad_ref      : (H+2, W+2, Cb)      VMEM scratch for ZeroPad2d(1)
    """

    def kernel(*refs):
        x_ref = refs[0]
        param_refs = refs[1:1 + 6 * num_layers]
        o_ref = refs[1 + 6 * num_layers]
        pad_ref = refs[2 + 6 * num_layers]

        # Zero only the 1-pixel border of the pad scratch (once per grid
        # step); the interior is fully overwritten by every layer below.
        zrow = jnp.zeros((1, W + 2, Cb), jnp.float32)
        zcol = jnp.zeros((H + 2, 1, Cb), jnp.float32)
        pad_ref[0:1, :, :] = zrow
        pad_ref[H + 1:H + 2, :, :] = zrow
        pad_ref[:, 0:1, :] = zcol
        pad_ref[:, W + 1:W + 2, :] = zcol

        # Front of the concat slab = the block input (torch.cat semantics).
        o_ref[:, :, 0:Cin] = x_ref[...]

        c = Cin
        for i in range(num_layers):
            s1, b1, w1, s2, b2, w2 = param_refs[6 * i:6 * i + 6]

            # --- BN1 (folded affine) + ReLU + 1x1 conv (MXU: M=H*W, K=c) ---
            cur = o_ref[:, :, 0:c].reshape(H * W, c).astype(jnp.float32)
            xn = jnp.maximum(cur * s1[...] + b1[...], 0.0)
            z = jnp.dot(xn.astype(compute_dtype),
                        w1[...].astype(compute_dtype),
                        preferred_element_type=jnp.float32)     # (H*W, Cb)

            # --- BN2 (folded affine) + ReLU ---
            t = jnp.maximum(z * s2[...] + b2[...], 0.0)

            # --- ZeroPad2d(1): interior store (border already zero) ---
            pad_ref[1:H + 1, 1:W + 1, :] = t.reshape(H, W, Cb)

            # --- 3x3 conv as ONE im2col matmul: (H*W, 9*Cb) x (9*Cb, G) ---
            patch = jnp.concatenate(
                [pad_ref[dy:dy + H, dx:dx + W, :]
                 for dy in range(3) for dx in range(3)], axis=-1)
            new = jnp.dot(patch.reshape(H * W, 9 * Cb).astype(compute_dtype),
                          w2[...].astype(compute_dtype),
                          preferred_element_type=jnp.float32)   # (H*W, G)

            # --- append new features to the concat slab, in place ---
            o_ref[:, :, c:c + G] = new.reshape(H, W, G).astype(o_ref.dtype)
            c += G

    return kernel


def dense_block_forward_nhwc(x_nhwc, block_params, compute_dtype=jnp.float32):
    """Fused _DenseBlock forward, NHWC in / NHWC out (one pallas_call).

    compute_dtype: jnp.float32 (default, all chips) or jnp.bfloat16 for the
    MXU inputs on v6e / v7x (accumulation stays f32 either way).
    """
    N, H, W, Cin = x_nhwc.shape
    num_layers = len(block_params)
    Cb = block_params[0][2].shape[1]          # bn_size * growth_rate
    G = block_params[0][5].shape[-1]          # growth_rate
    Ctot = Cin + num_layers * G

    # Flatten per-layer params; pre-reshape 3x3 weights (3,3,Cb,G) -> (9*Cb,G)
    # (tap-major: index dy*3+dx matches the in-kernel im2col concat order).
    flat = []
    for (s1, b1, w1, s2, b2, w2) in block_params:
        flat.extend([s1, b1, w1, s2, b2, w2.reshape(9 * Cb, G)])

    in_specs = [pl.BlockSpec((None, H, W, Cin), lambda n: (n, 0, 0, 0))]
    for p in flat:
        # Full-array (block index 0) weight/scale specs, identical every step.
        in_specs.append(
            pl.BlockSpec(p.shape, lambda n, _nd=p.ndim: (0,) * _nd))

    kernel = _make_block_kernel(num_layers, Cin, Cb, G, H, W, compute_dtype)

    return pl.pallas_call(
        kernel,
        out_shape=jax.ShapeDtypeStruct((N, H, W, Ctot), x_nhwc.dtype),
        grid_spec=pltpu.PrefetchScalarGridSpec(
            num_scalar_prefetch=0,
            grid=(N,),
            in_specs=in_specs,
            out_specs=pl.BlockSpec((None, H, W, Ctot),
                                   lambda n: (n, 0, 0, 0)),
            scratch_shapes=[pltpu.VMEM((H + 2, W + 2, Cb), jnp.float32)],
        ),
        compiler_params=pltpu.CompilerParams(
            dimension_semantics=("parallel",)),
    )(x_nhwc, *flat)


def dense_block_forward(x_nchw, block_params, compute_dtype=jnp.float32):
    """_DenseBlock.forward : NCHW in, NCHW out (layout change at boundary)."""
    x = jnp.transpose(x_nchw, (0, 2, 3, 1))        # NCHW -> NHWC
    y = dense_block_forward_nhwc(x, block_params, compute_dtype)
    return jnp.transpose(y, (0, 3, 1, 2))          # NHWC -> NCHW


# ----------------------------- parameter setup ------------------------------

def _fold_bn(gamma, beta, mean, var, eps=1e-5):
    scale = gamma / jnp.sqrt(var + eps)
    shift = beta - mean * scale
    return scale.reshape(1, -1).astype(jnp.float32), \
           shift.reshape(1, -1).astype(jnp.float32)


def init_block_params(key, num_layers, in_channels, bn_size, growth_rate):
    params = []
    c = in_channels
    cb = bn_size * growth_rate
    for _ in range(num_layers):
        key, *ks = jax.random.split(key, 11)
        # BN1 over c channels
        g1 = jax.random.uniform(ks[0], (c,), minval=0.5, maxval=1.5)
        be1 = jax.random.normal(ks[1], (c,)) * 0.1
        m1 = jax.random.normal(ks[2], (c,)) * 0.1
        v1 = jax.random.uniform(ks[3], (c,), minval=0.5, maxval=1.5)
        # 1x1 conv: torch weight (cb, c, 1, 1) -> kernel layout (c, cb)
        w1 = (jax.random.normal(ks[4], (c, cb)) / jnp.sqrt(c)).astype(jnp.float32)
        # BN2 over cb channels
        g2 = jax.random.uniform(ks[5], (cb,), minval=0.5, maxval=1.5)
        be2 = jax.random.normal(ks[6], (cb,)) * 0.1
        m2 = jax.random.normal(ks[7], (cb,)) * 0.1
        v2 = jax.random.uniform(ks[8], (cb,), minval=0.5, maxval=1.5)
        # 3x3 conv: torch weight (G, cb, 3, 3) -> HWIO (3,3,cb,G)
        w2 = (jax.random.normal(ks[9], (3, 3, cb, growth_rate))
              / jnp.sqrt(9.0 * cb)).astype(jnp.float32)

        s1, sh1 = _fold_bn(g1, be1, m1, v1)
        s2, sh2 = _fold_bn(g2, be2, m2, v2)
        params.append((s1, sh1, w1, s2, sh2, w2))
        c += growth_rate
    return params


# ------------------------------- pure-JAX ref --------------------------------

def dense_block_ref(x_nchw, block_params):
    x = jnp.transpose(x_nchw, (0, 2, 3, 1))
    for (s1, b1, w1, s2, b2, w2) in block_params:
        xn = jnp.maximum(x * s1.reshape(1, 1, 1, -1) + b1.reshape(1, 1, 1, -1), 0.0)
        z = jnp.einsum('nhwc,cd->nhwd', xn, w1)
        t = jnp.maximum(z * s2.reshape(1, 1, 1, -1) + b2.reshape(1, 1, 1, -1), 0.0)
        y = jax.lax.conv_general_dilated(
            t, w2, window_strides=(1, 1), padding=((1, 1), (1, 1)),
            dimension_numbers=('NHWC', 'HWIO', 'NHWC'))
        x = jnp.concatenate([x, y], axis=-1)
    return jnp.transpose(x, (0, 3, 1, 2))


# ----------------------------------- main ------------------------------------

if __name__ == "__main__":
    # small shapes consistent with the module's forward
    N, Cin, H, W = 2, 16, 8, 8
    num_layers, bn_size, growth_rate = 3, 2, 8   # dropout_rate=0, padding='zero'

    key = jax.random.PRNGKey(0)
    kx, kp = jax.random.split(key)
    x = jax.random.normal(kx, (N, Cin, H, W), dtype=jnp.float32)
    params = init_block_params(kp, num_layers, Cin, bn_size, growth_rate)

    fwd = jax.jit(lambda xx: dense_block_forward(xx, params))
    out = jax.block_until_ready(fwd(x))

    assert out.shape == (N, Cin + num_layers * growth_rate, H, W), out.shape
    ref = dense_block_ref(x, params)
    assert jnp.allclose(out, ref, atol=1e-3, rtol=1e-3), \
        float(jnp.max(jnp.abs(out - ref)))

    print("KERNEL_OK")
</pallas_src>

<mosaic_0001>
module attributes {stable_mosaic.version = 11 : i64} {
  func.func @kernel(%arg0: i32, %arg1: memref<1x8x8x16xf32, #tpu.memory_space<vmem>>, %arg2: memref<1x16xf32, #tpu.memory_space<vmem>>, %arg3: memref<1x16xf32, #tpu.memory_space<vmem>>, %arg4: memref<16x16xf32, #tpu.memory_space<vmem>>, %arg5: memref<1x16xf32, #tpu.memory_space<vmem>>, %arg6: memref<1x16xf32, #tpu.memory_space<vmem>>, %arg7: memref<144x8xf32, #tpu.memory_space<vmem>>, %arg8: memref<1x24xf32, #tpu.memory_space<vmem>>, %arg9: memref<1x24xf32, #tpu.memory_space<vmem>>, %arg10: memref<24x16xf32, #tpu.memory_space<vmem>>, %arg11: memref<1x16xf32, #tpu.memory_space<vmem>>, %arg12: memref<1x16xf32, #tpu.memory_space<vmem>>, %arg13: memref<144x8xf32, #tpu.memory_space<vmem>>, %arg14: memref<1x32xf32, #tpu.memory_space<vmem>>, %arg15: memref<1x32xf32, #tpu.memory_space<vmem>>, %arg16: memref<32x16xf32, #tpu.memory_space<vmem>>, %arg17: memref<1x16xf32, #tpu.memory_space<vmem>>, %arg18: memref<1x16xf32, #tpu.memory_space<vmem>>, %arg19: memref<144x8xf32, #tpu.memory_space<vmem>>, %arg20: memref<1x8x8x40xf32, #tpu.memory_space<vmem>>, %arg21: memref<10x10x16xf32, #tpu.memory_space<vmem>>) attributes {dimension_semantics = [#tpu.dimension_semantics<parallel>], iteration_bounds = array<i64: 2>, scalar_prefetch = 0 : i64, scratch_operands = 1 : i64, tpu.core_type = #tpu.core_type<tc>, window_params = [{transform_indices = @transform_0, window_bounds = array<i64: 1, 8, 8, 16>}, {pipeline_mode = #tpu.pipeline_mode<synchronous>, transform_indices = @transform_1, window_bounds = array<i64: 1, 16>}, {pipeline_mode = #tpu.pipeline_mode<synchronous>, transform_indices = @transform_2, window_bounds = array<i64: 1, 16>}, {pipeline_mode = #tpu.pipeline_mode<synchronous>, transform_indices = @transform_3, window_bounds = array<i64: 16, 16>}, {pipeline_mode = #tpu.pipeline_mode<synchronous>, transform_indices = @transform_4, window_bounds = array<i64: 1, 16>}, {pipeline_mode = #tpu.pipeline_mode<synchronous>, transform_indices = @transform_5, window_bounds = array<i64: 1, 16>}, {pipeline_mode = #tpu.pipeline_mode<synchronous>, transform_indices = @transform_6, window_bounds = array<i64: 144, 8>}, {pipeline_mode = #tpu.pipeline_mode<synchronous>, transform_indices = @transform_7, window_bounds = array<i64: 1, 24>}, {pipeline_mode = #tpu.pipeline_mode<synchronous>, transform_indices = @transform_8, window_bounds = array<i64: 1, 24>}, {pipeline_mode = #tpu.pipeline_mode<synchronous>, transform_indices = @transform_9, window_bounds = array<i64: 24, 16>}, {pipeline_mode = #tpu.pipeline_mode<synchronous>, transform_indices = @transform_10, window_bounds = array<i64: 1, 16>}, {pipeline_mode = #tpu.pipeline_mode<synchronous>, transform_indices = @transform_11, window_bounds = array<i64: 1, 16>}, {pipeline_mode = #tpu.pipeline_mode<synchronous>, transform_indices = @transform_12, window_bounds = array<i64: 144, 8>}, {pipeline_mode = #tpu.pipeline_mode<synchronous>, transform_indices = @transform_13, window_bounds = array<i64: 1, 32>}, {pipeline_mode = #tpu.pipeline_mode<synchronous>, transform_indices = @transform_14, window_bounds = array<i64: 1, 32>}, {pipeline_mode = #tpu.pipeline_mode<synchronous>, transform_indices = @transform_15, window_bounds = array<i64: 32, 16>}, {pipeline_mode = #tpu.pipeline_mode<synchronous>, transform_indices = @transform_16, window_bounds = array<i64: 1, 16>}, {pipeline_mode = #tpu.pipeline_mode<synchronous>, transform_indices = @transform_17, window_bounds = array<i64: 1, 16>}, {pipeline_mode = #tpu.pipeline_mode<synchronous>, transform_indices = @transform_18, window_bounds = array<i64: 144, 8>}, {transform_indices = @transform_19, window_bounds = array<i64: 1, 8, 8, 40>}]} {
    %cst = arith.constant 0.000000e+00 : f32
    %0 = vector.broadcast %cst : f32 to vector<1x10x16xf32>
    %cst_0 = arith.constant 0.000000e+00 : f32
    %1 = vector.broadcast %cst_0 : f32 to vector<10x1x16xf32>
    %c0 = arith.constant 0 : index
    %c0_1 = arith.constant 0 : index
    %c0_2 = arith.constant 0 : index
    %2 = vector.load %arg21[%c0, %c0_1, %c0_2] : memref<10x10x16xf32, #tpu.memory_space<vmem>>, vector<1x10x16xf32>
    tpu.vector_store %arg21[%c0, %c0_1, %c0_2], %0 {strides = array<i32>} : memref<10x10x16xf32, #tpu.memory_space<vmem>>, vector<1x10x16xf32>,
    %c9 = arith.constant 9 : index
    %c0_3 = arith.constant 0 : index
    %c0_4 = arith.constant 0 : index
    %3 = vector.load %arg21[%c9, %c0_3, %c0_4] : memref<10x10x16xf32, #tpu.memory_space<vmem>>, vector<1x10x16xf32>
    tpu.vector_store %arg21[%c9, %c0_3, %c0_4], %0 {strides = array<i32>} : memref<10x10x16xf32, #tpu.memory_space<vmem>>, vector<1x10x16xf32>,
    %c0_5 = arith.constant 0 : index
    %c0_6 = arith.constant 0 : index
    %c0_7 = arith.constant 0 : index
    %4 = vector.load %arg21[%c0_5, %c0_6, %c0_7] : memref<10x10x16xf32, #tpu.memory_space<vmem>>, vector<10x1x16xf32>
    tpu.vector_store %arg21[%c0_5, %c0_6, %c0_7], %1 {strides = array<i32>} : memref<10x10x16xf32, #tpu.memory_space<vmem>>, vector<10x1x16xf32>,
    %c0_8 = arith.constant 0 : index
    %c9_9 = arith.constant 9 : index
    %c0_10 = arith.constant 0 : index
    %5 = vector.load %arg21[%c0_8, %c9_9, %c0_10] : memref<10x10x16xf32, #tpu.memory_space<vmem>>, vector<10x1x16xf32>
    tpu.vector_store %arg21[%c0_8, %c9_9, %c0_10], %1 {strides = array<i32>} : memref<10x10x16xf32, #tpu.memory_space<vmem>>, vector<10x1x16xf32>,
    %c0_11 = arith.constant 0 : index
    %c0_12 = arith.constant 0 : index
    %c0_13 = arith.constant 0 : index
    %c0_14 = arith.constant 0 : index
    %6 = vector.load %arg1[%c0_11, %c0_12, %c0_13, %c0_14] : memref<1x8x8x16xf32, #tpu.memory_space<vmem>>, vector<1x8x8x16xf32>
    %7 = vector.shape_cast %6 : vector<1x8x8x16xf32> to vector<8x8x16xf32>
    %c0_15 = arith.constant 0 : index
    %c0_16 = arith.constant 0 : index
    %c0_17 = arith.constant 0 : index
    %c0_18 = arith.constant 0 : index
    %8 = vector.load %arg20[%c0_15, %c0_16, %c0_17, %c0_18] : memref<1x8x8x40xf32, #tpu.memory_space<vmem>>, vector<1x8x8x16xf32>
    %9 = vector.shape_cast %8 : vector<1x8x8x16xf32> to vector<8x8x16xf32>
    %10 = vector.shape_cast %7 : vector<8x8x16xf32> to vector<1x8x8x16xf32>
    tpu.vector_store %arg20[%c0_15, %c0_16, %c0_17, %c0_18], %10 {strides = array<i32>} : memref<1x8x8x40xf32, #tpu.memory_space<vmem>>, vector<1x8x8x16xf32>,
    %c0_19 = arith.constant 0 : index
    %c0_20 = arith.constant 0 : index
    %c0_21 = arith.constant 0 : index
    %c0_22 = arith.constant 0 : index
    %11 = vector.load %arg20[%c0_19, %c0_20, %c0_21, %c0_22] : memref<1x8x8x40xf32, #tpu.memory_space<vmem>>, vector<1x8x8x16xf32>
    %12 = vector.shape_cast %11 : vector<1x8x8x16xf32> to vector<8x8x16xf32>
    %13 = vector.shape_cast %12 : vector<8x8x16xf32> to vector<64x16xf32>
    %c0_23 = arith.constant 0 : index
    %c0_24 = arith.constant 0 : index
    %14 = vector.load %arg2[%c0_23, %c0_24] : memref<1x16xf32, #tpu.memory_space<vmem>>, vector<1x16xf32>
    %15 = vector.broadcast %14 : vector<1x16xf32> to vector<64x16xf32>
    %16 = arith.mulf %13, %15 : vector<64x16xf32>
    %c0_25 = arith.constant 0 : index
    %c0_26 = arith.constant 0 : index
    %17 = vector.load %arg3[%c0_25, %c0_26] : memref<1x16xf32, #tpu.memory_space<vmem>>, vector<1x16xf32>
    %18 = vector.broadcast %17 : vector<1x16xf32> to vector<64x16xf32>
    %19 = arith.addf %16, %18 : vector<64x16xf32>
    %cst_27 = arith.constant 0.000000e+00 : f32
    %20 = vector.broadcast %cst_27 : f32 to vector<64x16xf32>
    %21 = arith.maximumf %19, %20 : vector<64x16xf32>
    %c0_28 = arith.constant 0 : index
    %c0_29 = arith.constant 0 : index
    %22 = vector.load %arg4[%c0_28, %c0_29] : memref<16x16xf32, #tpu.memory_space<vmem>>, vector<16x16xf32>
    %cst_30 = arith.constant dense<0.000000e+00> : vector<64x16xf32>
    %23 = tpu.matmul %21, %22, %cst_30 {dimension_numbers = #tpu.dot_dimension_numbers<[1], [0], [0], [1], [0, 0, 1, 1], [], []>} : vector<64x16xf32>, vector<16x16xf32>, vector<64x16xf32> -> vector<64x16xf32>
    %c0_31 = arith.constant 0 : index
    %c0_32 = arith.constant 0 : index
    %24 = vector.load %arg5[%c0_31, %c0_32] : memref<1x16xf32, #tpu.memory_space<vmem>>, vector<1x16xf32>
    %25 = vector.broadcast %24 : vector<1x16xf32> to vector<64x16xf32>
    %26 = arith.mulf %23, %25 : vector<64x16xf32>
    %c0_33 = arith.constant 0 : index
    %c0_34 = arith.constant 0 : index
    %27 = vector.load %arg6[%c0_33, %c0_34] : memref<1x16xf32, #tpu.memory_space<vmem>>, vector<1x16xf32>
    %28 = vector.broadcast %27 : vector<1x16xf32> to vector<64x16xf32>
    %29 = arith.addf %26, %28 : vector<64x16xf32>
    %cst_35 = arith.constant 0.000000e+00 : f32
    %30 = vector.broadcast %cst_35 : f32 to vector<64x16xf32>
    %31 = arith.maximumf %29, %30 : vector<64x16xf32>
    %32 = vector.shape_cast %31 : vector<64x16xf32> to vector<8x8x16xf32>
    %c1 = arith.constant 1 : index
    %c1_36 = arith.constant 1 : index
    %c0_37 = arith.constant 0 : index
    %33 = vector.load %arg21[%c1, %c1_36, %c0_37] : memref<10x10x16xf32, #tpu.memory_space<vmem>>, vector<8x8x16xf32>
    tpu.vector_store %arg21[%c1, %c1_36, %c0_37], %32 {strides = array<i32>} : memref<10x10x16xf32, #tpu.memory_space<vmem>>, vector<8x8x16xf32>,
    %c0_38 = arith.constant 0 : index
    %c0_39 = arith.constant 0 : index
    %c0_40 = arith.constant 0 : index
    %34 = vector.load %arg21[%c0_38, %c0_39, %c0_40] : memref<10x10x16xf32, #tpu.memory_space<vmem>>, vector<8x8x16xf32>
    %c0_41 = arith.constant 0 : index
    %c1_42 = arith.constant 1 : index
    %c0_43 = arith.constant 0 : index
    %35 = vector.load %arg21[%c0_41, %c1_42, %c0_43] : memref<10x10x16xf32, #tpu.memory_space<vmem>>, vector<8x8x16xf32>
    %c0_44 = arith.constant 0 : index
    %c2 = arith.constant 2 : index
    %c0_45 = arith.constant 0 : index
    %36 = vector.load %arg21[%c0_44, %c2, %c0_45] : memref<10x10x16xf32, #tpu.memory_space<vmem>>, vector<8x8x16xf32>
    %c1_46 = arith.constant 1 : index
    %c0_47 = arith.constant 0 : index
    %c0_48 = arith.constant 0 : index
    %37 = vector.load %arg21[%c1_46, %c0_47, %c0_48] : memref<10x10x16xf32, #tpu.memory_space<vmem>>, vector<8x8x16xf32>
    %c1_49 = arith.constant 1 : index
    %c1_50 = arith.constant 1 : index
    %c0_51 = arith.constant 0 : index
    %38 = vector.load %arg21[%c1_49, %c1_50, %c0_51] : memref<10x10x16xf32, #tpu.memory_space<vmem>>, vector<8x8x16xf32>
    %c1_52 = arith.constant 1 : index
    %c2_53 = arith.constant 2 : index
    %c0_54 = arith.constant 0 : index
    %39 = vector.load %arg21[%c1_52, %c2_53, %c0_54] : memref<10x10x16xf32, #tpu.memory_space<vmem>>, vector<8x8x16xf32>
    %c2_55 = arith.constant 2 : index
    %c0_56 = arith.constant 0 : index
    %c0_57 = arith.constant 0 : index
    %40 = vector.load %arg21[%c2_55, %c0_56, %c0_57] : memref<10x10x16xf32, #tpu.memory_space<vmem>>, vector<8x8x16xf32>
    %c2_58 = arith.constant 2 : index
    %c1_59 = arith.constant 1 : index
    %c0_60 = arith.constant 0 : index
    %41 = vector.load %arg21[%c2_58, %c1_59, %c0_60] : memref<10x10x16xf32, #tpu.memory_space<vmem>>, vector<8x8x16xf32>
    %c2_61 = arith.constant 2 : index
    %c2_62 = arith.constant 2 : index
    %c0_63 = arith.constant 0 : index
    %42 = vector.load %arg21[%c2_61, %c2_62, %c0_63] : memref<10x10x16xf32, #tpu.memory_space<vmem>>, vector<8x8x16xf32>
    %43 = tpu.concatenate %34, %35, %36, %37, %38, %39, %40, %41, %42 in 2 : vector<8x8x16xf32>, vector<8x8x16xf32>, vector<8x8x16xf32>, vector<8x8x16xf32>, vector<8x8x16xf32>, vector<8x8x16xf32>, vector<8x8x16xf32>, vector<8x8x16xf32>, vector<8x8x16xf32> -> vector<8x8x144xf32>
    %44 = vector.shape_cast %43 : vector<8x8x144xf32> to vector<64x144xf32>
    %c0_64 = arith.constant 0 : index
    %c0_65 = arith.constant 0 : index
    %45 = vector.load %arg7[%c0_64, %c0_65] : memref<144x8xf32, #tpu.memory_space<vmem>>, vector<144x8xf32>
    %cst_66 = arith.constant dense<0.000000e+00> : vector<64x8xf32>
    %46 = tpu.matmul %44, %45, %cst_66 {dimension_numbers = #tpu.dot_dimension_numbers<[1], [0], [0], [1], [0, 0, 1, 1], [], []>} : vector<64x144xf32>, vector<144x8xf32>, vector<64x8xf32> -> vector<64x8xf32>
    %47 = vector.shape_cast %46 : vector<64x8xf32> to vector<8x8x8xf32>
    %c0_67 = arith.constant 0 : index
    %c0_68 = arith.constant 0 : index
    %c0_69 = arith.constant 0 : index
    %c16 = arith.constant 16 : index
    %48 = vector.load %arg20[%c0_67, %c0_68, %c0_69, %c16] : memref<1x8x8x40xf32, #tpu.memory_space<vmem>>, vector<1x8x8x8xf32>
    %49 = vector.shape_cast %48 : vector<1x8x8x8xf32> to vector<8x8x8xf32>
    %50 = vector.shape_cast %47 : vector<8x8x8xf32> to vector<1x8x8x8xf32>
    tpu.vector_store %arg20[%c0_67, %c0_68, %c0_69, %c16], %50 {strides = array<i32>} : memref<1x8x8x40xf32, #tpu.memory_space<vmem>>, vector<1x8x8x8xf32>,
    %c0_70 = arith.constant 0 : index
    %c0_71 = arith.constant 0 : index
    %c0_72 = arith.constant 0 : index
    %c0_73 = arith.constant 0 : index
    %51 = vector.load %arg20[%c0_70, %c0_71, %c0_72, %c0_73] : memref<1x8x8x40xf32, #tpu.memory_space<vmem>>, vector<1x8x8x24xf32>
    %52 = vector.shape_cast %51 : vector<1x8x8x24xf32> to vector<8x8x24xf32>
    %53 = vector.shape_cast %52 : vector<8x8x24xf32> to vector<64x24xf32>
    %c0_74 = arith.constant 0 : index
    %c0_75 = arith.constant 0 : index
    %54 = vector.load %arg8[%c0_74, %c0_75] : memref<1x24xf32, #tpu.memory_space<vmem>>, vector<1x24xf32>
    %55 = vector.broadcast %54 : vector<1x24xf32> to vector<64x24xf32>
    %56 = arith.mulf %53, %55 : vector<64x24xf32>
    %c0_76 = arith.constant 0 : index
    %c0_77 = arith.constant 0 : index
    %57 = vector.load %arg9[%c0_76, %c0_77] : memref<1x24xf32, #tpu.memory_space<vmem>>, vector<1x24xf32>
    %58 = vector.broadcast %57 : vector<1x24xf32> to vector<64x24xf32>
    %59 = arith.addf %56, %58 : vector<64x24xf32>
    %cst_78 = arith.constant 0.000000e+00 : f32
    %60 = vector.broadcast %cst_78 : f32 to vector<64x24xf32>
    %61 = arith.maximumf %59, %60 : vector<64x24xf32>
    %c0_79 = arith.constant 0 : index
    %c0_80 = arith.constant 0 : index
    %62 = vector.load %arg10[%c0_79, %c0_80] : memref<24x16xf32, #tpu.memory_space<vmem>>, vector<24x16xf32>
    %cst_81 = arith.constant dense<0.000000e+00> : vector<64x16xf32>
    %63 = tpu.matmul %61, %62, %cst_81 {dimension_numbers = #tpu.dot_dimension_numbers<[1], [0], [0], [1], [0, 0, 1, 1], [], []>} : vector<64x24xf32>, vector<24x16xf32>, vector<64x16xf32> -> vector<64x16xf32>
    %c0_82 = arith.constant 0 : index
    %c0_83 = arith.constant 0 : index
    %64 = vector.load %arg11[%c0_82, %c0_83] : memref<1x16xf32, #tpu.memory_space<vmem>>, vector<1x16xf32>
    %65 = vector.broadcast %64 : vector<1x16xf32> to vector<64x16xf32>
    %66 = arith.mulf %63, %65 : vector<64x16xf32>
    %c0_84 = arith.constant 0 : index
    %c0_85 = arith.constant 0 : index
    %67 = vector.load %arg12[%c0_84, %c0_85] : memref<1x16xf32, #tpu.memory_space<vmem>>, vector<1x16xf32>
    %68 = vector.broadcast %67 : vector<1x16xf32> to vector<64x16xf32>
    %69 = arith.addf %66, %68 : vector<64x16xf32>
    %cst_86 = arith.constant 0.000000e+00 : f32
    %70 = vector.broadcast %cst_86 : f32 to vector<64x16xf32>
    %71 = arith.maximumf %69, %70 : vector<64x16xf32>
    %72 = vector.shape_cast %71 : vector<64x16xf32> to vector<8x8x16xf32>
    %c1_87 = arith.constant 1 : index
    %c1_88 = arith.constant 1 : index
    %c0_89 = arith.constant 0 : index
    %73 = vector.load %arg21[%c1_87, %c1_88, %c0_89] : memref<10x10x16xf32, #tpu.memory_space<vmem>>, vector<8x8x16xf32>
    tpu.vector_store %arg21[%c1_87, %c1_88, %c0_89], %72 {strides = array<i32>} : memref<10x10x16xf32, #tpu.memory_space<vmem>>, vector<8x8x16xf32>,
    %c0_90 = arith.constant 0 : index
    %c0_91 = arith.constant 0 : index
    %c0_92 = arith.constant 0 : index
    %74 = vector.load %arg21[%c0_90, %c0_91, %c0_92] : memref<10x10x16xf32, #tpu.memory_space<vmem>>, vector<8x8x16xf32>
    %c0_93 = arith.constant 0 : index
    %c1_94 = arith.constant 1 : index
    %c0_95 = arith.constant 0 : index
    %75 = vector.load %arg21[%c0_93, %c1_94, %c0_95] : memref<10x10x16xf32, #tpu.memory_space<vmem>>, vector<8x8x16xf32>
    %c0_96 = arith.constant 0 : index
    %c2_97 = arith.constant 2 : index
    %c0_98 = arith.constant 0 : index
    %76 = vector.load %arg21[%c0_96, %c2_97, %c0_98] : memref<10x10x16xf32, #tpu.memory_space<vmem>>, vector<8x8x16xf32>
    %c1_99 = arith.constant 1 : index
    %c0_100 = arith.constant 0 : index
    %c0_101 = arith.constant 0 : index
    %77 = vector.load %arg21[%c1_99, %c0_100, %c0_101] : memref<10x10x16xf32, #tpu.memory_space<vmem>>, vector<8x8x16xf32>
    %c1_102 = arith.constant 1 : index
    %c1_103 = arith.constant 1 : index
    %c0_104 = arith.constant 0 : index
    %78 = vector.load %arg21[%c1_102, %c1_103, %c0_104] : memref<10x10x16xf32, #tpu.memory_space<vmem>>, vector<8x8x16xf32>
    %c1_105 = arith.constant 1 : index
    %c2_106 = arith.constant 2 : index
    %c0_107 = arith.constant 0 : index
    %79 = vector.load %arg21[%c1_105, %c2_106, %c0_107] : memref<10x10x16xf32, #tpu.memory_space<vmem>>, vector<8x8x16xf32>
    %c2_108 = arith.constant 2 : index
    %c0_109 = arith.constant 0 : index
    %c0_110 = arith.constant 0 : index
    %80 = vector.load %arg21[%c2_108, %c0_109, %c0_110] : memref<10x10x16xf32, #tpu.memory_space<vmem>>, vector<8x8x16xf32>
    %c2_111 = arith.constant 2 : index
    %c1_112 = arith.constant 1 : index
    %c0_113 = arith.constant 0 : index
    %81 = vector.load %arg21[%c2_111, %c1_112, %c0_113] : memref<10x10x16xf32, #tpu.memory_space<vmem>>, vector<8x8x16xf32>
    %c2_114 = arith.constant 2 : index
    %c2_115 = arith.constant 2 : index
    %c0_116 = arith.constant 0 : index
    %82 = vector.load %arg21[%c2_114, %c2_115, %c0_116] : memref<10x10x16xf32, #tpu.memory_space<vmem>>, vector<8x8x16xf32>
    %83 = tpu.concatenate %74, %75, %76, %77, %78, %79, %80, %81, %82 in 2 : vector<8x8x16xf32>, vector<8x8x16xf32>, vector<8x8x16xf32>, vector<8x8x16xf32>, vector<8x8x16xf32>, vector<8x8x16xf32>, vector<8x8x16xf32>, vector<8x8x16xf32>, vector<8x8x16xf32> -> vector<8x8x144xf32>
    %84 = vector.shape_cast %83 : vector<8x8x144xf32> to vector<64x144xf32>
    %c0_117 = arith.constant 0 : index
    %c0_118 = arith.constant 0 : index
    %85 = vector.load %arg13[%c0_117, %c0_118] : memref<144x8xf32, #tpu.memory_space<vmem>>, vector<144x8xf32>
    %cst_119 = arith.constant dense<0.000000e+00> : vector<64x8xf32>
    %86 = tpu.matmul %84, %85, %cst_119 {dimension_numbers = #tpu.dot_dimension_numbers<[1], [0], [0], [1], [0, 0, 1, 1], [], []>} : vector<64x144xf32>, vector<144x8xf32>, vector<64x8xf32> -> vector<64x8xf32>
    %87 = vector.shape_cast %86 : vector<64x8xf32> to vector<8x8x8xf32>
    %c0_120 = arith.constant 0 : index
    %c0_121 = arith.constant 0 : index
    %c0_122 = arith.constant 0 : index
    %c24 = arith.constant 24 : index
    %88 = vector.load %arg20[%c0_120, %c0_121, %c0_122, %c24] : memref<1x8x8x40xf32, #tpu.memory_space<vmem>>, vector<1x8x8x8xf32>
    %89 = vector.shape_cast %88 : vector<1x8x8x8xf32> to vector<8x8x8xf32>
    %90 = vector.shape_cast %87 : vector<8x8x8xf32> to vector<1x8x8x8xf32>
    tpu.vector_store %arg20[%c0_120, %c0_121, %c0_122, %c24], %90 {strides = array<i32>} : memref<1x8x8x40xf32, #tpu.memory_space<vmem>>, vector<1x8x8x8xf32>,
    %c0_123 = arith.constant 0 : index
    %c0_124 = arith.constant 0 : index
    %c0_125 = arith.constant 0 : index
    %c0_126 = arith.constant 0 : index
    %91 = vector.load %arg20[%c0_123, %c0_124, %c0_125, %c0_126] : memref<1x8x8x40xf32, #tpu.memory_space<vmem>>, vector<1x8x8x32xf32>
    %92 = vector.shape_cast %91 : vector<1x8x8x32xf32> to vector<8x8x32xf32>
    %93 = vector.shape_cast %92 : vector<8x8x32xf32> to vector<64x32xf32>
    %c0_127 = arith.constant 0 : index
    %c0_128 = arith.constant 0 : index
    %94 = vector.load %arg14[%c0_127, %c0_128] : memref<1x32xf32, #tpu.memory_space<vmem>>, vector<1x32xf32>
    %95 = vector.broadcast %94 : vector<1x32xf32> to vector<64x32xf32>
    %96 = arith.mulf %93, %95 : vector<64x32xf32>
    %c0_129 = arith.constant 0 : index
    %c0_130 = arith.constant 0 : index
    %97 = vector.load %arg15[%c0_129, %c0_130] : memref<1x32xf32, #tpu.memory_space<vmem>>, vector<1x32xf32>
    %98 = vector.broadcast %97 : vector<1x32xf32> to vector<64x32xf32>
    %99 = arith.addf %96, %98 : vector<64x32xf32>
    %cst_131 = arith.constant 0.000000e+00 : f32
    %100 = vector.broadcast %cst_131 : f32 to vector<64x32xf32>
    %101 = arith.maximumf %99, %100 : vector<64x32xf32>
    %c0_132 = arith.constant 0 : index
    %c0_133 = arith.constant 0 : index
    %102 = vector.load %arg16[%c0_132, %c0_133] : memref<32x16xf32, #tpu.memory_space<vmem>>, vector<32x16xf32>
    %cst_134 = arith.constant dense<0.000000e+00> : vector<64x16xf32>
    %103 = tpu.matmul %101, %102, %cst_134 {dimension_numbers = #tpu.dot_dimension_numbers<[1], [0], [0], [1], [0, 0, 1, 1], [], []>} : vector<64x32xf32>, vector<32x16xf32>, vector<64x16xf32> -> vector<64x16xf32>
    %c0_135 = arith.constant 0 : index
    %c0_136 = arith.constant 0 : index
    %104 = vector.load %arg17[%c0_135, %c0_136] : memref<1x16xf32, #tpu.memory_space<vmem>>, vector<1x16xf32>
    %105 = vector.broadcast %104 : vector<1x16xf32> to vector<64x16xf32>
    %106 = arith.mulf %103, %105 : vector<64x16xf32>
    %c0_137 = arith.constant 0 : index
    %c0_138 = arith.constant 0 : index
    %107 = vector.load %arg18[%c0_137, %c0_138] : memref<1x16xf32, #tpu.memory_space<vmem>>, vector<1x16xf32>
    %108 = vector.broadcast %107 : vector<1x16xf32> to vector<64x16xf32>
    %109 = arith.addf %106, %108 : vector<64x16xf32>
    %cst_139 = arith.constant 0.000000e+00 : f32
    %110 = vector.broadcast %cst_139 : f32 to vector<64x16xf32>
    %111 = arith.maximumf %109, %110 : vector<64x16xf32>
    %112 = vector.shape_cast %111 : vector<64x16xf32> to vector<8x8x16xf32>
    %c1_140 = arith.constant 1 : index
    %c1_141 = arith.constant 1 : index
    %c0_142 = arith.constant 0 : index
    %113 = vector.load %arg21[%c1_140, %c1_141, %c0_142] : memref<10x10x16xf32, #tpu.memory_space<vmem>>, vector<8x8x16xf32>
    tpu.vector_store %arg21[%c1_140, %c1_141, %c0_142], %112 {strides = array<i32>} : memref<10x10x16xf32, #tpu.memory_space<vmem>>, vector<8x8x16xf32>,
    %c0_143 = arith.constant 0 : index
    %c0_144 = arith.constant 0 : index
    %c0_145 = arith.constant 0 : index
    %114 = vector.load %arg21[%c0_143, %c0_144, %c0_145] : memref<10x10x16xf32, #tpu.memory_space<vmem>>, vector<8x8x16xf32>
    %c0_146 = arith.constant 0 : index
    %c1_147 = arith.constant 1 : index
    %c0_148 = arith.constant 0 : index
    %115 = vector.load %arg21[%c0_146, %c1_147, %c0_148] : memref<10x10x16xf32, #tpu.memory_space<vmem>>, vector<8x8x16xf32>
    %c0_149 = arith.constant 0 : index
    %c2_150 = arith.constant 2 : index
    %c0_151 = arith.constant 0 : index
    %116 = vector.load %arg21[%c0_149, %c2_150, %c0_151] : memref<10x10x16xf32, #tpu.memory_space<vmem>>, vector<8x8x16xf32>
    %c1_152 = arith.constant 1 : index
    %c0_153 = arith.constant 0 : index
    %c0_154 = arith.constant 0 : index
    %117 = vector.load %arg21[%c1_152, %c0_153, %c0_154] : memref<10x10x16xf32, #tpu.memory_space<vmem>>, vector<8x8x16xf32>
    %c1_155 = arith.constant 1 : index
    %c1_156 = arith.constant 1 : index
    %c0_157 = arith.constant 0 : index
    %118 = vector.load %arg21[%c1_155, %c1_156, %c0_157] : memref<10x10x16xf32, #tpu.memory_space<vmem>>, vector<8x8x16xf32>
    %c1_158 = arith.constant 1 : index
    %c2_159 = arith.constant 2 : index
    %c0_160 = arith.constant 0 : index
    %119 = vector.load %arg21[%c1_158, %c2_159, %c0_160] : memref<10x10x16xf32, #tpu.memory_space<vmem>>, vector<8x8x16xf32>
    %c2_161 = arith.constant 2 : index
    %c0_162 = arith.constant 0 : index
    %c0_163 = arith.constant 0 : index
    %120 = vector.load %arg21[%c2_161, %c0_162, %c0_163] : memref<10x10x16xf32, #tpu.memory_space<vmem>>, vector<8x8x16xf32>
    %c2_164 = arith.constant 2 : index
    %c1_165 = arith.constant 1 : index
    %c0_166 = arith.constant 0 : index
    %121 = vector.load %arg21[%c2_164, %c1_165, %c0_166] : memref<10x10x16xf32, #tpu.memory_space<vmem>>, vector<8x8x16xf32>
    %c2_167 = arith.constant 2 : index
    %c2_168 = arith.constant 2 : index
    %c0_169 = arith.constant 0 : index
    %122 = vector.load %arg21[%c2_167, %c2_168, %c0_169] : memref<10x10x16xf32, #tpu.memory_space<vmem>>, vector<8x8x16xf32>
    %123 = tpu.concatenate %114, %115, %116, %117, %118, %119, %120, %121, %122 in 2 : vector<8x8x16xf32>, vector<8x8x16xf32>, vector<8x8x16xf32>, vector<8x8x16xf32>, vector<8x8x16xf32>, vector<8x8x16xf32>, vector<8x8x16xf32>, vector<8x8x16xf32>, vector<8x8x16xf32> -> vector<8x8x144xf32>
    %124 = vector.shape_cast %123 : vector<8x8x144xf32> to vector<64x144xf32>
    %c0_170 = arith.constant 0 : index
    %c0_171 = arith.constant 0 : index
    %125 = vector.load %arg19[%c0_170, %c0_171] : memref<144x8xf32, #tpu.memory_space<vmem>>, vector<144x8xf32>
    %cst_172 = arith.constant dense<0.000000e+00> : vector<64x8xf32>
    %126 = tpu.matmul %124, %125, %cst_172 {dimension_numbers = #tpu.dot_dimension_numbers<[1], [0], [0], [1], [0, 0, 1, 1], [], []>} : vector<64x144xf32>, vector<144x8xf32>, vector<64x8xf32> -> vector<64x8xf32>
    %127 = vector.shape_cast %126 : vector<64x8xf32> to vector<8x8x8xf32>
    %c0_173 = arith.constant 0 : index
    %c0_174 = arith.constant 0 : index
    %c0_175 = arith.constant 0 : index
    %c32 = arith.constant 32 : index
    %128 = vector.load %arg20[%c0_173, %c0_174, %c0_175, %c32] : memref<1x8x8x40xf32, #tpu.memory_space<vmem>>, vector<1x8x8x8xf32>
    %129 = vector.shape_cast %128 : vector<1x8x8x8xf32> to vector<8x8x8xf32>
    %130 = vector.shape_cast %127 : vector<8x8x8xf32> to vector<1x8x8x8xf32>
    tpu.vector_store %arg20[%c0_173, %c0_174, %c0_175, %c32], %130 {strides = array<i32>} : memref<1x8x8x40xf32, #tpu.memory_space<vmem>>, vector<1x8x8x8xf32>,
    return
  }
  func.func @transform_0(%arg0: i32) -> (i32, i32, i32, i32) {
    %c0_i32 = arith.constant 0 : i32
    %c0_i32_0 = arith.constant 0 : i32
    %c0_i32_1 = arith.constant 0 : i32
    %c0_i32_2 = arith.constant 0 : i32
    return %arg0, %c0_i32, %c0_i32_0, %c0_i32_1 : i32, i32, i32, i32
  }
  func.func @transform_1(%arg0: i32) -> (i32, i32) {
    %c0_i32 = arith.constant 0 : i32
    %c0_i32_0 = arith.constant 0 : i32
    %c0_i32_1 = arith.constant 0 : i32
    return %c0_i32, %c0_i32_0 : i32, i32
  }
  func.func @transform_2(%arg0: i32) -> (i32, i32) {
    %c0_i32 = arith.constant 0 : i32
    %c0_i32_0 = arith.constant 0 : i32
    %c0_i32_1 = arith.constant 0 : i32
    return %c0_i32, %c0_i32_0 : i32, i32
  }
  func.func @transform_3(%arg0: i32) -> (i32, i32) {
    %c0_i32 = arith.constant 0 : i32
    %c0_i32_0 = arith.constant 0 : i32
    %c0_i32_1 = arith.constant 0 : i32
    return %c0_i32, %c0_i32_0 : i32, i32
  }
  func.func @transform_4(%arg0: i32) -> (i32, i32) {
    %c0_i32 = arith.constant 0 : i32
    %c0_i32_0 = arith.constant 0 : i32
    %c0_i32_1 = arith.constant 0 : i32
    return %c0_i32, %c0_i32_0 : i32, i32
  }
  func.func @transform_5(%arg0: i32) -> (i32, i32) {
    %c0_i32 = arith.constant 0 : i32
    %c0_i32_0 = arith.constant 0 : i32
    %c0_i32_1 = arith.constant 0 : i32
    return %c0_i32, %c0_i32_0 : i32, i32
  }
  func.func @transform_6(%arg0: i32) -> (i32, i32) {
    %c0_i32 = arith.constant 0 : i32
    %c0_i32_0 = arith.constant 0 : i32
    %c0_i32_1 = arith.constant 0 : i32
    return %c0_i32, %c0_i32_0 : i32, i32
  }
  func.func @transform_7(%arg0: i32) -> (i32, i32) {
    %c0_i32 = arith.constant 0 : i32
    %c0_i32_0 = arith.constant 0 : i32
    %c0_i32_1 = arith.constant 0 : i32
    return %c0_i32, %c0_i32_0 : i32, i32
  }
  func.func @transform_8(%arg0: i32) -> (i32, i32) {
    %c0_i32 = arith.constant 0 : i32
    %c0_i32_0 = arith.constant 0 : i32
    %c0_i32_1 = arith.constant 0 : i32
    return %c0_i32, %c0_i32_0 : i32, i32
  }
  func.func @transform_9(%arg0: i32) -> (i32, i32) {
    %c0_i32 = arith.constant 0 : i32
    %c0_i32_0 = arith.constant 0 : i32
    %c0_i32_1 = arith.constant 0 : i32
    return %c0_i32, %c0_i32_0 : i32, i32
  }
  func.func @transform_10(%arg0: i32) -> (i32, i32) {
    %c0_i32 = arith.constant 0 : i32
    %c0_i32_0 = arith.constant 0 : i32
    %c0_i32_1 = arith.constant 0 : i32
    return %c0_i32, %c0_i32_0 : i32, i32
  }
  func.func @transform_11(%arg0: i32) -> (i32, i32) {
    %c0_i32 = arith.constant 0 : i32
    %c0_i32_0 = arith.constant 0 : i32
    %c0_i32_1 = arith.constant 0 : i32
    return %c0_i32, %c0_i32_0 : i32, i32
  }
  func.func @transform_12(%arg0: i32) -> (i32, i32) {
    %c0_i32 = arith.constant 0 : i32
    %c0_i32_0 = arith.constant 0 : i32
    %c0_i32_1 = arith.constant 0 : i32
    return %c0_i32, %c0_i32_0 : i32, i32
  }
  func.func @transform_13(%arg0: i32) -> (i32, i32) {
    %c0_i32 = arith.constant 0 : i32
    %c0_i32_0 = arith.constant 0 : i32
    %c0_i32_1 = arith.constant 0 : i32
    return %c0_i32, %c0_i32_0 : i32, i32
  }
  func.func @transform_14(%arg0: i32) -> (i32, i32) {
    %c0_i32 = arith.constant 0 : i32
    %c0_i32_0 = arith.constant 0 : i32
    %c0_i32_1 = arith.constant 0 : i32
    return %c0_i32, %c0_i32_0 : i32, i32
  }
  func.func @transform_15(%arg0: i32) -> (i32, i32) {
    %c0_i32 = arith.constant 0 : i32
    %c0_i32_0 = arith.constant 0 : i32
    %c0_i32_1 = arith.constant 0 : i32
    return %c0_i32, %c0_i32_0 : i32, i32
  }
  func.func @transform_16(%arg0: i32) -> (i32, i32) {
    %c0_i32 = arith.constant 0 : i32
    %c0_i32_0 = arith.constant 0 : i32
    %c0_i32_1 = arith.constant 0 : i32
    return %c0_i32, %c0_i32_0 : i32, i32
  }
  func.func @transform_17(%arg0: i32) -> (i32, i32) {
    %c0_i32 = arith.constant 0 : i32
    %c0_i32_0 = arith.constant 0 : i32
    %c0_i32_1 = arith.constant 0 : i32
    return %c0_i32, %c0_i32_0 : i32, i32
  }
  func.func @transform_18(%arg0: i32) -> (i32, i32) {
    %c0_i32 = arith.constant 0 : i32
    %c0_i32_0 = arith.constant 0 : i32
    %c0_i32_1 = arith.constant 0 : i32
    return %c0_i32, %c0_i32_0 : i32, i32
  }
  func.func @transform_19(%arg0: i32) -> (i32, i32, i32, i32) {
    %c0_i32 = arith.constant 0 : i32
    %c0_i32_0 = arith.constant 0 : i32
    %c0_i32_1 = arith.constant 0 : i32
    %c0_i32_2 = arith.constant 0 : i32
    return %arg0, %c0_i32, %c0_i32_0, %c0_i32_1 : i32, i32, i32, i32
  }
}

</mosaic_0001>

<bundles_post_ra>
// kernel: _lambda_.1
= control target key start
LH: loop header
LB: loop body
LE: loop exit
PB: predicated region body
PF: predicated region fallthrough
CT: control target
= control target key end

     0   :  { %s5112_s0 = inlined_call_operand.hbm [shape: f32[2,8,8,16], index: 0, kind: input, shape index: {}]   ;;  %s5113_s1 = inlined_call_operand.hbm [shape: f32[1,16], index: 1, kind: input, shape index: {}]   ;;  %s5114_s2 = inlined_call_operand.hbm [shape: f32[1,16], index: 2, kind: input, shape index: {}]   ;;  %s5115_s3 = inlined_call_operand.hbm [shape: f32[16,16], index: 3, kind: input, shape index: {}]   ;;  %s5116_s4 = inlined_call_operand.hbm [shape: f32[1,16], index: 4, kind: input, shape index: {}]   ;;  %s5117_s5 = inlined_call_operand.hbm [shape: f32[1,16], index: 5, kind: input, shape index: {}]   ;;  %s5118_s6 = inlined_call_operand.hbm [shape: f32[144,8], index: 6, kind: input, shape index: {}]   ;;  %s5119_s7 = inlined_call_operand.vmem [shape: f32[1,24], index: 7, kind: input, shape index: {}]   ;;  %s5120_s8 = inlined_call_operand.vmem [shape: f32[1,24], index: 8, kind: input, shape index: {}]   ;;  %s5121_s9 = inlined_call_operand.hbm [shape: f32[24,16], index: 9, kind: input, shape index: {}]   ;;  %s5122_s10 = inlined_call_operand.vmem [shape: f32[1,16], index: 10, kind: input, shape index: {}]   ;;  %s5123_s11 = inlined_call_operand.vmem [shape: f32[1,16], index: 11, kind: input, shape index: {}]   ;;  %s5124_s12 = inlined_call_operand.hbm [shape: f32[144,8], index: 12, kind: input, shape index: {}]   ;;  %s5125_s13 = inlined_call_operand.vmem [shape: f32[1,32], index: 13, kind: input, shape index: {}]   ;;  %s5126_s14 = inlined_call_operand.vmem [shape: f32[1,32], index: 14, kind: input, shape index: {}]   ;;  %s5127_s15 = inlined_call_operand.hbm [shape: f32[32,16], index: 15, kind: input, shape index: {}]   ;;  %s5128_s16 = inlined_call_operand.vmem [shape: f32[1,16], index: 16, kind: input, shape index: {}]   ;;  %s5129_s17 = inlined_call_operand.vmem [shape: f32[1,16], index: 17, kind: input, shape index: {}]   ;;  %s5130_s18 = inlined_call_operand.hbm [shape: f32[144,8], index: 18, kind: input, shape index: {}]   ;;  %s5131_s19 = inlined_call_operand.hbm [shape: f32[2,8,8,40], index: 19, kind: output, shape index: {}]  }
   0x1   :  { %5136 = sst [smem:[#allocation29_spill]] %s5112_s0 }
   0x2   :  { %5137 = sst [smem:[#allocation30_spill]] %s5113_s1 }
   0x3   :  { %5138 = sst [smem:[#allocation31_spill]] %s5114_s2 }
   0x4   :  { %5139 = sst [smem:[#allocation32_spill]] %s5115_s3 }
   0x5   :  { %5140 = sst [smem:[#allocation33_spill]] %s5116_s4 }
   0x6   :  { %5141 = sst [smem:[#allocation34_spill]] %s5117_s5 }
   0x7   :  { %5142 = sst [smem:[#allocation35_spill]] %s5118_s6 }
   0x8   :  { %5143 = sst [smem:[#allocation36_spill]] %s5121_s9 }
   0x9   :  { %5144 = sst [smem:[#allocation37_spill]] %s5122_s10 }
   0xa   :  { %5145 = sst [smem:[#allocation38_spill]] %s5123_s11 }
   0xb   :  { %5146 = sst [smem:[#allocation39_spill]] %s5125_s13 }
   0xc   :  { %5147 = sst [smem:[#allocation40_spill]] %s5126_s14 }
   0xd   :  { %5148 = sst [smem:[#allocation41_spill]] %s5128_s16 }
   0xe   :  { %5149 = sst [smem:[#allocation42_spill]] %s5129_s17 }
   0xf   :  { %5150 = sst [smem:[#allocation43_spill]] %s5131_s19 }
  0x10   :  { %24 = vsyncpa [#allocation4], 0 }
  0x11   :  { %26 = vsyncpa [#allocation4 + $0x1], 0 }
  0x12   :  { %27 = vsyncpa [#allocation7], 0 }
  0x13   :  { %28 = vsyncpa [#allocation10], 0 }
  0x14   :  { %29 = vsyncpa [#allocation13], 0 }
  0x15   :  { %30 = vsyncpa [#allocation16], 0 }
  0x16   :  { %31 = vsyncpa [#allocation19], 0 }
  0x17   :  { %32 = vsyncpa [#allocation5], 0 }
  0x18   :  { %34 = vsyncpa [#allocation5 + $0x1], 0  ;;  %s4219_s0 = smov 0   ;;  %s4221_s30 = smov 0  }
  0x19   :  { %s4223_s20 = smov 0   ;;  %s4225_s21 = smov 0  }
  0x1a LB: > { %s5151_s2 = sld [smem:[#allocation30_spill]]  ;;  %s4243_s24 = sadd.s32 4294967295, %s4094_s21   ;;  %s4094_s21 = sphi %s4225_s21, %s5179_s21   ;;  %s4090_s20 = sphi %s4223_s20, %s5178_s20   ;;  %s4086_s30 = sphi %s4221_s30, %s5177_s30   ;;  %s4082_s0 = sphi %s4219_s0, %s5176_s0  }
  0x1b   : > { %p3013_p0 = scmp.ge.s32.totalorder %s4094_s21, 1  ;;  %p61_p1 = scmp.eq.s32.totalorder %s4243_s24, 0 }
  0x1c   : > { %p475_p2 = scmp.lt.s32.totalorder %s4094_s21, 3  ;;  %s4096_s3 = smov [#allocation6]  }
  0x1d   : > { %s489_s26 = sshll.u32 %s4096_s3, 4  ;;  %s5153_s29 = sld [smem:[#allocation32_spill]]  ;;  %s490_s26 = int_to_ptr.vmem [resolvable:$true] %s489_s26 }
  0x1e   : > { %p4248_p3 = pnand %p3013_p0, %p475_p2  ;;  %s5134_s3 = smov 128  }
  0x1f   : > { %s5135_s17 = smov 8   ;;  %s5155_s5 = sld [smem:[#allocation34_spill]] }
  0x20   : > { %s487_s23 = sshll.u32 %s5151_s2, 4  ;;  %p3160_p5 = pneg %p4248_p3  ;;  %s488_s23 = int_to_ptr.hbm [resolvable:$true] %s487_s23 }
  0x21   : > { %s4097_s2 = smov [#allocation9]   ;;  %s4100_s16 = smov [#allocation12]  }
  0x22   : > { %p4260_p6 = pnand %p3160_p5, %p61_p1  ;;  %s512_s19 = sshll.u32 %s4097_s2, 4  ;;  %s513_s19 = int_to_ptr.vmem [resolvable:$true] %s512_s19 }
  0x23   : > { %s510_s1 = sshll.u32 %s5153_s29, 4  ;;  %s539_s14 = sshll.u32 %s4100_s16, 4  ;;  %s511_s1 = int_to_ptr.hbm [resolvable:$true] %s510_s1  ;;  %s540_s14 = int_to_ptr.vmem [resolvable:$true] %s539_s14 }
  0x24   : > { %3163 = dma.hbm_to_vmem [thread:$0]  (!%p4260_p6), %s488_s23, 16, %s490_s26, [#allocation7]  }
  0x25   : > { %3169 = dma.hbm_to_vmem [thread:$0]  (!%p4260_p6), %s511_s1, 256, %s513_s19, [#allocation10], %s5134_s3, %s5134_s3, %s5135_s17  }
  0x26   : > { %s537_s29 = sshll.u32 %s5155_s5, 4  ;;  %s5156_s9 = sld [smem:[#allocation36_spill]]  ;;  %s538_s29 = int_to_ptr.hbm [resolvable:$true] %s537_s29 }
  0x27   : > { %3175 = dma.hbm_to_vmem [thread:$0]  (!%p4260_p6), %s538_s29, 16, %s540_s14, [#allocation13]  }
  0x28   : > { %s4101_s26 = smov [#allocation15]   ;;  %s608_s1 = sshll.u32 %s5127_s15, 4  ;;  %s609_s1 = int_to_ptr.hbm [resolvable:$true] %s608_s1 }
  0x29   : > { %s570_s11 = sshll.u32 %s4101_s26, 4  ;;  %s5157_s27 = sld [smem:[#allocation31_spill]]  ;;  %s571_s11 = int_to_ptr.vmem [resolvable:$true] %s570_s11 }
  0x2a   : > { %s4102_s14 = smov [#allocation18]   ;;  %s4103_s10 = smov [#allocation8]  }
  0x2b   : > { %s610_s29 = sshll.u32 %s4102_s14, 4  ;;  %s501_s2 = sshll.u32 %s4103_s10, 4  ;;  %s611_s29 = int_to_ptr.vmem [resolvable:$true] %s610_s29  ;;  %s502_s2 = int_to_ptr.vmem [resolvable:$true] %s501_s2 }
  0x2c   : > { %s568_s23 = sshll.u32 %s5156_s9, 4  ;;  %s5158_s4 = sld [smem:[#allocation33_spill]]  ;;  %s569_s23 = int_to_ptr.hbm [resolvable:$true] %s568_s23 }
  0x2d   : > { %3181 = dma.hbm_to_vmem [thread:$0]  (!%p4260_p6), %s569_s23, 384, %s571_s11, [#allocation16], %s5134_s3, %s5134_s3, %s5135_s17  }
  0x2e   : > { %3187 = dma.hbm_to_vmem [thread:$0]  (!%p4260_p6), %s609_s1, 512, %s611_s29, [#allocation19], %s5134_s3, %s5134_s3, %s5135_s17  }
  0x2f   : > { %s499_s28 = sshll.u32 %s5157_s27, 4  ;;  %s5159_s6 = sld [smem:[#allocation35_spill]]  ;;  %s500_s28 = int_to_ptr.hbm [resolvable:$true] %s499_s28 }
  0x30   : > { %3166 = dma.hbm_to_vmem [thread:$0]  (!%p4260_p6), %s500_s28, 16, %s502_s2, [#allocation7]  }
  0x31   : > { %s4104_s27 = smov [#allocation11]   ;;  %s4105_s1 = smov [#allocation14]  }
  0x32   : > { %s525_s11 = sshll.u32 %s5158_s4, 4  ;;  %s527_s14 = sshll.u32 %s4104_s27, 4  ;;  %s526_s11 = int_to_ptr.hbm [resolvable:$true] %s525_s11  ;;  %s528_s14 = int_to_ptr.vmem [resolvable:$true] %s527_s14 }
  0x33   : > { %3172 = dma.hbm_to_vmem [thread:$0]  (!%p4260_p6), %s526_s11, 16, %s528_s14, [#allocation10]  }
  0x34   : > { %s550_s29 = sshll.u32 %s4105_s1, 4  ;;  %s588_s28 = sshll.u32 %s5124_s12, 4  ;;  %s551_s29 = int_to_ptr.vmem [resolvable:$true] %s550_s29  ;;  %s589_s28 = int_to_ptr.hbm [resolvable:$true] %s588_s28 }
  0x35   : > { %s548_s13 = sshll.u32 %s5159_s6, 4  ;;  %s628_s11 = sshll.u32 %s5130_s18, 4  ;;  %s549_s13 = int_to_ptr.hbm [resolvable:$true] %s548_s13  ;;  %s629_s11 = int_to_ptr.hbm [resolvable:$true] %s628_s11 }
  0x36   : > { %3178 = dma.hbm_to_vmem [thread:$0]  (!%p4260_p6), %s549_s13, 2304, %s551_s29, [#allocation13], %s5134_s3, %s5134_s3, %s5135_s17  }
  0x37   : > { %s4106_s23 = smov [#allocation17]   ;;  %s4107_s13 = smov [#allocation20]  }
  0x38   : > { %s590_s16 = sshll.u32 %s4106_s23, 4  ;;  %s630_s27 = sshll.u32 %s4107_s13, 4  ;;  %s591_s16 = int_to_ptr.vmem [resolvable:$true] %s590_s16  ;;  %s631_s27 = int_to_ptr.vmem [resolvable:$true] %s630_s27 }
  0x39   : > { %3184 = dma.hbm_to_vmem [thread:$0]  (!%p4260_p6), %s589_s28, 2304, %s591_s16, [#allocation16], %s5134_s3, %s5134_s3, %s5135_s17  }
  0x3a   : > { %3190 = dma.hbm_to_vmem [thread:$0]  (!%p4260_p6), %s629_s11, 2304, %s631_s27, [#allocation19], %s5134_s3, %s5134_s3, %s5135_s17  }
  0x3b   : > { %s3012_s14 = sadd.s32 4294967294, %s4094_s21   ;;  %s4328_s1 = sadd.s32 1, %s4094_s21  }
  0x3c   : > { %s44_s29 = ssub.s32 %s4094_s21, %s4328_s1  ;;  %s47_s10 = sadd.s32 1, %s4090_s20 }
  0x3d   : > { %p45_p7 = scmp.eq.s32.totalorder %s44_s29, 0  ;;  %p54_p8 = scmp.ne.s32.totalorder %s4090_s20, %s4086_s30 }
  0x3e   : > { %p55_p9 = scmp.eq.s32.totalorder %s4094_s21, 0  ;;  %p60_p10 = scmp.ne.s32.totalorder %s4086_s30, %s4082_s0 }
  0x3f   : > { %s4339_s26 = scalar_select %p45_p7, %s4090_s20, %s47_s10  }
  0x40   : > { %p4341_p11 = por %p55_p9, %p54_p8  ;;  %p4347_p12 = por %p61_p1, %p60_p10 }
  0x41   : > { %p462_p13 = scmp.eq.s32.totalorder %s4243_s24, 1  ;;  %p468_p0 = scmp.eq.s32.totalorder %s3012_s14, 1 }
  0x42   : > { %p3209_p2 = scmp.lt.s32.totalorder %s4094_s21, 2  ;;  %s644_s2 = sand.u32 1, %s4090_s20  }
  0x43   : > { %p4354_p5 = por %p462_p13, %p54_p8  ;;  %p4358_p6 = por %p468_p0, %p60_p10 }
  0x44   : > { %s3025_s23 = sshll.u32 %s644_s2, 6  ;;  %s3094_s16 = sshll.u32 %s4094_s21, 6 }
  0x45   : > { %s5164_s29 = sld [smem:[#allocation29_spill]]  ;;  %s648_s3 = scalar_lea.vmem [#allocation3], %s3025_s23 }
  0x46   : > { %s656_s17 = sshll.u32 %s648_s3, 4  ;;  %p4368_p7 = pnand %p3209_p2, %p4341_p11  ;;  %s657_s17 = int_to_ptr.vmem [resolvable:$true] %s656_s17 }
  0x47   : > { %s645_s5 = scalar_lea.sflag [#allocation4], %s644_s2 }
  0x48   : > { %p3982_p9 = pneg %p4368_p7 }
  0x4b   : > { %s653_s10 = scalar_lea.hbm %s5164_s29, %s3094_s16  ;;  %s3985_s16 = scalar_lea.hbm %s5164_s29, 128 }
  0x4c   : > { %s654_s4 = sshll.u32 %s653_s10, 4  ;;  %s655_s4 = int_to_ptr.hbm [resolvable:$true] %s654_s4 }
  0x4d   : > { %s3978_s6 = sshra.s32 %s655_s4, 4  ;;  %s3979_s6 = int_to_ptr.hbm [resolvable:$true] %s3978_s6 }
  0x4e   : > { %s3980_s9 = scalar_lea.hbm %s3979_s6, 64  ;;  %p3986_p11 = scmp.lt.s32.totalorder %s3979_s6, %s5164_s29 }
  0x4f   : > { %p3981_p8 = scmp.ne.s32.totalorder %s3979_s6, %s3980_s9  ;;  %p3987_p0 = scmp.lt.s32.totalorder %s3985_s16, %s3980_s9 }
  0x51   : > { %p3983_p10 = pnand %p3982_p9, %p3981_p8  ;;  %p3988_p2 = por %p3987_p0, %p3986_p11 }
  0x53   : > { %p3984_p13 = pneg %p3983_p10 }
  0x55   : > { %p3989_p4 = pnand %p3988_p2, %p3984_p13 }
  0x57   : > { %3992 = shalt.err (!%p3989_p4)
}
  0x58   : > { %s5166_s2 = smov 8   ;;  %s5167_s27 = smov 128  }
  0x59   : > { %3194 = dma.hbm_to_vmem [thread:$0]  (!%p4368_p7), %s655_s4, 1024, %s657_s17, %s645_s5, %s5167_s27, %s5167_s27, %s5166_s2  }
  0x5a   : > { %668 = sbr.rel (%p4248_p3) target bundleno = 1791 (0x6ff), region = 96  ;;  %s4388_s10 = sand.u32 (!%p4248_p3), 1, %s4086_s30  }
  0x5b   : > { %s3029_s6 = sshll.u32 (!%p4248_p3), %s4388_s10, 6  ;;  %s671_s9 = scalar_lea.sflag (!%p4248_p3), [#allocation4], %s4388_s10 }
  0x5c   : > { %s4392_s23 = scalar_lea.vmem (!%p4248_p3), [#allocation3], %s3029_s6 }
  0x5f   : > { %4053 = dma.done.wait (%p4347_p12), %s671_s9, 1024  }
  0x60   : > { %4055 = vsyncadd (%p4347_p12), %s671_s9, 4294966272 }
  0x61   : > { %4057 = dma.done.wait (%p61_p1), [#allocation7], 32  }
  0x62   : > { %4059 = vsyncadd (%p61_p1), [#allocation7], 4294967264 }
  0x63   : > { %4061 = dma.done.wait (%p61_p1), [#allocation10], 272  }
  0x64   : > { %4063 = vsyncadd (%p61_p1), [#allocation10], 4294967024 }
  0x65   : > { %4065 = dma.done.wait (%p61_p1), [#allocation13], 2320  }
  0x66   : > { %4067 = vsyncadd (%p61_p1), [#allocation13], 4294964976 }
  0x67   : > { %4069 = dma.done.wait (%p61_p1), [#allocation16], 2688  }
  0x68   : > { %4071 = vsyncadd (%p61_p1), [#allocation16], 4294964608 }
  0x69   : > { %4073 = dma.done.wait (%p61_p1), [#allocation19], 2816  }
  0x6a   : > { %4075 = vsyncadd (%p61_p1), [#allocation19], 4294964480  ;;  %vm780_vm0 = vcmask 130048   ;;  %v865_v0 = vld [vmem:[#allocation9 + $0x8] sm:$0xff]  ;;  %v864_v1 = vld [vmem:[#allocation9] sm:$0xff]  ;;  %s4419_s4 = scalar_lea.vmem [#allocation21], %s3029_s6 }
  0x6b   : > { %v808_v2 = vld [vmem:[%s4392_s23] sm:$0xff]  ;;  %904 = vmatpush.msra.mxu0 %v865_v0  ;;  %v809_v3 = vld [vmem:[%s4392_s23 + $0x8] sm:$0xff]  ;;  %3096 = vmatpush.msra.mxu2 %v865_v0  ;;  %v810_v4 = vld [vmem:[%s4392_s23 + $0x10] sm:$0xff]  ;;  %vm782_vm1 = vcmask 123904   ;;  %v4108_v44 = vmov 0.0   ;;  %vm787_vm2 = vcmask 122880  }
  0x6c   : > { %816 = vst.msk [vmem:[%s4419_s4] sm:$0xff] %vm780_vm0, %v808_v2  ;;  %3097 = vmatpush.msra.mxu3 %v865_v0  ;;  %v3666_v5 = vld [vmem:[#allocation6] ss:$0 sm:$0xff]  ;;  %v811_v6 = vld [vmem:[%s4392_s23 + $0x18] sm:$0xff]  ;;  %v813_v8 = vld [vmem:[%s4392_s23 + $0x28] sm:$0xff]  ;;  %s4109_s5 = smov 16  }
  0x6d   : > { %817 = vst.msk [vmem:[%s4419_s4 + $0x8] sm:$0xff] %vm780_vm0, %v809_v3  ;;  %905 = vmatpush.msra.mxu0 %v864_v1  ;;  %3098 = vmatpush.msra.mxu2 %v864_v1  ;;  %v812_v7 = vld [vmem:[%s4392_s23 + $0x20] sm:$0xff]  ;;  %v814_v10 = vld [vmem:[%s4392_s23 + $0x30] sm:$0xff]  ;;  %v815_v11 = vld [vmem:[%s4392_s23 + $0x38] sm:$0xff]  ;;  %s4110_s17 = smov 80   ;;  %s4111_s25 = smov 48  }
  0x6e   : > { %818 = vst.msk [vmem:[%s4419_s4 + $0x10] sm:$0xff] %vm780_vm0, %v810_v4  ;;  %3099 = vmatpush.msra.mxu3 %v864_v1  ;;  %v3667_v9 = vld [vmem:[#allocation8] ss:$0 sm:$0xff]  ;;  %v1347_v46 = vld [vmem:[#allocation14 + $0x80] sm:$0xff]  ;;  %v3668_v47 = vld [vmem:[#allocation11] ss:$0 sm:$0xff] }
  0x6f   : > { %819 = vst.msk [vmem:[%s4419_s4 + $0x18] sm:$0xff] %vm780_vm0, %v811_v6  ;;  %v1348_v45 = vld [vmem:[#allocation14 + $0x88] sm:$0xff]  ;;  %v3669_v48 = vld [vmem:[#allocation12] ss:$0 sm:$0xff]  ;;  %s4112_s28 = smov 32   ;;  %s4113_s14 = smov 96  }
  0x70   : > { %820 = vst.msk [vmem:[%s4419_s4 + $0x20] sm:$0xff] %vm780_vm0, %v812_v7  ;;  %1428 = vmatpush.msrb.mxu2 %v1348_v45  ;;  %s4114_s3 = smov 64   ;;  %s4115_s16 = smov 112   ;;  %vm1277_vm3 = vcmask 261120   ;;  %vm1286_vm4 = vcmask 392192   ;;  %vm1295_vm5 = vcmask 523264  }
  0x71   : > { %821 = vst.msk [vmem:[%s4419_s4 + $0x28] sm:$0xff] %vm780_vm0, %v813_v8  ;;  %vm1304_vm6 = vcmask 654336   ;;  %vm1313_vm7 = vcmask 785408   ;;  %vm1322_vm8 = vcmask 916480   ;;  %vm1487_vm9 = vcmask 195712   ;;  %s5168_s23 = sld [smem:[#allocation37_spill]] }
  0x72   : > { %822 = vst.msk [vmem:[%s4419_s4 + $0x30] sm:$0xff] %vm780_vm0, %v814_v10  ;;  %1429 = vmatpush.msrb.mxu2 %v1347_v46  ;;  %vm1539_vm10 = vcmask 195584   ;;  %s5169_s2 = sld [smem:[#allocation38_spill]]  ;;  %s4116_s27 = smov 24   ;;  %vm2153_vm11 = vcmask 261312   ;;  %vm2819_vm12 = vcmask 326912  }
  0x73   : > { %v824_v12 = vld [vmem:[%s4419_s4] sm:$0xff]  ;;  %823 = vst.msk [vmem:[%s4419_s4 + $0x38] sm:$0xff] %vm780_vm0, %v815_v11  ;;  %s5172_s9 = sld [smem:[#allocation41_spill]] }
  0x74   : > { %v836_v13 = vmul.f32 %v3666_v5, %v824_v12  ;;  %v825_v14 = vld [vmem:[%s4419_s4 + $0x8] sm:$0xff]  ;;  %781 = vst.msk [vmem:[#allocation2] sm:$0xff] %vm780_vm0, %v4108_v44  ;;  %s5173_s22 = sld [smem:[#allocation42_spill]] }
  0x75   : > { %v837_v16 = vmul.f32 %v3666_v5, %v825_v14  ;;  %v826_v24 = vld [vmem:[%s4419_s4 + $0x10] sm:$0xff]  ;;  %783 = vst.msk [vmem:[#allocation2 + $0x8] sm:$0x3] %vm782_vm1, %v4108_v44 }
  0x76   : > { %v848_v15 = vadd.f32 %v3667_v9, %v836_v13  ;;  %v838_v29 = vmul.f32 %v3666_v5, %v826_v24  ;;  %v827_v37 = vld [vmem:[%s4419_s4 + $0x18] sm:$0xff]  ;;  %785 = vst.msk [vmem:[#allocation2 + $0x90] sm:$0xff] %vm780_vm0, %v4108_v44 }
  0x77   : > { %v828_v17 = vld [vmem:[%s4419_s4 + $0x20] sm:$0xff]  ;;  %v849_v21 = vadd.f32 %v3667_v9, %v837_v16  ;;  %v839_v39 = vmul.f32 %v3666_v5, %v827_v37  ;;  %786 = vst.msk [vmem:[#allocation2 + $0x98] sm:$0x3] %vm782_vm1, %v4108_v44 }
  0x78   : > { %v856_v18 = vmax.f32 %v848_v15, 0.0  ;;  %v840_v19 = vmul.f32 %v3666_v5, %v828_v17  ;;  %v829_v20 = vld [vmem:[%s4419_s4 + $0x28] sm:$0xff]  ;;  %v850_v34 = vadd.f32 %v3667_v9, %v838_v29  ;;  %800 = vst.msk [vmem:[#allocation2 + $0x29] sm:$0x1] %vm787_vm2, %v4108_v44 }
  0x79   : > { %v841_v23 = vmul.f32 %v3666_v5, %v829_v20  ;;  %v857_v28 = vmax.f32 %v849_v21, 0.0  ;;  %v830_v32 = vld [vmem:[%s4419_s4 + $0x30] sm:$0xff]  ;;  %v851_v41 = vadd.f32 %v3667_v9, %v839_v39  ;;  %788 = vst.msk [vmem:[#allocation2] sm:$0x1] %vm787_vm2, %v4108_v44 }
  0x7a   : > { %3041 = vmatmul.msk.f32.vlgmr.msra.gmra.mxu0 %vm780_vm0, %v856_v18  ;;  %v852_v22 = vadd.f32 %v3667_v9, %v840_v19  ;;  %v831_v25 = vld [vmem:[%s4419_s4 + $0x38] sm:$0xff]  ;;  %v842_v36 = vmul.f32 %v3666_v5, %v830_v32  ;;  %v858_v38 = vmax.f32 %v850_v34, 0.0  ;;  %789 = vst.msk [vmem:[#allocation2 + $0x10] sm:$0x1] %vm787_vm2, %v4108_v44 }
  0x7b   : > { %v843_v27 = vmul.f32 %v3666_v5, %v831_v25  ;;  %v853_v30 = vadd.f32 %v3667_v9, %v841_v23  ;;  %v859_v43 = vmax.f32 %v851_v41, 0.0  ;;  %790 = vst.msk [vmem:[#allocation2 + $0x20] sm:$0x1] %vm787_vm2, %v4108_v44 }
  0x7c   : > { %v860_v26 = vmax.f32 %v852_v22, 0.0  ;;  %v854_v40 = vadd.f32 %v3667_v9, %v842_v36  ;;  %791 = vst.msk [vmem:[#allocation2 + $0x30] sm:$0x1] %vm787_vm2, %v4108_v44  ;;  %v4483_v58 = vld [vmem:[#allocation2 + $0x1] sm:$0xff] }
  0x7d   : > { %v855_v31 = vadd.f32 %v3667_v9, %v843_v27  ;;  %v861_v35 = vmax.f32 %v853_v30, 0.0  ;;  %792 = vst.msk [vmem:[#allocation2 + $0x40] sm:$0x1] %vm787_vm2, %v4108_v44 }
  0x7e   : > { %3045 = vmatmul.msk.f32.vlgmr.msra.gmra.mxu2 %vm780_vm0, %v860_v26  ;;  %v862_v42 = vmax.f32 %v854_v40, 0.0  ;;  %793 = vst.msk [vmem:[#allocation2 + $0x50] sm:$0x1] %vm787_vm2, %v4108_v44 }
  0x7f   : > { %v863_v33 = vmax.f32 %v855_v31, 0.0  ;;  %794 = vst.msk [vmem:[#allocation2 + $0x60] sm:$0x1] %vm787_vm2, %v4108_v44 }
  0x80   : > { %795 = vst.msk [vmem:[#allocation2 + $0x70] sm:$0x1] %vm787_vm2, %v4108_v44 }
  0x81   : > { %3048 = vmatmul.msk.f32.vlgmr.msra.gmra.mxu3 %vm780_vm0, %v863_v33  ;;  %796 = vst.msk [vmem:[#allocation2 + $0x80] sm:$0x1] %vm787_vm2, %v4108_v44 }
  0x82   : > { %3042 = vmatmul.msk.f32.gmra.mxu0 %vm780_vm0, %v857_v28  ;;  %797 = vst.msk [vmem:[#allocation2 + $0x90] sm:$0x1] %vm787_vm2, %v4108_v44 }
  0x83   : > { %798 = vst.msk [vmem:[#allocation2 + $0x9] sm:$0x1] %vm787_vm2, %v4108_v44 }
  0x84   : > { %799 = vst.msk [vmem:[#allocation2 + $0x19] sm:$0x1] %vm787_vm2, %v4108_v44 }
  0x85   : > { %801 = vst.msk [vmem:[#allocation2 + $0x39] sm:$0x1] %vm787_vm2, %v4108_v44 }
  0x86   : > { %3046 = vmatmul.msk.f32.gmra.mxu2 %vm780_vm0, %v861_v35  ;;  %802 = vst.msk [vmem:[#allocation2 + $0x49] sm:$0x1] %vm787_vm2, %v4108_v44 }
  0x87   : > { %803 = vst.msk [vmem:[#allocation2 + $0x59] sm:$0x1] %vm787_vm2, %v4108_v44 }
  0x88   : > { %804 = vst.msk [vmem:[#allocation2 + $0x69] sm:$0x1] %vm787_vm2, %v4108_v44 }
  0x89   : > { %805 = vst.msk [vmem:[#allocation2 + $0x79] sm:$0x1] %vm787_vm2, %v4108_v44 }
  0x8a   : > { %3043 = vmatmul.msk.f32.gmra.mxu0 %vm780_vm0, %v858_v38  ;;  %806 = vst.msk [vmem:[#allocation2 + $0x89] sm:$0x1] %vm787_vm2, %v4108_v44  ;;  %v4489_v7 = vld [vmem:[#allocation2 + $0x2] sm:$0xff] }
  0x8b   : > { %807 = vst.msk [vmem:[#allocation2 + $0x99] sm:$0x1] %vm787_vm2, %v4108_v44 }
  0x8e   : > { %3047 = vmatmul.msk.f32.gmra.mxu2 %vm780_vm0, %v862_v42 }
  0x92   : > { %3044 = vmatmul.msk.f32.gmra.mxu0 %vm780_vm0, %v859_v43 }
  0xf7   : > { %v907_v49 = vpop.f32.mrf.mxu0 }
  0xf8   : > { %v935_v50 = vmul.f32 %v3668_v47, %v907_v49 }
  0xfa   : > { %v947_v51 = vadd.f32 %v3669_v48, %v935_v50 }
  0xfc   : > { %v955_v52 = vmax.f32 %v947_v51, 0.0 }
  0xfe   : > { %964 = vst.msk [vmem:[#allocation2 + $0x11] sm:$0xff] %vm780_vm0, %v955_v52 }
  0xff   : > { %v910_v53 = vpop.f32.mrf.mxu0 }
 0x100   : > { %v936_v54 = vmul.f32 %v3668_v47, %v910_v53 }
 0x101   : > { %v919_v55 = vpop.f32.mrf.mxu2 }
 0x102   : > { %v948_v56 = vadd.f32 %v3669_v48, %v936_v54  ;;  %v939_v57 = vmul.f32 %v3668_v47, %v919_v55 }
 0x104   : > { %v956_v59 = vmax.f32 %v948_v56, 0.0  ;;  %v951_v60 = vadd.f32 %v3669_v48, %v939_v57  ;;  %v928_v19 = vpop.f32.mrf.mxu3 }
 0x105   : > { %v981_v61 = vld [vmem:[#allocation2 + $0x11] sm:$0xff]  ;;  %v942_v22 = vmul.f32 %v3668_v47, %v928_v19 }
 0x106   : > { %965 = vst.msk [vmem:[#allocation2 + $0x21] sm:$0xff] %vm780_vm0, %v956_v59  ;;  %v3276_v62 = vpack.i.bf16 %v981_v61, %v4483_v58  ;;  %v959_v63 = vmax.f32 %v951_v60, 0.0  ;;  %v1012_v6 = vld [vmem:[#allocation2 + $0x12] sm:$0xff] }
 0x107   : > { %v913_v0 = vpop.f32.mrf.mxu0  ;;  %v4491_v10 = vld [vmem:[#allocation2 + $0x10] sm:$0xff]  ;;  %v3281_v16 = vpack.i.bf16 %v1012_v6, %v4489_v7  ;;  %v954_v26 = vadd.f32 %v3669_v48, %v942_v22  ;;  %v1331_v22 = vld [vmem:[#allocation14] sm:$0xff] }
 0x108   : > { %v937_v1 = vmul.f32 %v3668_v47, %v913_v0  ;;  %3277 = vrot.lane.b32.xlu0 %v3276_v62, %s4109_s5  ;;  %968 = vst.msk [vmem:[#allocation2 + $0x51] sm:$0xff] %vm780_vm0, %v959_v63  ;;  %v1334_v19 = vld [vmem:[#allocation14 + $0x18] sm:$0xff] }
 0x109   : > { %v922_v2 = vpop.f32.mrf.mxu2  ;;  %v962_v34 = vmax.f32 %v954_v26, 0.0 }
 0x10a   : > { %v949_v3 = vadd.f32 %v3669_v48, %v937_v1  ;;  %v940_v4 = vmul.f32 %v3668_v47, %v922_v2  ;;  %v1346_v2 = vld [vmem:[#allocation14 + $0x78] sm:$0xff] }
 0x10b   : > { %971 = vst.msk [vmem:[#allocation2 + $0x81] sm:$0xff] %vm780_vm0, %v962_v34  ;;  %1373 = vmatpush.msra.mxu1 %v1346_v2 }
 0x10c   : > { %v957_v5 = vmax.f32 %v949_v3, 0.0  ;;  %v952_v8 = vadd.f32 %v3669_v48, %v940_v4  ;;  %v1345_v3 = vld [vmem:[#allocation14 + $0x70] sm:$0xff]  ;;  %v1344_v4 = vld [vmem:[#allocation14 + $0x68] sm:$0xff] }
 0x10d   : > { %v1037_v9 = vld [vmem:[#allocation2 + $0x22] sm:$0xff]  ;;  %1374 = vmatpush.msra.mxu1 %v1345_v3 }
 0x10e   : > { %v4493_v11 = vld [vmem:[#allocation2 + $0x20] sm:$0xff]  ;;  %966 = vst.msk [vmem:[#allocation2 + $0x31] sm:$0xff] %vm780_vm0, %v957_v5  ;;  %3049 = vmatmul.msk.f32.vlgmr.msrb.gmra.mxu2 %vm780_vm0, %v1037_v9  ;;  %v3296_v12 = vpack.i.bf16 %v1037_v9, %v1012_v6  ;;  %v960_v14 = vmax.f32 %v952_v8, 0.0  ;;  %v4558_v5 = vld [vmem:[#allocation2 + $0x90] sm:$0xff]  ;;  %v1343_v8 = vld [vmem:[#allocation14 + $0x60] sm:$0xff] }
 0x10f   : > { %v3286_v13 = vpack.i.bf16 %v4493_v11, %v4491_v10  ;;  %v916_v15 = vpop.f32.mrf.mxu0  ;;  %v1005_v23 = vld [vmem:[#allocation2 + $0x21] sm:$0xff]  ;;  %v4523_v39 = vld [vmem:[#allocation2 + $0x50] sm:$0xff]  ;;  %1375 = vmatpush.msra.mxu1 %v1344_v4 }
 0x110   : > { %v938_v17 = vmul.f32 %v3668_v47, %v916_v15  ;;  %3297 = vrot.lane.b32.xlu2 %v3296_v12, %s4110_s17  ;;  %969 = vst.msk [vmem:[#allocation2 + $0x61] sm:$0xff] %vm780_vm0, %v960_v14  ;;  %3282 = vrot.lane.b32.xlu0 %v3281_v16, %s4112_s28  ;;  %v3291_v31 = vpack.i.bf16 %v1005_v23, %v981_v61  ;;  %v1040_v42 = vld [vmem:[#allocation2 + $0x52] sm:$0xff]  ;;  %v1341_v12 = vld [vmem:[#allocation14 + $0x50] sm:$0xff] }
 0x111   : > { %3287 = vrot.lane.b32.xlu1 %v3286_v13, %s4111_s25  ;;  %v925_v18 = vpop.f32.mrf.mxu2  ;;  %v4560_v6 = vld [vmem:[#allocation2 + $0x91] sm:$0xff]  ;;  %1376 = vmatpush.msra.mxu1 %v1343_v8  ;;  %v1340_v13 = vld [vmem:[#allocation14 + $0x48] sm:$0xff]  ;;  %v1337_v16 = vld [vmem:[#allocation14 + $0x30] sm:$0xff] }
 0x112   : > { %v950_v20 = vadd.f32 %v3669_v48, %v938_v17  ;;  %v941_v21 = vmul.f32 %v3668_v47, %v925_v18  ;;  %v1008_v47 = vld [vmem:[#allocation2 + $0x51] sm:$0xff]  ;;  %v1043_v57 = vld [vmem:[#allocation2 + $0x82] sm:$0xff] }
 0x113   : > { %v1003_v61 = vld [vmem:[#allocation2 + $0x80] sm:$0xff]  ;;  %v1339_v14 = vld [vmem:[#allocation14 + $0x40] sm:$0xff]  ;;  %v1338_v15 = vld [vmem:[#allocation14 + $0x38] sm:$0xff] }
 0x114   : > { %v958_v24 = vmax.f32 %v950_v20, 0.0  ;;  %v953_v25 = vadd.f32 %v3669_v48, %v941_v21  ;;  %v1011_v62 = vld [vmem:[#allocation2 + $0x81] sm:$0xff]  ;;  %v1335_v18 = vld [vmem:[#allocation14 + $0x20] sm:$0xff] }
 0x115   : > { %v4504_v27 = vld [vmem:[#allocation2 + $0x30] sm:$0xff]  ;;  %v1336_v17 = vld [vmem:[#allocation14 + $0x28] sm:$0xff]  ;;  %v1333_v20 = vld [vmem:[#allocation14 + $0x10] sm:$0xff] }
 0x116   : > { %v1030_v28 = vld [vmem:[#allocation2 + $0x31] sm:$0xff]  ;;  %967 = vst.msk [vmem:[#allocation2 + $0x41] sm:$0xff] %vm780_vm0, %v958_v24  ;;  %v3301_v30 = vpack.i.bf16 %v4504_v27, %v4493_v11  ;;  %v961_v33 = vmax.f32 %v953_v25, 0.0  ;;  %v1332_v21 = vld [vmem:[#allocation14 + $0x8] sm:$0xff] }
 0x117   : > { %v1038_v29 = vld [vmem:[#allocation2 + $0x32] sm:$0xff]  ;;  %v3306_v32 = vpack.i.bf16 %v1030_v28, %v1005_v23  ;;  %v1009_v45 = vld [vmem:[#allocation2 + $0x61] sm:$0xff] }
 0x118   : > { %3050 = vmatmul.msk.f32.gmra.mxu2 %vm780_vm0, %v1038_v29  ;;  %3302 = vrot.lane.b32.xlu2 %v3301_v30, %s4113_s14  ;;  %970 = vst.msk [vmem:[#allocation2 + $0x71] sm:$0xff] %vm780_vm0, %v961_v33  ;;  %v3316_v37 = vpack.i.bf16 %v1038_v29, %v1037_v9  ;;  %v1017_v46 = vld [vmem:[#allocation2 + $0x62] sm:$0xff]  ;;  %v3351_v48 = vpack.i.bf16 %v1009_v45, %v1008_v47  ;;  %v1342_v9 = vld [vmem:[#allocation14 + $0x58] sm:$0xff] }
 0x119   : > { %3292 = vrot.lane.b32.xlu1 %v3291_v31, %s4114_s3  ;;  %3307 = vrot.lane.b32.xlu0 %v3306_v32, %s4115_s16  ;;  %v3356_v49 = vpack.i.bf16 %v1017_v46, %v1040_v42  ;;  %v4535_v51 = vld [vmem:[#allocation2 + $0x60] sm:$0xff] }
 0x11a   : > { %v3346_v53 = vpack.i.bf16 %v4535_v51, %v4523_v39  ;;  %1377 = vmatpush.msra.mxu1 %v1342_v9  ;;  %v4567_v31 = vld [vmem:[#allocation2] sm:$0xff] }
 0x11c   : > { %1378 = vmatpush.msra.mxu1 %v1341_v12 }
 0x11d   : > { %v4515_v35 = vld [vmem:[#allocation2 + $0x40] sm:$0xff] }
 0x11e   : > { %v1039_v36 = vld [vmem:[#allocation2 + $0x42] sm:$0xff]  ;;  %v3321_v38 = vpack.i.bf16 %v4515_v35, %v4504_v27  ;;  %v3336_v41 = vpack.i.bf16 %v4523_v39, %v4515_v35  ;;  %1379 = vmatpush.msra.mxu1 %v1340_v13 }
 0x11f   : > { %v1007_v40 = vld [vmem:[#allocation2 + $0x41] sm:$0xff]  ;;  %v3331_v43 = vpack.i.bf16 %v1039_v36, %v1038_v29  ;;  %v1042_v52 = vld [vmem:[#allocation2 + $0x72] sm:$0xff]  ;;  %v3376_v54 = vpack.i.bf16 %v1040_v42, %v1039_v36 }
 0x120   : > { %3051 = vmatmul.msk.f32.gmra.mxu2 %vm780_vm0, %v1039_v36  ;;  %3317 = vrot.lane.b32.xlu2 %v3316_v37, %s4112_s28  ;;  %v3326_v44 = vpack.i.bf16 %v1007_v40, %v1030_v28  ;;  %v3341_v50 = vpack.i.bf16 %v1008_v47, %v1007_v40  ;;  %v1034_v55 = vld [vmem:[#allocation2 + $0x71] sm:$0xff]  ;;  %v3386_v0 = vpack.i.bf16 %v1042_v52, %v1017_v46 }
 0x121   : > { %3312 = vrot.lane.b32.xlu1 %v3306_v32, %s4109_s5  ;;  %3322 = vrot.lane.b32.xlu0 %v3321_v38, %s4111_s25  ;;  %v4543_v56 = vld [vmem:[#allocation2 + $0x70] sm:$0xff]  ;;  %v3371_v59 = vpack.i.bf16 %v1034_v55, %v1009_v45  ;;  %v3396_v1 = vpack.i.bf16 %v1011_v62, %v1034_v55 }
 0x122   : > { %v3361_v60 = vpack.i.bf16 %v4543_v56, %v4535_v51  ;;  %v3391_v63 = vpack.i.bf16 %v1003_v61, %v4543_v56  ;;  %1380 = vmatpush.msra.mxu1 %v1339_v14 }
 0x124   : > { %1381 = vmatpush.msra.mxu1 %v1338_v15 }
 0x126   : > { %1382 = vmatpush.msra.mxu1 %v1337_v16 }
 0x128   : > { %3052 = vmatmul.msk.f32.gmra.mxu2 %vm780_vm0, %v1040_v42  ;;  %3332 = vrot.lane.b32.xlu2 %v3331_v43, %s4110_s17 }
 0x129   : > { %3327 = vrot.lane.b32.xlu1 %v3326_v44, %s4114_s3  ;;  %3337 = vrot.lane.b32.xlu0 %v3336_v41, %s4113_s14 }
 0x12a   : > { %1383 = vmatpush.msra.mxu1 %v1336_v17 }
 0x12c   : > { %1384 = vmatpush.msra.mxu1 %v1335_v18 }
 0x12e   : > { %1385 = vmatpush.msra.mxu1 %v1334_v19 }
 0x130   : > { %3053 = vmatmul.msk.f32.gmra.mxu2 %vm780_vm0, %v1017_v46  ;;  %3352 = vrot.lane.b32.xlu2 %v3351_v48, %s4114_s3 }
 0x131   : > { %3342 = vrot.lane.b32.xlu1 %v3341_v50, %s4115_s16  ;;  %3357 = vrot.lane.b32.xlu0 %v3356_v49, %s4110_s17 }
 0x132   : > { %1386 = vmatpush.msra.mxu1 %v1333_v20 }
 0x134   : > { %1387 = vmatpush.msra.mxu1 %v1332_v21 }
 0x136   : > { %1388 = vmatpush.msra.mxu1 %v1331_v22 }
 0x138   : > { %3054 = vmatmul.msk.f32.gmra.mxu2 %vm780_vm0, %v1042_v52  ;;  %3367 = vrot.lane.b32.xlu2 %v3341_v50, %s4109_s5 }
 0x139   : > { %3347 = vrot.lane.b32.xlu1 %v3346_v53, %s4111_s25  ;;  %3377 = vrot.lane.b32.xlu0 %v3376_v54, %s4112_s28 }
 0x140   : > { %3055 = vmatmul.msk.f32.gmra.mxu2 %vm780_vm0, %v1043_v57  ;;  %3372 = vrot.lane.b32.xlu2 %v3371_v59, %s4115_s16 }
 0x141   : > { %3362 = vrot.lane.b32.xlu1 %v3361_v60, %s4113_s14  ;;  %3382 = vrot.lane.b32.xlu0 %v3371_v59, %s4109_s5 }
 0x148   : > { %3392 = vrot.lane.b32.xlu2 %v3391_v63, %s4111_s25 }
 0x149   : > { %3387 = vrot.lane.b32.xlu1 %v3386_v0, %s4112_s28  ;;  %3397 = vrot.lane.b32.xlu0 %v3396_v1, %s4114_s3 }
 0x150   : > { %1225 = vrot.lane.b32.xlu2 %v1003_v61, %s4113_s14 }
 0x151   : > { %1193 = vrot.lane.b32.xlu1 %v1042_v52, %s4110_s17  ;;  %1257 = vrot.lane.b32.xlu0 %v1011_v62, %s4115_s16 }
 0x158   : > { %1227 = vrot.lane.b32.xlu2 %v4558_v5, %s4113_s14 }
 0x159   : > { %1195 = vrot.lane.b32.xlu1 %v1043_v57, %s4110_s17  ;;  %1259 = vrot.lane.b32.xlu0 %v4560_v6, %s4115_s16 }
 0x16a   : > { %v3298_v23 = vpop.permute.xlu2 %3297 }
 0x16b   : > { %v3299_v47 = vunpack.i.l.bf16 %v3298_v23  ;;  %v3300_v59 = vunpack.i.h.bf16 %v3298_v23 }
 0x172   : > { %v3303_v25 = vpop.permute.xlu2 %3302 }
 0x173   : > { %v3304_v49 = vunpack.i.l.bf16 %v3303_v25  ;;  %v3305_v63 = vunpack.i.h.bf16 %v3303_v25 }
 0x17a   : > { %v3278_v24 = vpop.permute.xlu0 %3277  ;;  %v3318_v30 = vpop.permute.xlu2 %3317 }
 0x17b   : > { %v3279_v29 = vunpack.i.l.bf16 %v3278_v24  ;;  %v3280_v33 = vunpack.i.h.bf16 %v3278_v24  ;;  %v3319_v8 = vunpack.i.l.bf16 %v3318_v30  ;;  %v3320_v22 = vunpack.i.h.bf16 %v3318_v30 }
 0x17d   : > { %v1269_v36 = vsel %vm780_vm0, %v4567_v31, %v3279_v29  ;;  %v1270_v40 = vsel %vm780_vm0, %v4491_v10, %v3280_v33 }
 0x182   : > { %v3283_v28 = vpop.permute.xlu0 %3282  ;;  %v3333_v54 = vpop.permute.xlu2 %3332 }
 0x183   : > { %v3288_v26 = vpop.permute.xlu1 %3287  ;;  %v3284_v32 = vunpack.i.l.bf16 %v3283_v28  ;;  %v3285_v34 = vunpack.i.h.bf16 %v3283_v28  ;;  %v3334_v21 = vunpack.i.l.bf16 %v3333_v54  ;;  %v3335_v30 = vunpack.i.h.bf16 %v3333_v54 }
 0x184   : > { %v3289_v37 = vunpack.i.l.bf16 %v3288_v26  ;;  %v3290_v41 = vunpack.i.h.bf16 %v3288_v26 }
 0x185   : > { %v1278_v38 = vsel %vm1277_vm3, %v1269_v36, %v3284_v32  ;;  %v1279_v43 = vsel %vm1277_vm3, %v1270_v40, %v3285_v34  ;;  %v4600_v40 = vld [vmem:[#allocation2 + $0x92] sm:$0xff] }
 0x186   : > { %v1287_v48 = vsel %vm1286_vm4, %v1278_v38, %v3289_v37  ;;  %v1288_v52 = vsel %vm1286_vm4, %v1279_v43, %v3290_v41  ;;  %3056 = vmatmul.msk.f32.gmra.mxu2 %vm780_vm0, %v4600_v40 }
 0x18a   : > { %v4587_v12 = vpop.permute.xlu2 %3352 }
 0x18b   : > { %v3293_v42 = vpop.permute.xlu1 %3292  ;;  %v3308_v46 = vpop.permute.xlu0 %3307 }
 0x18c   : > { %v3295_v44 = vunpack.i.h.bf16 %v3293_v42  ;;  %v3294_v45 = vunpack.i.l.bf16 %v3293_v42  ;;  %v3309_v10 = vunpack.i.l.bf16 %v3308_v46  ;;  %v3310_v3 = vunpack.i.h.bf16 %v3308_v46 }
 0x18e   : > { %v1296_v50 = vsel %vm1295_vm5, %v1287_v48, %v3294_v45  ;;  %v1297_v55 = vsel %vm1295_vm5, %v1288_v52, %v3295_v44 }
 0x18f   : > { %v1305_v53 = vsel %vm1304_vm6, %v1296_v50, %v3299_v47  ;;  %v1306_v62 = vsel %vm1304_vm6, %v1297_v55, %v3300_v59 }
 0x190   : > { %v1314_v57 = vsel %vm1313_vm7, %v1305_v53, %v3304_v49  ;;  %v1315_v2 = vsel %vm1313_vm7, %v1306_v62, %v3305_v63 }
 0x191   : > { %v1323_v60 = vsel %vm1322_vm8, %v1314_v57, %v3309_v10  ;;  %v1324_v9 = vsel %vm1322_vm8, %v1315_v2, %v3310_v3  ;;  %v3354_v57 = vunpack.i.l.bf16 %v4587_v12 }
 0x192   : > { %1389 = vmatmul.f32.vlgmr.msra.gmra.mxu1 %v1323_v60  ;;  %v3368_v29 = vpop.permute.xlu2 %3367 }
 0x193   : > { %v3313_v61 = vpop.permute.xlu1 %3312  ;;  %v3323_v1 = vpop.permute.xlu0 %3322  ;;  %v3369_v41 = vunpack.i.l.bf16 %v3368_v29  ;;  %v3370_v48 = vunpack.i.h.bf16 %v3368_v29 }
 0x194   : > { %v3314_v0 = vunpack.i.l.bf16 %v3313_v61  ;;  %v3315_v15 = vunpack.i.h.bf16 %v3313_v61  ;;  %v3324_v16 = vunpack.i.l.bf16 %v3323_v1  ;;  %v3325_v32 = vunpack.i.h.bf16 %v3323_v1 }
 0x195   : > { %v1273_v52 = vsel %vm780_vm0, %v4515_v35, %v3369_v41  ;;  %v1274_v60 = vsel %vm780_vm0, %v4523_v39, %v3370_v48 }
 0x196   : > { %v1271_v4 = vsel %vm780_vm0, %v4493_v11, %v3314_v0  ;;  %v1272_v11 = vsel %vm780_vm0, %v4504_v27, %v3315_v15 }
 0x197   : > { %v1280_v13 = vsel %vm1277_vm3, %v1271_v4, %v3319_v8  ;;  %v1281_v24 = vsel %vm1277_vm3, %v1272_v11, %v3320_v22 }
 0x198   : > { %v1289_v19 = vsel %vm1286_vm4, %v1280_v13, %v3324_v16  ;;  %v1290_v37 = vsel %vm1286_vm4, %v1281_v24, %v3325_v32 }
 0x19a   : > { %1392 = vmatmul.f32.gmra.mxu1 %v1324_v9  ;;  %v3373_v10 = vpop.permute.xlu2 %3372  ;;  %v3355_v9 = vunpack.i.h.bf16 %v4587_v12 }
 0x19b   : > { %v3328_v14 = vpop.permute.xlu1 %3327  ;;  %v3338_v18 = vpop.permute.xlu0 %3337  ;;  %v3374_v3 = vunpack.i.l.bf16 %v3373_v10 }
 0x19c   : > { %v3329_v17 = vunpack.i.l.bf16 %v3328_v14  ;;  %v3330_v25 = vunpack.i.h.bf16 %v3328_v14  ;;  %v3339_v26 = vunpack.i.l.bf16 %v3338_v18  ;;  %v3340_v44 = vunpack.i.h.bf16 %v3338_v18 }
 0x19e   : > { %v1298_v20 = vsel %vm1295_vm5, %v1289_v19, %v3329_v17  ;;  %v1299_v27 = vsel %vm1295_vm5, %v1290_v37, %v3330_v25 }
 0x19f   : > { %v1307_v23 = vsel %vm1304_vm6, %v1298_v20, %v3334_v21  ;;  %v1308_v43 = vsel %vm1304_vm6, %v1299_v27, %v3335_v30 }
 0x1a0   : > { %v1316_v36 = vsel %vm1313_vm7, %v1307_v23, %v3339_v26  ;;  %v1317_v50 = vsel %vm1313_vm7, %v1308_v43, %v3340_v44  ;;  %v3375_v23 = vunpack.i.h.bf16 %v3373_v10  ;;  %v1431_v10 = vpop.f32.mrf.mxu2 }
 0x1a2   : > { %v3393_v14 = vpop.permute.xlu2 %3392 }
 0x1a3   : > { %v3343_v28 = vpop.permute.xlu1 %3342  ;;  %v3358_v34 = vpop.permute.xlu0 %3357  ;;  %v3394_v24 = vunpack.i.l.bf16 %v3393_v14 }
 0x1a4   : > { %v3344_v33 = vunpack.i.l.bf16 %v3343_v28  ;;  %v3345_v42 = vunpack.i.h.bf16 %v3343_v28  ;;  %v3359_v35 = vunpack.i.l.bf16 %v3358_v34  ;;  %v3360_v17 = vunpack.i.h.bf16 %v3358_v34 }
 0x1a6   : > { %v1325_v38 = vsel %vm1322_vm8, %v1316_v36, %v3344_v33  ;;  %v1326_v54 = vsel %vm1322_vm8, %v1317_v50, %v3345_v42  ;;  %v3395_v42 = vunpack.i.h.bf16 %v3393_v14 }
 0x1a7   : > { %1395 = vmatmul.f32.gmra.mxu1 %v1325_v38 }
 0x1aa   : > { %v1226_v34 = vpop.permute.xlu2 %1225 }
 0x1ab   : > { %v3348_v45 = vpop.permute.xlu1 %3347  ;;  %v3378_v47 = vpop.permute.xlu0 %3377 }
 0x1ac   : > { %v3349_v46 = vunpack.i.l.bf16 %v3348_v45  ;;  %v3379_v49 = vunpack.i.l.bf16 %v3378_v47  ;;  %v3380_v53 = vunpack.i.h.bf16 %v3378_v47  ;;  %v3350_v61 = vunpack.i.h.bf16 %v3348_v45 }
 0x1ae   : > { %v1282_v55 = vsel %vm1277_vm3, %v1273_v52, %v3379_v49  ;;  %v1283_v62 = vsel %vm1277_vm3, %v1274_v60, %v3380_v53 }
 0x1af   : > { %1398 = vmatmul.f32.gmra.mxu1 %v1326_v54  ;;  %v1291_v59 = vsel %vm1286_vm4, %v1282_v55, %v3349_v46  ;;  %v1292_v4 = vsel %vm1286_vm4, %v1283_v62, %v3350_v61  ;;  %v1434_v55 = vpop.f32.mrf.mxu2 }
 0x1b0   : > { %v1300_v63 = vsel %vm1295_vm5, %v1291_v59, %v3354_v57  ;;  %v1301_v16 = vsel %vm1295_vm5, %v1292_v4, %v3355_v9 }
 0x1b1   : > { %v1309_v8 = vsel %vm1304_vm6, %v1300_v63, %v3359_v35  ;;  %v1310_v20 = vsel %vm1304_vm6, %v1301_v16, %v3360_v17 }
 0x1b2   : > { %v1228_v46 = vpop.permute.xlu2 %1227 }
 0x1b3   : > { %v3363_v0 = vpop.permute.xlu1 %3362  ;;  %v3383_v2 = vpop.permute.xlu0 %3382 }
 0x1b4   : > { %v3364_v1 = vunpack.i.l.bf16 %v3363_v0  ;;  %v3365_v15 = vunpack.i.h.bf16 %v3363_v0  ;;  %v3384_v18 = vunpack.i.l.bf16 %v3383_v2  ;;  %v3385_v28 = vunpack.i.h.bf16 %v3383_v2 }
 0x1b6   : > { %v1318_v13 = vsel %vm1313_vm7, %v1309_v8, %v3364_v1  ;;  %v1319_v22 = vsel %vm1313_vm7, %v1310_v20, %v3365_v15  ;;  %v1275_v12 = vsel %vm780_vm0, %v4535_v51, %v3384_v18  ;;  %v1276_v38 = vsel %vm780_vm0, %v4543_v56, %v3385_v28  ;;  %v1538_v18 = vld [vmem:[#allocation15 + $0x10] sm:$0xff]  ;;  %v1536_v20 = vld [vmem:[#allocation15] sm:$0xff] }
 0x1b7   : > { %v1327_v39 = vsel %vm1322_vm8, %v1318_v13, %v3374_v3  ;;  %v1328_v26 = vsel %vm1322_vm8, %v1319_v22, %v3375_v23  ;;  %v1437_v60 = vpop.f32.mrf.mxu2  ;;  %1577 = vmatpush.msrb.mxu3 %v1538_v18  ;;  %v3670_v22 = vld [vmem:[%s5119_s7] ss:$0 sm:$0xff] }
 0x1b8   : > { %1401 = vmatmul.f32.gmra.mxu1 %v1327_v39 }
 0x1bb   : > { %v3388_v19 = vpop.permute.xlu1 %3387  ;;  %v3398_v11 = vpop.permute.xlu0 %3397 }
 0x1bc   : > { %v3389_v21 = vunpack.i.l.bf16 %v3388_v19  ;;  %v3390_v32 = vunpack.i.h.bf16 %v3388_v19  ;;  %v3399_v33 = vunpack.i.l.bf16 %v3398_v11  ;;  %v3400_v45 = vunpack.i.h.bf16 %v3398_v11  ;;  %v1537_v19 = vld [vmem:[#allocation15 + $0x8] sm:$0xff] }
 0x1bd   : > { %1578 = vmatpush.msrb.mxu3 %v1537_v19 }
 0x1be   : > { %v1284_v25 = vsel %vm1277_vm3, %v1275_v12, %v3389_v21  ;;  %v1285_v30 = vsel %vm1277_vm3, %v1276_v38, %v3390_v32 }
 0x1bf   : > { %v1293_v29 = vsel %vm1286_vm4, %v1284_v25, %v3394_v24  ;;  %v1294_v44 = vsel %vm1286_vm4, %v1285_v30, %v3395_v42  ;;  %v1440_v63 = vpop.f32.mrf.mxu2  ;;  %1579 = vmatpush.msrb.mxu3 %v1536_v20  ;;  %v3671_v24 = vld [vmem:[%s5120_s8] ss:$0 sm:$0xff] }
 0x1c0   : > { %1404 = vmatmul.f32.gmra.mxu1 %v1328_v26  ;;  %v1302_v37 = vsel %vm1295_vm5, %v1293_v29, %v3399_v33  ;;  %v1303_v48 = vsel %vm1295_vm5, %v1294_v44, %v3400_v45 }
 0x1c3   : > { %v1194_v36 = vpop.permute.xlu1 %1193  ;;  %v1258_v27 = vpop.permute.xlu0 %1257 }
 0x1c4   : > { %v1311_v51 = vsel %vm1304_vm6, %v1302_v37, %v1194_v36 }
 0x1c5   : > { %v1320_v41 = vsel %vm1313_vm7, %v1311_v51, %v1226_v34 }
 0x1c6   : > { %v1329_v43 = vsel %vm1322_vm8, %v1320_v41, %v1258_v27 }
 0x1c7   : > { %v1443_v1 = vpop.f32.mrf.mxu2 }
 0x1c8   : > { %1407 = vmatmul.f32.gmra.mxu1 %v1329_v43 }
 0x1cb   : > { %v1196_v47 = vpop.permute.xlu1 %1195  ;;  %v1260_v49 = vpop.permute.xlu0 %1259 }
 0x1cc   : > { %v1312_v56 = vsel %vm1304_vm6, %v1303_v48, %v1196_v47 }
 0x1cd   : > { %v1321_v50 = vsel %vm1313_vm7, %v1312_v56, %v1228_v46 }
 0x1ce   : > { %v1330_v52 = vsel %vm1322_vm8, %v1321_v50, %v1260_v49 }
 0x1cf   : > { %v1446_v4 = vpop.f32.mrf.mxu2 }
 0x1d0   : > { %1410 = vmatmul.f32.gmra.mxu1 %v1330_v52 }
 0x1d7   : > { %v1449_v13 = vpop.f32.mrf.mxu2 }
 0x209   : > { %v1452_v15 = vpop.f32.mrf.mxu2 }
 0x20f   : > { %v1390_v53 = vpop.f32.mrf.mxu1 }
 0x210   : > { %v1432_v54 = vadd.f32 %v1431_v10, %v1390_v53 }
 0x212   : > { %1463 = vrot.lane.b32.xlu1 %v1432_v54, %s4109_s5 }
 0x217   : > { %v1393_v57 = vpop.f32.mrf.mxu1 }
 0x218   : > { %v1435_v59 = vadd.f32 %v1434_v55, %v1393_v57 }
 0x21a   : > { %1465 = vrot.lane.b32.xlu2 %v1435_v59, %s4109_s5 }
 0x224   : > { %v1396_v61 = vpop.f32.mrf.mxu1 }
 0x225   : > { %v1438_v62 = vadd.f32 %v1437_v60, %v1396_v61 }
 0x227   : > { %1467 = vrot.lane.b32.xlu0 %v1438_v62, %s4109_s5 }
 0x22c   : > { %v1399_v35 = vpop.f32.mrf.mxu1 }
 0x22d   : > { %v1441_v0 = vadd.f32 %v1440_v63, %v1399_v35 }
 0x22f   : > { %1469 = vrot.lane.b32.xlu1 %v1441_v0, %s4109_s5  ;;  %v2014_v0 = vld [vmem:[#allocation17 + $0x88] sm:$0xff] }
 0x230   : > { %2094 = vmatpush.msra.mxu2 %v2014_v0 }
 0x235   : > { %v1402_v2 = vpop.f32.mrf.mxu1 }
 0x236   : > { %v1444_v3 = vadd.f32 %v1443_v1, %v1402_v2  ;;  %v2013_v1 = vld [vmem:[#allocation17 + $0x80] sm:$0xff] }
 0x237   : > { %2095 = vmatpush.msra.mxu2 %v2013_v1  ;;  %v4690_v2 = vld [vmem:[%s5168_s23] ss:$0 sm:$0xff]  ;;  %s5170_s23 = sld [smem:[#allocation39_spill]] }
 0x238   : > { %1471 = vrot.lane.b32.xlu2 %v1444_v3, %s4109_s5  ;;  %v4695_v3 = vld [vmem:[%s5169_s2] ss:$0 sm:$0xff]  ;;  %s5171_s2 = sld [smem:[#allocation40_spill]] }
 0x23d   : > { %v1405_v8 = vpop.f32.mrf.mxu1 }
 0x23e   : > { %v1447_v9 = vadd.f32 %v1446_v4, %v1405_v8 }
 0x240   : > { %1473 = vrot.lane.b32.xlu0 %v1447_v9, %s4109_s5 }
 0x245   : > { %v1408_v39 = vpop.f32.mrf.mxu1 }
 0x246   : > { %v1450_v14 = vadd.f32 %v1449_v13, %v1408_v39 }
 0x248   : > { %1475 = vrot.lane.b32.xlu1 %v1450_v14, %s4109_s5 }
 0x24d   : > { %v1411_v16 = vpop.f32.mrf.mxu1 }
 0x24e   : > { %v1453_v17 = vadd.f32 %v1452_v15, %v1411_v16 }
 0x250   : > { %1477 = vrot.lane.b32.xlu2 %v1453_v17, %s4109_s5 }
 0x274   : > { %v1466_v21 = vpop.permute.xlu2 %1465 }
 0x275   : > { %1489 = vst.msk [vmem:[%s4419_s4 + $0x8] sm:$0xff] %vm1487_vm9, %v1466_v21 }
 0x27c   : > { %v1497_v25 = vld [vmem:[%s4419_s4 + $0x8] sm:$0xff] }
 0x27d   : > { %v1509_v29 = vmul.f32 %v3670_v22, %v1497_v25 }
 0x27f   : > { %v1521_v33 = vadd.f32 %v3671_v24, %v1509_v29 }
 0x281   : > { %v1529_v36 = vmax.f32 %v1521_v33, 0.0 }
 0x284   : > { %v1464_v11 = vpop.permute.xlu1 %1463 }
 0x285   : > { %1488 = vst.msk [vmem:[%s4419_s4] sm:$0xff] %vm1487_vm9, %v1464_v11 }
 0x28c   : > { %v1496_v23 = vld [vmem:[%s4419_s4] sm:$0xff] }
 0x28d   : > { %v1508_v12 = vmul.f32 %v3670_v22, %v1496_v23 }
 0x28f   : > { %v1520_v26 = vadd.f32 %v3671_v24, %v1508_v12 }
 0x291   : > { %v1528_v28 = vmax.f32 %v1520_v26, 0.0 }
 0x292   : > { %v1472_v32 = vpop.permute.xlu2 %1471 }
 0x293   : > { %1492 = vst.msk [vmem:[%s4419_s4 + $0x20] sm:$0xff] %vm1487_vm9, %v1472_v32  ;;  %3057 = vmatmul.msk.f32.vlgmr.msrb.gmra.mxu3 %vm1539_vm10, %v1528_v28 }
 0x299   : > { %v1468_v34 = vpop.permute.xlu0 %1467 }
 0x29a   : > { %1490 = vst.msk [vmem:[%s4419_s4 + $0x10] sm:$0xff] %vm1487_vm9, %v1468_v34  ;;  %v1500_v44 = vld [vmem:[%s4419_s4 + $0x20] sm:$0xff] }
 0x29b   : > { %3058 = vmatmul.msk.f32.gmra.mxu3 %vm1539_vm10, %v1529_v36  ;;  %v1512_v47 = vmul.f32 %v3670_v22, %v1500_v44 }
 0x29d   : > { %v1524_v56 = vadd.f32 %v3671_v24, %v1512_v47 }
 0x29f   : > { %v1532_v49 = vmax.f32 %v1524_v56, 0.0 }
 0x2a1   : > { %v1470_v37 = vpop.permute.xlu1 %1469  ;;  %v1498_v38 = vld [vmem:[%s4419_s4 + $0x10] sm:$0xff] }
 0x2a2   : > { %1491 = vst.msk [vmem:[%s4419_s4 + $0x18] sm:$0xff] %vm1487_vm9, %v1470_v37  ;;  %v1510_v51 = vmul.f32 %v3670_v22, %v1498_v38 }
 0x2a4   : > { %v1522_v27 = vadd.f32 %v3671_v24, %v1510_v51 }
 0x2a6   : > { %v1530_v30 = vmax.f32 %v1522_v27, 0.0 }
 0x2a8   : > { %3059 = vmatmul.msk.f32.gmra.mxu3 %vm1539_vm10, %v1530_v30 }
 0x2a9   : > { %v1499_v41 = vld [vmem:[%s4419_s4 + $0x18] sm:$0xff] }
 0x2aa   : > { %v1478_v42 = vpop.permute.xlu2 %1477  ;;  %v1511_v43 = vmul.f32 %v3670_v22, %v1499_v41 }
 0x2ab   : > { %1495 = vst.msk [vmem:[%s4419_s4 + $0x38] sm:$0xff] %vm1487_vm9, %v1478_v42 }
 0x2ac   : > { %v1523_v45 = vadd.f32 %v3671_v24, %v1511_v43 }
 0x2ae   : > { %v1531_v46 = vmax.f32 %v1523_v45, 0.0 }
 0x2b0   : > { %3060 = vmatmul.msk.f32.gmra.mxu3 %vm1539_vm10, %v1531_v46 }
 0x2b2   : > { %v1474_v48 = vpop.permute.xlu0 %1473  ;;  %v1503_v59 = vld [vmem:[%s4419_s4 + $0x38] sm:$0xff] }
 0x2b3   : > { %1493 = vst.msk [vmem:[%s4419_s4 + $0x28] sm:$0xff] %vm1487_vm9, %v1474_v48  ;;  %v1515_v62 = vmul.f32 %v3670_v22, %v1503_v59 }
 0x2b5   : > { %v1527_v63 = vadd.f32 %v3671_v24, %v1515_v62 }
 0x2b7   : > { %v1535_v35 = vmax.f32 %v1527_v63, 0.0 }
 0x2b8   : > { %3061 = vmatmul.msk.f32.gmra.mxu3 %vm1539_vm10, %v1532_v49 }
 0x2ba   : > { %v1476_v50 = vpop.permute.xlu1 %1475  ;;  %v1501_v52 = vld [vmem:[%s4419_s4 + $0x28] sm:$0xff] }
 0x2bb   : > { %1494 = vst.msk [vmem:[%s4419_s4 + $0x30] sm:$0xff] %vm1487_vm9, %v1476_v50  ;;  %v1513_v10 = vmul.f32 %v3670_v22, %v1501_v52 }
 0x2bd   : > { %v1525_v53 = vadd.f32 %v3671_v24, %v1513_v10 }
 0x2bf   : > { %v1533_v54 = vmax.f32 %v1525_v53, 0.0 }
 0x2c1   : > { %3062 = vmatmul.msk.f32.gmra.mxu3 %vm1539_vm10, %v1533_v54 }
 0x2c2   : > { %v1502_v55 = vld [vmem:[%s4419_s4 + $0x30] sm:$0xff] }
 0x2c3   : > { %v1514_v57 = vmul.f32 %v3670_v22, %v1502_v55 }
 0x2c5   : > { %v1526_v60 = vadd.f32 %v3671_v24, %v1514_v57 }
 0x2c7   : > { %v1534_v61 = vmax.f32 %v1526_v60, 0.0 }
 0x2c9   : > { %3063 = vmatmul.msk.f32.gmra.mxu3 %vm1539_vm10, %v1534_v61 }
 0x2d1   : > { %3064 = vmatmul.msk.f32.gmra.mxu3 %vm1539_vm10, %v1535_v35 }
 0x316   : > { %v1581_v4 = vpop.f32.mrf.mxu3 }
 0x317   : > { %v1609_v8 = vmul.f32 %v4690_v2, %v1581_v4 }
 0x319   : > { %v1621_v9 = vadd.f32 %v4695_v3, %v1609_v8 }
 0x31b   : > { %v1629_v13 = vmax.f32 %v1621_v9, 0.0 }
 0x31d   : > { %1637 = vst.msk [vmem:[#allocation2 + $0x11] sm:$0xff] %vm780_vm0, %v1629_v13 }
 0x31e   : > { %v1584_v39 = vpop.f32.mrf.mxu3 }
 0x31f   : > { %v1610_v14 = vmul.f32 %v4690_v2, %v1584_v39 }
 0x321   : > { %v1622_v15 = vadd.f32 %v4695_v3, %v1610_v14 }
 0x323   : > { %v1630_v16 = vmax.f32 %v1622_v15, 0.0 }
 0x324   : > { %v1654_v17 = vld [vmem:[#allocation2 + $0x11] sm:$0xff] }
 0x325   : > { %v1662_v18 = vld [vmem:[#allocation2 + $0x12] sm:$0xff]  ;;  %1638 = vst.msk [vmem:[#allocation2 + $0x21] sm:$0xff] %vm780_vm0, %v1630_v16  ;;  %v3401_v19 = vpack.i.bf16 %v1654_v17, %v4483_v58 }
 0x326   : > { %v3406_v20 = vpack.i.bf16 %v1662_v18, %v4489_v7  ;;  %v4707_v11 = vld [vmem:[#allocation2 + $0x10] sm:$0xff] }
 0x327   : > { %3402 = vrot.lane.b32.xlu0 %v3401_v19, %s4109_s5 }
 0x328   : > { %3407 = vrot.lane.b32.xlu1 %v3406_v20, %s4112_s28 }
 0x32b   : > { %v1587_v21 = vpop.f32.mrf.mxu3 }
 0x32c   : > { %v1611_v22 = vmul.f32 %v4690_v2, %v1587_v21  ;;  %v1709_v23 = vld [vmem:[#allocation2 + $0x22] sm:$0xff] }
 0x32d   : > { %v1678_v12 = vld [vmem:[#allocation2 + $0x21] sm:$0xff]  ;;  %3065 = vmatmul.msk.f32.vlgmr.msra.gmra.mxu2 %vm780_vm0, %v1709_v23  ;;  %v3421_v26 = vpack.i.bf16 %v1709_v23, %v1662_v18 }
 0x32e   : > { %v4710_v24 = vld [vmem:[#allocation2 + $0x20] sm:$0xff]  ;;  %v3416_v25 = vpack.i.bf16 %v1678_v12, %v1654_v17  ;;  %v1623_v7 = vadd.f32 %v4695_v3, %v1611_v22 }
 0x32f   : > { %v3411_v58 = vpack.i.bf16 %v4710_v24, %v4707_v11 }
 0x330   : > { %3417 = vrot.lane.b32.xlu0 %v3416_v25, %s4114_s3  ;;  %3422 = vrot.lane.b32.xlu1 %v3421_v26, %s4110_s17  ;;  %v1631_v28 = vmax.f32 %v1623_v7, 0.0  ;;  %v2012_v7 = vld [vmem:[#allocation17 + $0x78] sm:$0xff] }
 0x331   : > { %3412 = vrot.lane.b32.xlu2 %v3411_v58, %s4111_s25  ;;  %2039 = vmatpush.msrb.mxu0 %v2012_v7 }
 0x332   : > { %1639 = vst.msk [vmem:[#allocation2 + $0x31] sm:$0xff] %vm780_vm0, %v1631_v28  ;;  %v2011_v28 = vld [vmem:[#allocation17 + $0x70] sm:$0xff]  ;;  %3100 = vmatpush.msra.mxu3 %v2012_v7 }
 0x333   : > { %v1590_v29 = vpop.f32.mrf.mxu3  ;;  %2040 = vmatpush.msrb.mxu0 %v2011_v28 }
 0x334   : > { %v1612_v32 = vmul.f32 %v4690_v2, %v1590_v29  ;;  %3101 = vmatpush.msra.mxu3 %v2011_v28 }
 0x336   : > { %v1624_v33 = vadd.f32 %v4695_v3, %v1612_v32 }
 0x338   : > { %v1632_v34 = vmax.f32 %v1624_v33, 0.0  ;;  %v2010_v33 = vld [vmem:[#allocation17 + $0x68] sm:$0xff] }
 0x339   : > { %v1710_v36 = vld [vmem:[#allocation2 + $0x32] sm:$0xff]  ;;  %2041 = vmatpush.msrb.mxu0 %v2010_v33  ;;  %3102 = vmatpush.msra.mxu3 %v2010_v33 }
 0x33a   : > { %v1702_v37 = vld [vmem:[#allocation2 + $0x31] sm:$0xff]  ;;  %1640 = vst.msk [vmem:[#allocation2 + $0x41] sm:$0xff] %vm780_vm0, %v1632_v34  ;;  %3066 = vmatmul.msk.f32.gmra.mxu2 %vm780_vm0, %v1710_v36  ;;  %v3441_v56 = vpack.i.bf16 %v1710_v36, %v1709_v23 }
 0x33b   : > { %v4722_v38 = vld [vmem:[#allocation2 + $0x30] sm:$0xff]  ;;  %v3431_v51 = vpack.i.bf16 %v1702_v37, %v1678_v12  ;;  %v1593_v30 = vpop.f32.mrf.mxu3  ;;  %v2008_v34 = vld [vmem:[#allocation17 + $0x58] sm:$0xff] }
 0x33c   : > { %v3426_v27 = vpack.i.bf16 %v4722_v38, %v4710_v24  ;;  %v1613_v41 = vmul.f32 %v4690_v2, %v1593_v30  ;;  %v2001_v30 = vld [vmem:[#allocation17 + $0x20] sm:$0xff] }
 0x33d   : > { %3432 = vrot.lane.b32.xlu0 %v3431_v51, %s4115_s16  ;;  %3437 = vrot.lane.b32.xlu1 %v3431_v51, %s4109_s5  ;;  %v2003_v51 = vld [vmem:[#allocation17 + $0x30] sm:$0xff] }
 0x33e   : > { %3427 = vrot.lane.b32.xlu2 %v3426_v27, %s4113_s14  ;;  %v1625_v42 = vadd.f32 %v4695_v3, %v1613_v41  ;;  %v2002_v27 = vld [vmem:[#allocation17 + $0x28] sm:$0xff]  ;;  %v2000_v41 = vld [vmem:[#allocation17 + $0x18] sm:$0xff] }
 0x340   : > { %v1633_v43 = vmax.f32 %v1625_v42, 0.0  ;;  %v1999_v42 = vld [vmem:[#allocation17 + $0x10] sm:$0xff] }
 0x341   : > { %v1711_v44 = vld [vmem:[#allocation2 + $0x42] sm:$0xff] }
 0x342   : > { %v4733_v45 = vld [vmem:[#allocation2 + $0x40] sm:$0xff]  ;;  %1641 = vst.msk [vmem:[#allocation2 + $0x51] sm:$0xff] %vm780_vm0, %v1633_v43  ;;  %3067 = vmatmul.msk.f32.gmra.mxu2 %vm780_vm0, %v1711_v44  ;;  %v3456_v60 = vpack.i.bf16 %v1711_v44, %v1710_v36  ;;  %v2007_v36 = vld [vmem:[#allocation17 + $0x50] sm:$0xff]  ;;  %v1998_v43 = vld [vmem:[#allocation17 + $0x8] sm:$0xff] }
 0x343   : > { %v1680_v46 = vld [vmem:[#allocation2 + $0x41] sm:$0xff]  ;;  %v3446_v47 = vpack.i.bf16 %v4733_v45, %v4722_v38 }
 0x344   : > { %v3451_v48 = vpack.i.bf16 %v1680_v46, %v1702_v37  ;;  %v1596_v49 = vpop.f32.mrf.mxu3  ;;  %v2006_v37 = vld [vmem:[#allocation17 + $0x48] sm:$0xff] }
 0x345   : > { %3447 = vrot.lane.b32.xlu0 %v3446_v47, %s4111_s25  ;;  %v1614_v50 = vmul.f32 %v4690_v2, %v1596_v49 }
 0x346   : > { %3452 = vrot.lane.b32.xlu1 %v3451_v48, %s4114_s3  ;;  %3442 = vrot.lane.b32.xlu2 %v3441_v56, %s4112_s28 }
 0x347   : > { %v1626_v52 = vadd.f32 %v4695_v3, %v1614_v50 }
 0x349   : > { %v1634_v10 = vmax.f32 %v1626_v52, 0.0  ;;  %v1712_v53 = vld [vmem:[#allocation2 + $0x52] sm:$0xff] }
 0x34a   : > { %v4744_v54 = vld [vmem:[#allocation2 + $0x50] sm:$0xff]  ;;  %3068 = vmatmul.msk.f32.gmra.mxu2 %vm780_vm0, %v1712_v53  ;;  %v3476_v1 = vpack.i.bf16 %v1712_v53, %v1711_v44  ;;  %v1997_v44 = vld [vmem:[#allocation17] sm:$0xff] }
 0x34b   : > { %v1704_v55 = vld [vmem:[#allocation2 + $0x51] sm:$0xff]  ;;  %v3461_v57 = vpack.i.bf16 %v4744_v54, %v4733_v45  ;;  %1642 = vst.msk [vmem:[#allocation2 + $0x61] sm:$0xff] %vm780_vm0, %v1634_v10 }
 0x34c   : > { %v3466_v59 = vpack.i.bf16 %v1704_v55, %v1680_v46  ;;  %v1599_v61 = vpop.f32.mrf.mxu3 }
 0x34d   : > { %3462 = vrot.lane.b32.xlu0 %v3461_v57, %s4113_s14  ;;  %v1615_v62 = vmul.f32 %v4690_v2, %v1599_v61 }
 0x34e   : > { %3467 = vrot.lane.b32.xlu1 %v3466_v59, %s4115_s16  ;;  %3457 = vrot.lane.b32.xlu2 %v3456_v60, %s4110_s17 }
 0x34f   : > { %v1627_v63 = vadd.f32 %v4695_v3, %v1615_v62 }
 0x351   : > { %v1635_v35 = vmax.f32 %v1627_v63, 0.0 }
 0x352   : > { %v1713_v0 = vld [vmem:[#allocation2 + $0x62] sm:$0xff] }
 0x353   : > { %v4755_v4 = vld [vmem:[#allocation2 + $0x60] sm:$0xff]  ;;  %1643 = vst.msk [vmem:[#allocation2 + $0x71] sm:$0xff] %vm780_vm0, %v1635_v35  ;;  %3069 = vmatmul.msk.f32.gmra.mxu2 %vm780_vm0, %v1713_v0  ;;  %v3491_v17 = vpack.i.bf16 %v1713_v0, %v1712_v53 }
 0x354   : > { %v3481_v8 = vpack.i.bf16 %v4755_v4, %v4744_v54  ;;  %v1602_v9 = vpop.f32.mrf.mxu3  ;;  %v1682_v14 = vld [vmem:[#allocation2 + $0x61] sm:$0xff] }
 0x355   : > { %3477 = vrot.lane.b32.xlu0 %v3476_v1, %s4112_s28  ;;  %v1616_v13 = vmul.f32 %v4690_v2, %v1602_v9  ;;  %v3486_v19 = vpack.i.bf16 %v1682_v14, %v1704_v55 }
 0x356   : > { %3472 = vrot.lane.b32.xlu2 %v3466_v59, %s4109_s5  ;;  %3482 = vrot.lane.b32.xlu1 %v3481_v8, %s4111_s25 }
 0x357   : > { %v1628_v39 = vadd.f32 %v4695_v3, %v1616_v13 }
 0x359   : > { %v1636_v15 = vmax.f32 %v1628_v39, 0.0 }
 0x35a   : > { %v1714_v16 = vld [vmem:[#allocation2 + $0x72] sm:$0xff] }
 0x35b   : > { %v4766_v18 = vld [vmem:[#allocation2 + $0x70] sm:$0xff]  ;;  %1644 = vst.msk [vmem:[#allocation2 + $0x81] sm:$0xff] %vm780_vm0, %v1636_v15  ;;  %3070 = vmatmul.msk.f32.gmra.mxu2 %vm780_vm0, %v1714_v16  ;;  %v3511_v22 = vpack.i.bf16 %v1714_v16, %v1713_v0 }
 0x35c   : > { %v3496_v20 = vpack.i.bf16 %v4766_v18, %v4755_v4  ;;  %v1660_v2 = vld [vmem:[#allocation2 + $0x71] sm:$0xff] }
 0x35d   : > { %3492 = vrot.lane.b32.xlu0 %v3491_v17, %s4110_s17  ;;  %v3506_v21 = vpack.i.bf16 %v1660_v2, %v1682_v14 }
 0x35e   : > { %3487 = vrot.lane.b32.xlu2 %v3486_v19, %s4114_s3  ;;  %3497 = vrot.lane.b32.xlu1 %v3496_v20, %s4113_s14 }
 0x362   : > { %v1715_v3 = vld [vmem:[#allocation2 + $0x82] sm:$0xff] }
 0x363   : > { %3071 = vmatmul.msk.f32.gmra.mxu2 %vm780_vm0, %v1715_v3  ;;  %v1684_v23 = vld [vmem:[#allocation2 + $0x81] sm:$0xff]  ;;  %v3526_v58 = vpack.i.bf16 %v1715_v3, %v1714_v16 }
 0x364   : > { %v1676_v12 = vld [vmem:[#allocation2 + $0x80] sm:$0xff]  ;;  %v3521_v25 = vpack.i.bf16 %v1684_v23, %v1660_v2  ;;  %v3536_v29 = vpack.i.bf16 %v4560_v6, %v1684_v23 }
 0x365   : > { %3507 = vrot.lane.b32.xlu0 %v3506_v21, %s4109_s5  ;;  %v3516_v26 = vpack.i.bf16 %v1676_v12, %v4766_v18  ;;  %v3531_v32 = vpack.i.bf16 %v4558_v5, %v1676_v12  ;;  %v2005_v6 = vld [vmem:[#allocation17 + $0x40] sm:$0xff]  ;;  %v2004_v5 = vld [vmem:[#allocation17 + $0x38] sm:$0xff] }
 0x366   : > { %3502 = vrot.lane.b32.xlu2 %v3506_v21, %s4115_s16  ;;  %3512 = vrot.lane.b32.xlu1 %v3511_v22, %s4112_s28 }
 0x36b   : > { %3072 = vmatmul.msk.f32.gmra.mxu2 %vm780_vm0, %v4600_v40  ;;  %v2009_v40 = vld [vmem:[#allocation17 + $0x60] sm:$0xff] }
 0x36c   : > { %2042 = vmatpush.msrb.mxu0 %v2009_v40  ;;  %3103 = vmatpush.msra.mxu3 %v2009_v40 }
 0x36d   : > { %3522 = vrot.lane.b32.xlu0 %v3521_v25, %s4114_s3 }
 0x36e   : > { %3517 = vrot.lane.b32.xlu2 %v3516_v26, %s4111_s25  ;;  %3527 = vrot.lane.b32.xlu1 %v3526_v58, %s4110_s17 }
 0x36f   : > { %2043 = vmatpush.msrb.mxu0 %v2008_v34  ;;  %3104 = vmatpush.msra.mxu3 %v2008_v34 }
 0x371   : > { %2044 = vmatpush.msrb.mxu0 %v2007_v36  ;;  %3105 = vmatpush.msra.mxu3 %v2007_v36 }
 0x373   : > { %2045 = vmatpush.msrb.mxu0 %v2006_v37  ;;  %3106 = vmatpush.msra.mxu3 %v2006_v37 }
 0x375   : > { %3537 = vrot.lane.b32.xlu0 %v3536_v29, %s4115_s16  ;;  %2046 = vmatpush.msrb.mxu0 %v2005_v6 }
 0x376   : > { %3532 = vrot.lane.b32.xlu2 %v3531_v32, %s4113_s14  ;;  %3107 = vmatpush.msra.mxu3 %v2005_v6 }
 0x377   : > { %2047 = vmatpush.msrb.mxu0 %v2004_v5 }
 0x378   : > { %3108 = vmatpush.msra.mxu3 %v2004_v5 }
 0x379   : > { %2048 = vmatpush.msrb.mxu0 %v2003_v51 }
 0x37a   : > { %3109 = vmatpush.msra.mxu3 %v2003_v51 }
 0x37b   : > { %2049 = vmatpush.msrb.mxu0 %v2002_v27 }
 0x37c   : > { %3110 = vmatpush.msra.mxu3 %v2002_v27 }
 0x37d   : > { %2050 = vmatpush.msrb.mxu0 %v2001_v30 }
 0x37e   : > { %3111 = vmatpush.msra.mxu3 %v2001_v30 }
 0x37f   : > { %2051 = vmatpush.msrb.mxu0 %v2000_v41 }
 0x380   : > { %3112 = vmatpush.msra.mxu3 %v2000_v41 }
 0x381   : > { %2052 = vmatpush.msrb.mxu0 %v1999_v42 }
 0x382   : > { %3113 = vmatpush.msra.mxu3 %v1999_v42 }
 0x383   : > { %2053 = vmatpush.msrb.mxu0 %v1998_v43 }
 0x384   : > { %3114 = vmatpush.msra.mxu3 %v1998_v43 }
 0x385   : > { %2054 = vmatpush.msrb.mxu0 %v1997_v44 }
 0x386   : > { %3115 = vmatpush.msra.mxu3 %v1997_v44 }
 0x38b   : > { %v3413_v46 = vpop.permute.xlu2 %3412 }
 0x38c   : > { %v3414_v60 = vunpack.i.l.bf16 %v3413_v46  ;;  %v3415_v15 = vunpack.i.h.bf16 %v3413_v46 }
 0x398   : > { %v3428_v48 = vpop.permute.xlu2 %3427 }
 0x399   : > { %v3403_v47 = vpop.permute.xlu0 %3402  ;;  %v3430_v12 = vunpack.i.h.bf16 %v3428_v48 }
 0x39a   : > { %v3408_v56 = vpop.permute.xlu1 %3407  ;;  %v3404_v49 = vunpack.i.l.bf16 %v3403_v47  ;;  %v3405_v61 = vunpack.i.h.bf16 %v3403_v47 }
 0x39b   : > { %v3409_v50 = vunpack.i.l.bf16 %v3408_v56  ;;  %v3410_v35 = vunpack.i.h.bf16 %v3408_v56 }
 0x39c   : > { %v1941_v52 = vsel %vm780_vm0, %v4567_v31, %v3404_v49  ;;  %v1942_v1 = vsel %vm780_vm0, %v4707_v11, %v3405_v61  ;;  %v3429_v31 = vunpack.i.l.bf16 %v3428_v48 }
 0x39d   : > { %v1949_v53 = vsel %vm1277_vm3, %v1941_v52, %v3409_v50  ;;  %v1950_v9 = vsel %vm1277_vm3, %v1942_v1, %v3410_v35 }
 0x39e   : > { %v1957_v62 = vsel %vm1286_vm4, %v1949_v53, %v3414_v60  ;;  %v1958_v20 = vsel %vm1286_vm4, %v1950_v9, %v3415_v15 }
 0x3a0   : > { %v3443_v55 = vpop.permute.xlu2 %3442 }
 0x3a1   : > { %v3444_v7 = vunpack.i.l.bf16 %v3443_v55  ;;  %v3445_v5 = vunpack.i.h.bf16 %v3443_v55 }
 0x3a2   : > { %v3418_v10 = vpop.permute.xlu0 %3417  ;;  %v3423_v59 = vpop.permute.xlu1 %3422 }
 0x3a3   : > { %v3419_v57 = vunpack.i.l.bf16 %v3418_v10  ;;  %v3424_v63 = vunpack.i.l.bf16 %v3423_v59  ;;  %v3420_v13 = vunpack.i.h.bf16 %v3418_v10  ;;  %v3425_v2 = vunpack.i.h.bf16 %v3423_v59 }
 0x3a5   : > { %v1965_v0 = vsel %vm1295_vm5, %v1957_v62, %v3419_v57  ;;  %v1966_v11 = vsel %vm1295_vm5, %v1958_v20, %v3420_v13 }
 0x3a6   : > { %v1973_v8 = vsel %vm1304_vm6, %v1965_v0, %v3424_v63  ;;  %v1974_v23 = vsel %vm1304_vm6, %v1966_v11, %v3425_v2 }
 0x3a7   : > { %v1981_v19 = vsel %vm1313_vm7, %v1973_v8, %v3429_v31  ;;  %v1982_v32 = vsel %vm1313_vm7, %v1974_v23, %v3430_v12 }
 0x3a8   : > { %v3458_v17 = vpop.permute.xlu2 %3457 }
 0x3a9   : > { %v3459_v27 = vunpack.i.l.bf16 %v3458_v17  ;;  %v3460_v52 = vunpack.i.h.bf16 %v3458_v17 }
 0x3af   : > { %v3433_v39 = vpop.permute.xlu0 %3432  ;;  %v3438_v14 = vpop.permute.xlu1 %3437 }
 0x3b0   : > { %v3434_v16 = vunpack.i.l.bf16 %v3433_v39  ;;  %v3439_v21 = vunpack.i.l.bf16 %v3438_v14  ;;  %v3435_v22 = vunpack.i.h.bf16 %v3433_v39  ;;  %v3440_v29 = vunpack.i.h.bf16 %v3438_v14  ;;  %v3473_v36 = vpop.permute.xlu2 %3472 }
 0x3b1   : > { %v3474_v53 = vunpack.i.l.bf16 %v3473_v36  ;;  %v3475_v63 = vunpack.i.h.bf16 %v3473_v36 }
 0x3b2   : > { %v1989_v3 = vsel %vm1322_vm8, %v1981_v19, %v3434_v16  ;;  %v1943_v25 = vsel %vm780_vm0, %v4710_v24, %v3439_v21  ;;  %v1990_v34 = vsel %vm1322_vm8, %v1982_v32, %v3435_v22  ;;  %v1944_v6 = vsel %vm780_vm0, %v4722_v38, %v3440_v29 }
 0x3b3   : > { %2055 = vmatmul.f32.vlgmr.msrb.gmra.mxu0 %v1989_v3  ;;  %v1951_v33 = vsel %vm1277_vm3, %v1943_v25, %v3444_v7  ;;  %v1952_v42 = vsel %vm1277_vm3, %v1944_v6, %v3445_v5  ;;  %v1945_v35 = vsel %vm780_vm0, %v4733_v45, %v3474_v53  ;;  %v1946_v9 = vsel %vm780_vm0, %v4744_v54, %v3475_v63 }
 0x3b7   : > { %v3448_v26 = vpop.permute.xlu0 %3447 }
 0x3b8   : > { %v3453_v58 = vpop.permute.xlu1 %3452  ;;  %v3449_v28 = vunpack.i.l.bf16 %v3448_v26  ;;  %v3450_v24 = vunpack.i.h.bf16 %v3448_v26  ;;  %v3488_v10 = vpop.permute.xlu2 %3487 }
 0x3b9   : > { %v3454_v40 = vunpack.i.l.bf16 %v3453_v58  ;;  %v3455_v43 = vunpack.i.h.bf16 %v3453_v58  ;;  %v3489_v14 = vunpack.i.l.bf16 %v3488_v10  ;;  %v3490_v54 = vunpack.i.h.bf16 %v3488_v10 }
 0x3ba   : > { %v1959_v37 = vsel %vm1286_vm4, %v1951_v33, %v3449_v28  ;;  %v1960_v47 = vsel %vm1286_vm4, %v1952_v42, %v3450_v24 }
 0x3bb   : > { %2058 = vmatmul.f32.gmra.mxu0 %v1990_v34  ;;  %v1967_v51 = vsel %vm1295_vm5, %v1959_v37, %v3454_v40  ;;  %v1968_v49 = vsel %vm1295_vm5, %v1960_v47, %v3455_v43 }
 0x3bc   : > { %v1975_v48 = vsel %vm1304_vm6, %v1967_v51, %v3459_v27  ;;  %v1976_v59 = vsel %vm1304_vm6, %v1968_v49, %v3460_v52 }
 0x3bf   : > { %v3463_v30 = vpop.permute.xlu0 %3462 }
 0x3c0   : > { %v3468_v41 = vpop.permute.xlu1 %3467  ;;  %v3464_v44 = vunpack.i.l.bf16 %v3463_v30  ;;  %v3465_v50 = vunpack.i.h.bf16 %v3463_v30  ;;  %v3503_v15 = vpop.permute.xlu2 %3502 }
 0x3c1   : > { %v3469_v46 = vunpack.i.l.bf16 %v3468_v41  ;;  %v3470_v55 = vunpack.i.h.bf16 %v3468_v41  ;;  %v3504_v3 = vunpack.i.l.bf16 %v3503_v15  ;;  %v3505_v40 = vunpack.i.h.bf16 %v3503_v15 }
 0x3c2   : > { %v1983_v56 = vsel %vm1313_vm7, %v1975_v48, %v3464_v44  ;;  %v1984_v62 = vsel %vm1313_vm7, %v1976_v59, %v3465_v50 }
 0x3c3   : > { %v1991_v38 = vsel %vm1322_vm8, %v1983_v56, %v3469_v46  ;;  %v1992_v31 = vsel %vm1322_vm8, %v1984_v62, %v3470_v55 }
 0x3c4   : > { %2061 = vmatmul.f32.gmra.mxu0 %v1991_v38 }
 0x3c7   : > { %v3478_v57 = vpop.permute.xlu0 %3477 }
 0x3c8   : > { %v3479_v60 = vunpack.i.l.bf16 %v3478_v57  ;;  %v3483_v61 = vpop.permute.xlu1 %3482  ;;  %v3480_v1 = vunpack.i.h.bf16 %v3478_v57  ;;  %v3518_v34 = vpop.permute.xlu2 %3517 }
 0x3c9   : > { %v3484_v0 = vunpack.i.l.bf16 %v3483_v61  ;;  %v3485_v13 = vunpack.i.h.bf16 %v3483_v61  ;;  %v3520_v41 = vunpack.i.h.bf16 %v3518_v34  ;;  %v3519_v42 = vunpack.i.l.bf16 %v3518_v34 }
 0x3ca   : > { %v1953_v8 = vsel %vm1277_vm3, %v1945_v35, %v3479_v60  ;;  %v1954_v16 = vsel %vm1277_vm3, %v1946_v9, %v3480_v1  ;;  %v2097_v35 = vpop.f32.mrf.mxu2 }
 0x3cb   : > { %v1961_v39 = vsel %vm1286_vm4, %v1953_v8, %v3484_v0  ;;  %v1962_v11 = vsel %vm1286_vm4, %v1954_v16, %v3485_v13 }
 0x3cc   : > { %2064 = vmatmul.f32.gmra.mxu0 %v1992_v31  ;;  %v1969_v2 = vsel %vm1295_vm5, %v1961_v39, %v3489_v14  ;;  %v1970_v26 = vsel %vm1295_vm5, %v1962_v11, %v3490_v54 }
 0x3cf   : > { %v3493_v17 = vpop.permute.xlu0 %3492 }
 0x3d0   : > { %v3494_v19 = vunpack.i.l.bf16 %v3493_v17  ;;  %v3498_v45 = vpop.permute.xlu1 %3497  ;;  %v3495_v21 = vunpack.i.h.bf16 %v3493_v17  ;;  %v3533_v49 = vpop.permute.xlu2 %3532 }
 0x3d1   : > { %v3499_v20 = vunpack.i.l.bf16 %v3498_v45  ;;  %v3500_v25 = vunpack.i.h.bf16 %v3498_v45  ;;  %v3535_v10 = vunpack.i.h.bf16 %v3533_v49  ;;  %v3534_v53 = vunpack.i.l.bf16 %v3533_v49 }
 0x3d2   : > { %v1977_v22 = vsel %vm1304_vm6, %v1969_v2, %v3494_v19  ;;  %v1978_v58 = vsel %vm1304_vm6, %v1970_v26, %v3495_v21  ;;  %v2100_v8 = vpop.f32.mrf.mxu2  ;;  %v2205_v26 = vld [vmem:[#allocation18 + $0x18] sm:$0xff] }
 0x3d3   : > { %v1985_v23 = vsel %vm1313_vm7, %v1977_v22, %v3499_v20  ;;  %v1986_v33 = vsel %vm1313_vm7, %v1978_v58, %v3500_v25  ;;  %v2204_v58 = vld [vmem:[#allocation18 + $0x10] sm:$0xff]  ;;  %2242 = vmatpush.msrb.mxu3 %v2205_v26 }
 0x3d4   : > { %v1993_v12 = vsel %vm1322_vm8, %v1985_v23, %v3504_v3  ;;  %v1994_v5 = vsel %vm1322_vm8, %v1986_v33, %v3505_v40  ;;  %v3674_v33 = vld [vmem:[%s5170_s23] ss:$0 sm:$0xff] }
 0x3d5   : > { %2067 = vmatmul.f32.gmra.mxu0 %v1993_v12  ;;  %2243 = vmatpush.msrb.mxu3 %v2204_v58 }
 0x3d7   : > { %v3508_v7 = vpop.permute.xlu0 %3507 }
 0x3d8   : > { %v3510_v28 = vunpack.i.h.bf16 %v3508_v7  ;;  %v3509_v29 = vunpack.i.l.bf16 %v3508_v7  ;;  %v3513_v32 = vpop.permute.xlu1 %3512  ;;  %v2203_v7 = vld [vmem:[#allocation18 + $0x8] sm:$0xff] }
 0x3d9   : > { %v3515_v36 = vunpack.i.h.bf16 %v3513_v32  ;;  %v3514_v37 = vunpack.i.l.bf16 %v3513_v32  ;;  %2244 = vmatpush.msrb.mxu3 %v2203_v7 }
 0x3da   : > { %v1947_v6 = vsel %vm780_vm0, %v4755_v4, %v3509_v29  ;;  %v1948_v24 = vsel %vm780_vm0, %v4766_v18, %v3510_v28  ;;  %v2103_v13 = vpop.f32.mrf.mxu2  ;;  %v2202_v28 = vld [vmem:[#allocation18] sm:$0xff] }
 0x3db   : > { %v1956_v51 = vsel %vm1277_vm3, %v1948_v24, %v3515_v36  ;;  %v1955_v27 = vsel %vm1277_vm3, %v1947_v6, %v3514_v37  ;;  %2245 = vmatpush.msrb.mxu3 %v2202_v28  ;;  %v3675_v36 = vld [vmem:[%s5171_s2] ss:$0 sm:$0xff]  ;;  %s2829_s2 = scalar_lea.sflag [#allocation5], %s4388_s10 }
 0x3dc   : > { %v1963_v47 = vsel %vm1286_vm4, %v1955_v27, %v3519_v42  ;;  %v1964_v4 = vsel %vm1286_vm4, %v1956_v51, %v3520_v41 }
 0x3dd   : > { %2070 = vmatmul.f32.gmra.mxu0 %v1994_v5 }
 0x3df   : > { %v3523_v30 = vpop.permute.xlu0 %3522 }
 0x3e0   : > { %v3525_v43 = vunpack.i.h.bf16 %v3523_v30  ;;  %v3524_v44 = vunpack.i.l.bf16 %v3523_v30  ;;  %v3528_v46 = vpop.permute.xlu1 %3527 }
 0x3e1   : > { %v3530_v48 = vunpack.i.h.bf16 %v3528_v46  ;;  %v3529_v56 = vunpack.i.l.bf16 %v3528_v46 }
 0x3e2   : > { %v1971_v18 = vsel %vm1295_vm5, %v1963_v47, %v3524_v44  ;;  %v1972_v38 = vsel %vm1295_vm5, %v1964_v4, %v3525_v43  ;;  %v2106_v15 = vpop.f32.mrf.mxu2 }
 0x3e3   : > { %v1980_v50 = vsel %vm1304_vm6, %v1972_v38, %v3530_v48  ;;  %v1979_v52 = vsel %vm1304_vm6, %v1971_v18, %v3529_v56 }
 0x3e4   : > { %v1987_v60 = vsel %vm1313_vm7, %v1979_v52, %v3534_v53  ;;  %v1988_v61 = vsel %vm1313_vm7, %v1980_v50, %v3535_v10 }
 0x3e7   : > { %v3538_v55 = vpop.permute.xlu0 %3537 }
 0x3e8   : > { %v3540_v57 = vunpack.i.h.bf16 %v3538_v55  ;;  %v3539_v59 = vunpack.i.l.bf16 %v3538_v55 }
 0x3ea   : > { %v1995_v62 = vsel %vm1322_vm8, %v1987_v60, %v3539_v59  ;;  %v1996_v63 = vsel %vm1322_vm8, %v1988_v61, %v3540_v57  ;;  %v2109_v19 = vpop.f32.mrf.mxu2 }
 0x3eb   : > { %2073 = vmatmul.f32.gmra.mxu0 %v1995_v62  ;;  %2076 = vmatmul.f32.vlgmr.msra.gmra.mxu3 %v1996_v63 }
 0x3f2   : > { %v2112_v2 = vpop.f32.mrf.mxu2 }
 0x3fa   : > { %v2115_v21 = vpop.f32.mrf.mxu2 }
 0x402   : > { %v2118_v23 = vpop.f32.mrf.mxu2 }
 0x430   : > { %v2056_v0 = vpop.f32.mrf.mxu0 }
 0x431   : > { %v2098_v1 = vadd.f32 %v2097_v35, %v2056_v0 }
 0x433   : > { %2129 = vrot.lane.b32.xlu1 %v2098_v1, %s4116_s27 }
 0x438   : > { %v2059_v31 = vpop.f32.mrf.mxu0 }
 0x439   : > { %v2101_v9 = vadd.f32 %v2100_v8, %v2059_v31 }
 0x43b   : > { %2131 = vrot.lane.b32.xlu2 %v2101_v9, %s4116_s27 }
 0x441   : > { %v2062_v39 = vpop.f32.mrf.mxu0 }
 0x442   : > { %v2104_v14 = vadd.f32 %v2103_v13, %v2062_v39  ;;  %v2680_v13 = vld [vmem:[#allocation20 + $0x88] sm:$0xff]  ;;  %v2679_v39 = vld [vmem:[#allocation20 + $0x80] sm:$0xff] }
 0x443   : > { %2760 = vmatpush.msra.mxu0 %v2680_v13  ;;  %v2678_v13 = vld [vmem:[#allocation20 + $0x78] sm:$0xff] }
 0x444   : > { %2133 = vrot.lane.b32.xlu0 %v2104_v14, %s4116_s27  ;;  %v4894_v14 = vld [vmem:[%s5172_s9] ss:$0 sm:$0xff]  ;;  %2705 = vmatpush.msrb.mxu1 %v2678_v13 }
 0x445   : > { %2761 = vmatpush.msra.mxu0 %v2679_v39 }
 0x449   : > { %v2065_v16 = vpop.f32.mrf.mxu0 }
 0x44a   : > { %v2107_v17 = vadd.f32 %v2106_v15, %v2065_v16  ;;  %v4899_v15 = vld [vmem:[%s5173_s22] ss:$0 sm:$0xff] }
 0x44c   : > { %2135 = vrot.lane.b32.xlu1 %v2107_v17, %s4116_s27 }
 0x452   : > { %v2068_v45 = vpop.f32.mrf.mxu0 }
 0x453   : > { %v2110_v20 = vadd.f32 %v2109_v19, %v2068_v45 }
 0x455   : > { %2137 = vrot.lane.b32.xlu2 %v2110_v20, %s4116_s27 }
 0x45a   : > { %v2071_v3 = vpop.f32.mrf.mxu0 }
 0x45b   : > { %v2113_v11 = vadd.f32 %v2112_v2, %v2071_v3 }
 0x45d   : > { %2139 = vrot.lane.b32.xlu0 %v2113_v11, %s4116_s27  ;;  %v2319_v11 = vld [vmem:[#allocation2 + $0x1] sm:$0xff] }
 0x468   : > { %v2074_v22 = vpop.f32.mrf.mxu0 }
 0x469   : > { %v2116_v54 = vadd.f32 %v2115_v21, %v2074_v22  ;;  %v2327_v21 = vld [vmem:[#allocation2 + $0x2] sm:$0xff] }
 0x46b   : > { %2141 = vrot.lane.b32.xlu1 %v2116_v54, %s4116_s27 }
 0x46e   : > { %v2077_v12 = vpop.f32.mrf.mxu3 }
 0x46f   : > { %v2119_v25 = vadd.f32 %v2118_v23, %v2077_v12 }
 0x471   : > { %2143 = vrot.lane.b32.xlu2 %v2119_v25, %s4116_s27 }
 0x495   : > { %v2132_v29 = vpop.permute.xlu2 %2131 }
 0x496   : > { %2155 = vst.msk [vmem:[%s4419_s4 + $0x8] sm:$0xff] %vm2153_vm11, %v2132_v29 }
 0x49d   : > { %v2163_v6 = vld [vmem:[%s4419_s4 + $0x8] sm:$0xff] }
 0x49e   : > { %v2175_v51 = vmul.f32 %v3674_v33, %v2163_v6 }
 0x4a0   : > { %v2187_v30 = vadd.f32 %v3675_v36, %v2175_v51 }
 0x4a2   : > { %v2195_v41 = vmax.f32 %v2187_v30, 0.0 }
 0x4a5   : > { %v2130_v32 = vpop.permute.xlu1 %2129 }
 0x4a6   : > { %2154 = vst.msk [vmem:[%s4419_s4] sm:$0xff] %vm2153_vm11, %v2130_v32 }
 0x4ad   : > { %v2162_v40 = vld [vmem:[%s4419_s4] sm:$0xff] }
 0x4ae   : > { %v2174_v34 = vmul.f32 %v3674_v33, %v2162_v40 }
 0x4af   : > { %v2138_v37 = vpop.permute.xlu2 %2137 }
 0x4b0   : > { %2158 = vst.msk [vmem:[%s4419_s4 + $0x20] sm:$0xff] %vm2153_vm11, %v2138_v37  ;;  %v2186_v24 = vadd.f32 %v3675_v36, %v2174_v34 }
 0x4b2   : > { %v2194_v5 = vmax.f32 %v2186_v24, 0.0 }
 0x4b4   : > { %3073 = vmatmul.msk.f32.vlgmr.msrb.gmra.mxu3 %vm1277_vm3, %v2194_v5 }
 0x4b6   : > { %v2134_v27 = vpop.permute.xlu0 %2133 }
 0x4b7   : > { %2156 = vst.msk [vmem:[%s4419_s4 + $0x10] sm:$0xff] %vm2153_vm11, %v2134_v27  ;;  %v2166_v56 = vld [vmem:[%s4419_s4 + $0x20] sm:$0xff] }
 0x4b8   : > { %v2178_v50 = vmul.f32 %v3674_v33, %v2166_v56 }
 0x4ba   : > { %v2190_v10 = vadd.f32 %v3675_v36, %v2178_v50 }
 0x4bc   : > { %3074 = vmatmul.msk.f32.gmra.mxu3 %vm1277_vm3, %v2195_v41  ;;  %v2198_v53 = vmax.f32 %v2190_v10, 0.0 }
 0x4be   : > { %v2136_v42 = vpop.permute.xlu1 %2135  ;;  %v2164_v43 = vld [vmem:[%s4419_s4 + $0x10] sm:$0xff] }
 0x4bf   : > { %2157 = vst.msk [vmem:[%s4419_s4 + $0x18] sm:$0xff] %vm2153_vm11, %v2136_v42  ;;  %v2176_v44 = vmul.f32 %v3674_v33, %v2164_v43 }
 0x4c1   : > { %v2188_v46 = vadd.f32 %v3675_v36, %v2176_v44 }
 0x4c3   : > { %v2196_v47 = vmax.f32 %v2188_v46, 0.0 }
 0x4c5   : > { %3075 = vmatmul.msk.f32.gmra.mxu3 %vm1277_vm3, %v2196_v47 }
 0x4c6   : > { %v2165_v4 = vld [vmem:[%s4419_s4 + $0x18] sm:$0xff] }
 0x4c7   : > { %v2177_v48 = vmul.f32 %v3674_v33, %v2165_v4 }
 0x4c9   : > { %v2189_v18 = vadd.f32 %v3675_v36, %v2177_v48 }
 0x4cb   : > { %v2144_v38 = vpop.permute.xlu2 %2143  ;;  %v2197_v49 = vmax.f32 %v2189_v18, 0.0 }
 0x4cc   : > { %2161 = vst.msk [vmem:[%s4419_s4 + $0x38] sm:$0xff] %vm2153_vm11, %v2144_v38 }
 0x4cd   : > { %3076 = vmatmul.msk.f32.gmra.mxu3 %vm1277_vm3, %v2197_v49 }
 0x4cf   : > { %v2140_v52 = vpop.permute.xlu0 %2139 }
 0x4d0   : > { %2159 = vst.msk [vmem:[%s4419_s4 + $0x28] sm:$0xff] %vm2153_vm11, %v2140_v52 }
 0x4d3   : > { %v2169_v55 = vld [vmem:[%s4419_s4 + $0x38] sm:$0xff] }
 0x4d4   : > { %v2181_v57 = vmul.f32 %v3674_v33, %v2169_v55 }
 0x4d5   : > { %3077 = vmatmul.msk.f32.gmra.mxu3 %vm1277_vm3, %v2198_v53 }
 0x4d6   : > { %v2193_v59 = vadd.f32 %v3675_v36, %v2181_v57 }
 0x4d7   : > { %v2167_v60 = vld [vmem:[%s4419_s4 + $0x28] sm:$0xff] }
 0x4d8   : > { %v2179_v61 = vmul.f32 %v3674_v33, %v2167_v60  ;;  %v2201_v9 = vmax.f32 %v2193_v59, 0.0 }
 0x4da   : > { %v2191_v62 = vadd.f32 %v3675_v36, %v2179_v61 }
 0x4dc   : > { %v2199_v63 = vmax.f32 %v2191_v62, 0.0 }
 0x4dd   : > { %v2142_v35 = vpop.permute.xlu1 %2141 }
 0x4de   : > { %2160 = vst.msk [vmem:[%s4419_s4 + $0x30] sm:$0xff] %vm2153_vm11, %v2142_v35  ;;  %3078 = vmatmul.msk.f32.gmra.mxu3 %vm1277_vm3, %v2199_v63 }
 0x4e5   : > { %v2168_v0 = vld [vmem:[%s4419_s4 + $0x30] sm:$0xff] }
 0x4e6   : > { %v2180_v1 = vmul.f32 %v3674_v33, %v2168_v0 }
 0x4e8   : > { %v2192_v8 = vadd.f32 %v3675_v36, %v2180_v1 }
 0x4ea   : > { %v2200_v31 = vmax.f32 %v2192_v8, 0.0 }
 0x4ec   : > { %3079 = vmatmul.msk.f32.gmra.mxu3 %vm1277_vm3, %v2200_v31 }
 0x4f4   : > { %3080 = vmatmul.msk.f32.gmra.mxu3 %vm1277_vm3, %v2201_v9 }
 0x537   : > { %v2247_v16 = vpop.f32.mrf.mxu3 }
 0x538   : > { %v2275_v17 = vmul.f32 %v4894_v14, %v2247_v16 }
 0x53a   : > { %v2287_v19 = vadd.f32 %v4899_v15, %v2275_v17 }
 0x53c   : > { %v2295_v45 = vmax.f32 %v2287_v19, 0.0 }
 0x53e   : > { %2303 = vst.msk [vmem:[#allocation2 + $0x11] sm:$0xff] %vm780_vm0, %v2295_v45 }
 0x53f   : > { %v2250_v20 = vpop.f32.mrf.mxu3 }
 0x540   : > { %v2276_v2 = vmul.f32 %v4894_v14, %v2250_v20 }
 0x542   : > { %v2288_v3 = vadd.f32 %v4899_v15, %v2276_v2 }
 0x544   : > { %v2296_v22 = vmax.f32 %v2288_v3, 0.0  ;;  %v2677_v3 = vld [vmem:[#allocation20 + $0x70] sm:$0xff] }
 0x545   : > { %v2320_v54 = vld [vmem:[#allocation2 + $0x11] sm:$0xff]  ;;  %2706 = vmatpush.msrb.mxu1 %v2677_v3 }
 0x546   : > { %v2328_v23 = vld [vmem:[#allocation2 + $0x12] sm:$0xff]  ;;  %2304 = vst.msk [vmem:[#allocation2 + $0x21] sm:$0xff] %vm780_vm0, %v2296_v22  ;;  %v3541_v12 = vpack.i.bf16 %v2320_v54, %v2319_v11 }
 0x547   : > { %v3546_v25 = vpack.i.bf16 %v2328_v23, %v2327_v21  ;;  %v4911_v28 = vld [vmem:[#allocation2 + $0x10] sm:$0xff]  ;;  %v2676_v11 = vld [vmem:[#allocation20 + $0x68] sm:$0xff] }
 0x548   : > { %v2253_v26 = vpop.f32.mrf.mxu3  ;;  %3542 = vrot.lane.b32.xlu0 %v3541_v12, %s4109_s5  ;;  %v2675_v22 = vld [vmem:[#allocation20 + $0x60] sm:$0xff]  ;;  %2707 = vmatpush.msrb.mxu1 %v2676_v11 }
 0x549   : > { %3547 = vrot.lane.b32.xlu1 %v3546_v25, %s4112_s28  ;;  %v2277_v58 = vmul.f32 %v4894_v14, %v2253_v26 }
 0x54a   : > { %2708 = vmatpush.msrb.mxu1 %v2675_v22 }
 0x54b   : > { %v2289_v7 = vadd.f32 %v4899_v15, %v2277_v58 }
 0x54d   : > { %v2297_v29 = vmax.f32 %v2289_v7, 0.0  ;;  %v2375_v32 = vld [vmem:[#allocation2 + $0x22] sm:$0xff] }
 0x54e   : > { %v4913_v33 = vld [vmem:[#allocation2 + $0x20] sm:$0xff]  ;;  %3081 = vmatmul.msk.f32.vlgmr.msra.gmra.mxu0 %vm780_vm0, %v2375_v32  ;;  %v3561_v37 = vpack.i.bf16 %v2375_v32, %v2328_v23  ;;  %v2674_v23 = vld [vmem:[#allocation20 + $0x58] sm:$0xff] }
 0x54f   : > { %v2344_v40 = vld [vmem:[#allocation2 + $0x21] sm:$0xff]  ;;  %v3551_v34 = vpack.i.bf16 %v4913_v33, %v4911_v28  ;;  %2305 = vst.msk [vmem:[#allocation2 + $0x31] sm:$0xff] %vm780_vm0, %v2297_v29  ;;  %2709 = vmatpush.msrb.mxu1 %v2674_v23 }
 0x550   : > { %v3556_v36 = vpack.i.bf16 %v2344_v40, %v2320_v54  ;;  %v2256_v6 = vpop.f32.mrf.mxu3 }
 0x551   : > { %3552 = vrot.lane.b32.xlu2 %v3551_v34, %s4111_s25  ;;  %v2278_v24 = vmul.f32 %v4894_v14, %v2256_v6  ;;  %3562 = vrot.lane.b32.xlu1 %v3561_v37, %s4110_s17  ;;  %v2672_v37 = vld [vmem:[#allocation20 + $0x48] sm:$0xff]  ;;  %v2671_v6 = vld [vmem:[#allocation20 + $0x40] sm:$0xff] }
 0x552   : > { %3557 = vrot.lane.b32.xlu0 %v3556_v36, %s4114_s3  ;;  %v2673_v36 = vld [vmem:[#allocation20 + $0x50] sm:$0xff] }
 0x553   : > { %v2290_v5 = vadd.f32 %v4899_v15, %v2278_v24  ;;  %2710 = vmatpush.msrb.mxu1 %v2673_v36  ;;  %v2670_v24 = vld [vmem:[#allocation20 + $0x38] sm:$0xff] }
 0x555   : > { %v2298_v51 = vmax.f32 %v2290_v5, 0.0  ;;  %2711 = vmatpush.msrb.mxu1 %v2672_v37  ;;  %v2374_v5 = vld [vmem:[#allocation2 + $0x91] sm:$0xff] }
 0x556   : > { %v2376_v27 = vld [vmem:[#allocation2 + $0x32] sm:$0xff] }
 0x557   : > { %v4924_v30 = vld [vmem:[#allocation2 + $0x30] sm:$0xff]  ;;  %2306 = vst.msk [vmem:[#allocation2 + $0x41] sm:$0xff] %vm780_vm0, %v2298_v51  ;;  %3082 = vmatmul.msk.f32.gmra.mxu0 %vm780_vm0, %v2376_v27  ;;  %v3581_v38 = vpack.i.bf16 %v2376_v27, %v2375_v32  ;;  %2712 = vmatpush.msrb.mxu1 %v2671_v6 }
 0x558   : > { %v2368_v41 = vld [vmem:[#allocation2 + $0x31] sm:$0xff]  ;;  %v3566_v42 = vpack.i.bf16 %v4924_v30, %v4913_v33  ;;  %v2259_v44 = vpop.f32.mrf.mxu3 }
 0x559   : > { %v3571_v43 = vpack.i.bf16 %v2368_v41, %v2344_v40  ;;  %v2279_v46 = vmul.f32 %v4894_v14, %v2259_v44  ;;  %2713 = vmatpush.msrb.mxu1 %v2670_v24  ;;  %v2366_v51 = vld [vmem:[#allocation2 + $0x90] sm:$0xff]  ;;  %v2665_v44 = vld [vmem:[#allocation20 + $0x10] sm:$0xff] }
 0x55a   : > { %3567 = vrot.lane.b32.xlu2 %v3566_v42, %s4113_s14  ;;  %v2667_v42 = vld [vmem:[#allocation20 + $0x20] sm:$0xff] }
 0x55b   : > { %3572 = vrot.lane.b32.xlu0 %v3571_v43, %s4115_s16  ;;  %3577 = vrot.lane.b32.xlu1 %v3571_v43, %s4109_s5  ;;  %v2291_v47 = vadd.f32 %v4899_v15, %v2279_v46  ;;  %v2666_v43 = vld [vmem:[#allocation20 + $0x18] sm:$0xff]  ;;  %v2664_v46 = vld [vmem:[#allocation20 + $0x8] sm:$0xff] }
 0x55d   : > { %v2299_v4 = vmax.f32 %v2291_v47, 0.0  ;;  %v2663_v47 = vld [vmem:[#allocation20] sm:$0xff] }
 0x55e   : > { %v2377_v48 = vld [vmem:[#allocation2 + $0x42] sm:$0xff] }
 0x55f   : > { %v4935_v56 = vld [vmem:[#allocation2 + $0x40] sm:$0xff]  ;;  %2307 = vst.msk [vmem:[#allocation2 + $0x51] sm:$0xff] %vm780_vm0, %v2299_v4  ;;  %3083 = vmatmul.msk.f32.gmra.mxu0 %vm780_vm0, %v2377_v48  ;;  %v3596_v61 = vpack.i.bf16 %v2377_v48, %v2376_v27 }
 0x560   : > { %v2346_v18 = vld [vmem:[#allocation2 + $0x41] sm:$0xff]  ;;  %v3586_v49 = vpack.i.bf16 %v4935_v56, %v4924_v30 }
 0x561   : > { %v3591_v50 = vpack.i.bf16 %v2346_v18, %v2368_v41  ;;  %v2262_v52 = vpop.f32.mrf.mxu3  ;;  %v2669_v27 = vld [vmem:[#allocation20 + $0x30] sm:$0xff]  ;;  %v2668_v41 = vld [vmem:[#allocation20 + $0x28] sm:$0xff] }
 0x562   : > { %3582 = vrot.lane.b32.xlu2 %v3581_v38, %s4112_s28  ;;  %v2280_v10 = vmul.f32 %v4894_v14, %v2262_v52  ;;  %2714 = vmatpush.msrb.mxu1 %v2669_v27 }
 0x563   : > { %3587 = vrot.lane.b32.xlu0 %v3586_v49, %s4111_s25  ;;  %3592 = vrot.lane.b32.xlu1 %v3591_v50, %s4114_s3  ;;  %v2311_v50 = vld [vmem:[#allocation2] sm:$0xff] }
 0x564   : > { %v2292_v53 = vadd.f32 %v4899_v15, %v2280_v10  ;;  %2715 = vmatpush.msrb.mxu1 %v2668_v41 }
 0x566   : > { %v2300_v55 = vmax.f32 %v2292_v53, 0.0  ;;  %v2378_v57 = vld [vmem:[#allocation2 + $0x52] sm:$0xff]  ;;  %2716 = vmatpush.msrb.mxu1 %v2667_v42 }
 0x567   : > { %v4946_v59 = vld [vmem:[#allocation2 + $0x50] sm:$0xff]  ;;  %3084 = vmatmul.msk.f32.gmra.mxu0 %vm780_vm0, %v2378_v57  ;;  %v3616_v1 = vpack.i.bf16 %v2378_v57, %v2377_v48 }
 0x568   : > { %v2370_v60 = vld [vmem:[#allocation2 + $0x51] sm:$0xff]  ;;  %v3601_v62 = vpack.i.bf16 %v4946_v59, %v4935_v56  ;;  %2308 = vst.msk [vmem:[#allocation2 + $0x61] sm:$0xff] %vm780_vm0, %v2300_v55  ;;  %2717 = vmatpush.msrb.mxu1 %v2666_v43 }
 0x569   : > { %v3606_v63 = vpack.i.bf16 %v2370_v60, %v2346_v18 }
 0x56a   : > { %3597 = vrot.lane.b32.xlu2 %v3596_v61, %s4110_s17  ;;  %2718 = vmatpush.msrb.mxu1 %v2665_v44 }
 0x56b   : > { %3602 = vrot.lane.b32.xlu0 %v3601_v62, %s4113_s14  ;;  %3607 = vrot.lane.b32.xlu1 %v3606_v63, %s4115_s16 }
 0x56c   : > { %2719 = vmatpush.msrb.mxu1 %v2664_v46 }
 0x56e   : > { %2720 = vmatpush.msrb.mxu1 %v2663_v47 }
 0x56f   : > { %v2265_v35 = vpop.f32.mrf.mxu3  ;;  %v2379_v0 = vld [vmem:[#allocation2 + $0x62] sm:$0xff] }
 0x570   : > { %v4955_v8 = vld [vmem:[#allocation2 + $0x60] sm:$0xff]  ;;  %v2281_v31 = vmul.f32 %v4894_v14, %v2265_v35  ;;  %3085 = vmatmul.msk.f32.gmra.mxu0 %vm780_vm0, %v2379_v0  ;;  %v3631_v45 = vpack.i.bf16 %v2379_v0, %v2378_v57 }
 0x571   : > { %v3621_v9 = vpack.i.bf16 %v4955_v8, %v4946_v59  ;;  %v2348_v17 = vld [vmem:[#allocation2 + $0x61] sm:$0xff] }
 0x572   : > { %3612 = vrot.lane.b32.xlu2 %v3606_v63, %s4109_s5  ;;  %v2293_v39 = vadd.f32 %v4899_v15, %v2281_v31  ;;  %v3626_v20 = vpack.i.bf16 %v2348_v17, %v2370_v60 }
 0x573   : > { %3617 = vrot.lane.b32.xlu0 %v3616_v1, %s4112_s28  ;;  %3622 = vrot.lane.b32.xlu1 %v3621_v9, %s4111_s25 }
 0x574   : > { %v2301_v16 = vmax.f32 %v2293_v39, 0.0 }
 0x576   : > { %2309 = vst.msk [vmem:[#allocation2 + $0x71] sm:$0xff] %vm780_vm0, %v2301_v16 }
 0x577   : > { %v2268_v19 = vpop.f32.mrf.mxu3 }
 0x578   : > { %v2282_v2 = vmul.f32 %v4894_v14, %v2268_v19 }
 0x57a   : > { %3627 = vrot.lane.b32.xlu2 %v3626_v20, %s4114_s3  ;;  %v2294_v21 = vadd.f32 %v4899_v15, %v2282_v2 }
 0x57b   : > { %3632 = vrot.lane.b32.xlu0 %v3631_v45, %s4110_s17 }
 0x57c   : > { %v2302_v54 = vmax.f32 %v2294_v21, 0.0 }
 0x57d   : > { %v2380_v12 = vld [vmem:[#allocation2 + $0x72] sm:$0xff] }
 0x57e   : > { %v4970_v25 = vld [vmem:[#allocation2 + $0x70] sm:$0xff]  ;;  %2310 = vst.msk [vmem:[#allocation2 + $0x81] sm:$0xff] %vm780_vm0, %v2302_v54  ;;  %3086 = vmatmul.msk.f32.gmra.mxu0 %vm780_vm0, %v2380_v12  ;;  %v3651_v32 = vpack.i.bf16 %v2380_v12, %v2379_v0 }
 0x57f   : > { %v2372_v26 = vld [vmem:[#allocation2 + $0x71] sm:$0xff]  ;;  %v3636_v14 = vpack.i.bf16 %v4970_v25, %v4955_v8 }
 0x580   : > { %v3641_v58 = vpack.i.bf16 %v2372_v26, %v2348_v17 }
 0x581   : > { %3637 = vrot.lane.b32.xlu1 %v3636_v14, %s4113_s14 }
 0x582   : > { %3642 = vrot.lane.b32.xlu2 %v3641_v58, %s4115_s16 }
 0x583   : > { %3647 = vrot.lane.b32.xlu0 %v3641_v58, %s4109_s5  ;;  %s3095_s5 = sshll.u32 %s4243_s24, 6 }
 0x585   : > { %v2381_v15 = vld [vmem:[#allocation2 + $0x82] sm:$0xff] }
 0x586   : > { %v2350_v7 = vld [vmem:[#allocation2 + $0x81] sm:$0xff]  ;;  %3087 = vmatmul.msk.f32.gmra.mxu0 %vm780_vm0, %v2381_v15 }
 0x587   : > { %v2342_v29 = vld [vmem:[#allocation2 + $0x80] sm:$0xff]  ;;  %v3661_v40 = vpack.i.bf16 %v2350_v7, %v2372_v26 }
 0x588   : > { %v3656_v34 = vpack.i.bf16 %v2342_v29, %v4970_v25 }
 0x589   : > { %3652 = vrot.lane.b32.xlu1 %v3651_v32, %s4112_s28 }
 0x58a   : > { %3657 = vrot.lane.b32.xlu2 %v3656_v34, %s4111_s25 }
 0x58b   : > { %3662 = vrot.lane.b32.xlu0 %v3661_v40, %s4114_s3  ;;  %s2841_s3 = sshll.u32 %s4419_s4, 4  ;;  %s2842_s3 = int_to_ptr.vmem [resolvable:$true] %s2841_s3 }
 0x591   : > { %2531 = vrot.lane.b32.xlu1 %v2380_v12, %s4110_s17 }
 0x592   : > { %2563 = vrot.lane.b32.xlu2 %v2342_v29, %s4113_s14 }
 0x593   : > { %2595 = vrot.lane.b32.xlu0 %v2350_v7, %s4115_s16 }
 0x599   : > { %2533 = vrot.lane.b32.xlu1 %v2381_v15, %s4110_s17 }
 0x59a   : > { %2565 = vrot.lane.b32.xlu2 %v2366_v51, %s4113_s14 }
 0x59b   : > { %2597 = vrot.lane.b32.xlu0 %v2374_v5, %s4115_s16 }
 0x5ab   : > { %v3553_v4 = vpop.permute.xlu2 %3552 }
 0x5ac   : > { %v3554_v61 = vunpack.i.l.bf16 %v3553_v4  ;;  %v3555_v45 = vunpack.i.h.bf16 %v3553_v4 }
 0x5b4   : > { %v3568_v38 = vpop.permute.xlu2 %3567 }
 0x5b5   : > { %v3569_v39 = vunpack.i.l.bf16 %v3568_v38  ;;  %v3570_v14 = vunpack.i.h.bf16 %v3568_v38 }
 0x5ba   : > { %v3543_v48 = vpop.permute.xlu0 %3542 }
 0x5bb   : > { %v3548_v18 = vpop.permute.xlu1 %3547  ;;  %v3544_v49 = vunpack.i.l.bf16 %v3543_v48  ;;  %v3545_v62 = vunpack.i.h.bf16 %v3543_v48 }
 0x5bc   : > { %v3549_v52 = vunpack.i.l.bf16 %v3548_v18  ;;  %v3583_v63 = vpop.permute.xlu2 %3582  ;;  %v3550_v1 = vunpack.i.h.bf16 %v3548_v18 }
 0x5bd   : > { %v2607_v10 = vsel %vm780_vm0, %v2311_v50, %v3544_v49  ;;  %v2608_v9 = vsel %vm780_vm0, %v4911_v28, %v3545_v62  ;;  %v3584_v7 = vunpack.i.l.bf16 %v3583_v63  ;;  %v3585_v27 = vunpack.i.h.bf16 %v3583_v63 }
 0x5be   : > { %v2615_v55 = vsel %vm1277_vm3, %v2607_v10, %v3549_v52  ;;  %v2616_v16 = vsel %vm1277_vm3, %v2608_v9, %v3550_v1 }
 0x5bf   : > { %v2623_v35 = vsel %vm1286_vm4, %v2615_v55, %v3554_v61  ;;  %v2624_v11 = vsel %vm1286_vm4, %v2616_v16, %v3555_v45 }
 0x5c3   : > { %v3563_v60 = vpop.permute.xlu1 %3562 }
 0x5c4   : > { %v3558_v53 = vpop.permute.xlu0 %3557  ;;  %v3564_v0 = vunpack.i.l.bf16 %v3563_v60  ;;  %v3565_v21 = vunpack.i.h.bf16 %v3563_v60  ;;  %v3598_v28 = vpop.permute.xlu2 %3597 }
 0x5c5   : > { %v3559_v57 = vunpack.i.l.bf16 %v3558_v53  ;;  %v3560_v17 = vunpack.i.h.bf16 %v3558_v53  ;;  %v3599_v42 = vunpack.i.l.bf16 %v3598_v28  ;;  %v3600_v10 = vunpack.i.h.bf16 %v3598_v28 }
 0x5c7   : > { %v2631_v31 = vsel %vm1295_vm5, %v2623_v35, %v3559_v57  ;;  %v2632_v54 = vsel %vm1295_vm5, %v2624_v11, %v3560_v17 }
 0x5c8   : > { %v2639_v13 = vsel %vm1304_vm6, %v2631_v31, %v3564_v0  ;;  %v2640_v26 = vsel %vm1304_vm6, %v2632_v54, %v3565_v21 }
 0x5c9   : > { %v2647_v3 = vsel %vm1313_vm7, %v2639_v13, %v3569_v39  ;;  %v2648_v34 = vsel %vm1313_vm7, %v2640_v26, %v3570_v14 }
 0x5cc   : > { %v3613_v5 = vpop.permute.xlu2 %3612 }
 0x5cd   : > { %v3573_v19 = vpop.permute.xlu0 %3572  ;;  %v3578_v2 = vpop.permute.xlu1 %3577  ;;  %v3614_v63 = vunpack.i.l.bf16 %v3613_v5  ;;  %v3615_v16 = vunpack.i.h.bf16 %v3613_v5 }
 0x5ce   : > { %v3574_v20 = vunpack.i.l.bf16 %v3573_v19  ;;  %v3579_v23 = vunpack.i.l.bf16 %v3578_v2  ;;  %v3575_v12 = vunpack.i.h.bf16 %v3573_v19  ;;  %v3580_v40 = vunpack.i.h.bf16 %v3578_v2  ;;  %v2382_v19 = vld [vmem:[#allocation2 + $0x92] sm:$0xff] }
 0x5cf   : > { %v2611_v31 = vsel %vm780_vm0, %v4935_v56, %v3614_v63  ;;  %3088 = vmatmul.msk.f32.gmra.mxu0 %vm780_vm0, %v2382_v19 }
 0x5d0   : > { %v2655_v22 = vsel %vm1322_vm8, %v2647_v3, %v3574_v20  ;;  %v2609_v58 = vsel %vm780_vm0, %v4913_v33, %v3579_v23  ;;  %v2656_v6 = vsel %vm1322_vm8, %v2648_v34, %v3575_v12  ;;  %v2610_v51 = vsel %vm780_vm0, %v4924_v30, %v3580_v40 }
 0x5d1   : > { %2721 = vmatmul.f32.vlgmr.msrb.gmra.mxu1 %v2655_v22  ;;  %v2617_v36 = vsel %vm1277_vm3, %v2609_v58, %v3584_v7  ;;  %v2618_v44 = vsel %vm1277_vm3, %v2610_v51, %v3585_v27  ;;  %v2612_v3 = vsel %vm780_vm0, %v4946_v59, %v3615_v16 }
 0x5d4   : > { %v3628_v53 = vpop.permute.xlu2 %3627 }
 0x5d5   : > { %v3588_v15 = vpop.permute.xlu0 %3587  ;;  %v3593_v32 = vpop.permute.xlu1 %3592  ;;  %v3629_v2 = vunpack.i.l.bf16 %v3628_v53  ;;  %v3630_v7 = vunpack.i.h.bf16 %v3628_v53 }
 0x5d6   : > { %v3589_v29 = vunpack.i.l.bf16 %v3588_v15  ;;  %v3594_v37 = vunpack.i.l.bf16 %v3593_v32  ;;  %v3590_v33 = vunpack.i.h.bf16 %v3588_v15  ;;  %v3595_v46 = vunpack.i.h.bf16 %v3593_v32 }
 0x5d8   : > { %v2625_v24 = vsel %vm1286_vm4, %v2617_v36, %v3589_v29  ;;  %v2626_v48 = vsel %vm1286_vm4, %v2618_v44, %v3590_v33 }
 0x5d9   : > { %2724 = vmatmul.f32.gmra.mxu1 %v2656_v6  ;;  %v2633_v41 = vsel %vm1295_vm5, %v2625_v24, %v3594_v37  ;;  %v2634_v50 = vsel %vm1295_vm5, %v2626_v48, %v3595_v46 }
 0x5da   : > { %v2641_v38 = vsel %vm1304_vm6, %v2633_v41, %v3599_v42  ;;  %v2642_v60 = vsel %vm1304_vm6, %v2634_v50, %v3600_v10 }
 0x5dc   : > { %v3643_v13 = vpop.permute.xlu2 %3642 }
 0x5dd   : > { %v3603_v43 = vpop.permute.xlu0 %3602  ;;  %v3608_v4 = vpop.permute.xlu1 %3607  ;;  %v3644_v23 = vunpack.i.l.bf16 %v3643_v13  ;;  %v3645_v5 = vunpack.i.h.bf16 %v3643_v13 }
 0x5de   : > { %v3604_v47 = vunpack.i.l.bf16 %v3603_v43  ;;  %v3609_v18 = vunpack.i.l.bf16 %v3608_v4  ;;  %v3605_v52 = vunpack.i.h.bf16 %v3603_v43  ;;  %v3610_v55 = vunpack.i.h.bf16 %v3608_v4 }
 0x5e0   : > { %v2649_v49 = vsel %vm1313_vm7, %v2641_v38, %v3604_v47  ;;  %v2650_v61 = vsel %vm1313_vm7, %v2642_v60, %v3605_v52 }
 0x5e1   : > { %v2657_v30 = vsel %vm1322_vm8, %v2649_v49, %v3609_v18  ;;  %v2658_v62 = vsel %vm1322_vm8, %v2650_v61, %v3610_v55 }
 0x5e2   : > { %2727 = vmatmul.f32.gmra.mxu1 %v2657_v30 }
 0x5e4   : > { %v3658_v59 = vpop.permute.xlu2 %3657 }
 0x5e5   : > { %v3618_v57 = vpop.permute.xlu0 %3617  ;;  %v3623_v0 = vpop.permute.xlu1 %3622  ;;  %v3659_v33 = vunpack.i.l.bf16 %v3658_v59  ;;  %v3660_v50 = vunpack.i.h.bf16 %v3658_v59 }
 0x5e6   : > { %v3619_v35 = vunpack.i.l.bf16 %v3618_v57  ;;  %v3624_v9 = vunpack.i.l.bf16 %v3623_v0  ;;  %v3620_v17 = vunpack.i.h.bf16 %v3618_v57  ;;  %v3625_v11 = vunpack.i.h.bf16 %v3623_v0 }
 0x5e8   : > { %v2619_v39 = vsel %vm1277_vm3, %v2611_v31, %v3619_v35  ;;  %v2620_v56 = vsel %vm1277_vm3, %v2612_v3, %v3620_v17  ;;  %v2763_v35 = vpop.f32.mrf.mxu0 }
 0x5e9   : > { %v2627_v45 = vsel %vm1286_vm4, %v2619_v39, %v3624_v9  ;;  %v2628_v14 = vsel %vm1286_vm4, %v2620_v56, %v3625_v11 }
 0x5ea   : > { %2730 = vmatmul.f32.gmra.mxu1 %v2658_v62  ;;  %v2635_v28 = vsel %vm1295_vm5, %v2627_v45, %v3629_v2  ;;  %v2636_v40 = vsel %vm1295_vm5, %v2628_v14, %v3630_v7 }
 0x5ec   : > { %v2564_v47 = vpop.permute.xlu2 %2563 }
 0x5ed   : > { %v3633_v1 = vpop.permute.xlu0 %3632 }
 0x5ee   : > { %v3634_v20 = vunpack.i.l.bf16 %v3633_v1  ;;  %v3635_v58 = vunpack.i.h.bf16 %v3633_v1 }
 0x5f0   : > { %v2643_v12 = vsel %vm1304_vm6, %v2635_v28, %v3634_v20  ;;  %v2644_v36 = vsel %vm1304_vm6, %v2636_v40, %v3635_v58  ;;  %v2766_v31 = vpop.f32.mrf.mxu0 }
 0x5f3   : > { %v3638_v21 = vpop.permute.xlu1 %3637 }
 0x5f4   : > { %v3639_v22 = vunpack.i.l.bf16 %v3638_v21  ;;  %v3640_v29 = vunpack.i.h.bf16 %v3638_v21  ;;  %v2566_v55 = vpop.permute.xlu2 %2565 }
 0x5f5   : > { %v3648_v54 = vpop.permute.xlu0 %3647 }
 0x5f6   : > { %v2651_v26 = vsel %vm1313_vm7, %v2643_v12, %v3639_v22  ;;  %v3649_v32 = vunpack.i.l.bf16 %v3648_v54  ;;  %v2652_v24 = vsel %vm1313_vm7, %v2644_v36, %v3640_v29  ;;  %v3650_v43 = vunpack.i.h.bf16 %v3648_v54 }
 0x5f7   : > { %v2659_v15 = vsel %vm1322_vm8, %v2651_v26, %v3644_v23  ;;  %v2660_v42 = vsel %vm1322_vm8, %v2652_v24, %v3645_v5 }
 0x5f8   : > { %2733 = vmatmul.f32.gmra.mxu1 %v2659_v15  ;;  %v2613_v51 = vsel %vm780_vm0, %v4955_v8, %v3649_v32  ;;  %v2614_v18 = vsel %vm780_vm0, %v4970_v25, %v3650_v43  ;;  %v2769_v39 = vpop.f32.mrf.mxu0 }
 0x5fb   : > { %v3653_v34 = vpop.permute.xlu1 %3652 }
 0x5fc   : > { %v3654_v37 = vunpack.i.l.bf16 %v3653_v34  ;;  %v3655_v46 = vunpack.i.h.bf16 %v3653_v34 }
 0x5fd   : > { %v3663_v6 = vpop.permute.xlu0 %3662 }
 0x5fe   : > { %v2621_v27 = vsel %vm1277_vm3, %v2613_v51, %v3654_v37  ;;  %v3664_v41 = vunpack.i.l.bf16 %v3663_v6  ;;  %v2622_v49 = vsel %vm1277_vm3, %v2614_v18, %v3655_v46  ;;  %v3665_v10 = vunpack.i.h.bf16 %v3663_v6 }
 0x5ff   : > { %v2629_v44 = vsel %vm1286_vm4, %v2621_v27, %v3659_v33  ;;  %v2630_v53 = vsel %vm1286_vm4, %v2622_v49, %v3660_v50 }
 0x600   : > { %2736 = vmatmul.f32.gmra.mxu1 %v2660_v42  ;;  %v2637_v48 = vsel %vm1295_vm5, %v2629_v44, %v3664_v41  ;;  %v2638_v60 = vsel %vm1295_vm5, %v2630_v53, %v3665_v10  ;;  %v2772_v19 = vpop.f32.mrf.mxu0 }
 0x603   : > { %v2532_v4 = vpop.permute.xlu1 %2531 }
 0x604   : > { %v2645_v8 = vsel %vm1304_vm6, %v2637_v48, %v2532_v4 }
 0x605   : > { %v2596_v38 = vpop.permute.xlu0 %2595  ;;  %v2653_v30 = vsel %vm1313_vm7, %v2645_v8, %v2564_v47 }
 0x606   : > { %v2661_v52 = vsel %vm1322_vm8, %v2653_v30, %v2596_v38 }
 0x608   : > { %2739 = vmatmul.f32.gmra.mxu1 %v2661_v52  ;;  %v2775_v2 = vpop.f32.mrf.mxu0 }
 0x60b   : > { %v2534_v57 = vpop.permute.xlu1 %2533 }
 0x60c   : > { %v2646_v25 = vsel %vm1304_vm6, %v2638_v60, %v2534_v57 }
 0x60d   : > { %v2598_v61 = vpop.permute.xlu0 %2597  ;;  %v2654_v62 = vsel %vm1313_vm7, %v2646_v25, %v2566_v55 }
 0x60e   : > { %v2662_v63 = vsel %vm1322_vm8, %v2654_v62, %v2598_v61 }
 0x610   : > { %2742 = vmatmul.f32.gmra.mxu1 %v2662_v63  ;;  %v2778_v21 = vpop.f32.mrf.mxu0 }
 0x618   : > { %v2781_v54 = vpop.f32.mrf.mxu0 }
 0x64c   : > { %v2784_v12 = vpop.f32.mrf.mxu0 }
 0x64e   : > { %v2722_v0 = vpop.f32.mrf.mxu1 }
 0x64f   : > { %v2764_v1 = vadd.f32 %v2763_v35, %v2722_v0 }
 0x651   : > { %2795 = vrot.lane.b32.xlu1 %v2764_v1, %s4112_s28 }
 0x656   : > { %v2725_v9 = vpop.f32.mrf.mxu1 }
 0x657   : > { %v2767_v13 = vadd.f32 %v2766_v31, %v2725_v9 }
 0x659   : > { %2797 = vrot.lane.b32.xlu2 %v2767_v13, %s4112_s28 }
 0x65f   : > { %v2728_v16 = vpop.f32.mrf.mxu1 }
 0x660   : > { %v2770_v17 = vadd.f32 %v2769_v39, %v2728_v16 }
 0x662   : > { %2799 = vrot.lane.b32.xlu0 %v2770_v17, %s4112_s28 }
 0x667   : > { %v2731_v45 = vpop.f32.mrf.mxu1 }
 0x668   : > { %v2773_v20 = vadd.f32 %v2772_v19, %v2731_v45 }
 0x66a   : > { %2801 = vrot.lane.b32.xlu1 %v2773_v20, %s4112_s28 }
 0x675   : > { %v2734_v3 = vpop.f32.mrf.mxu1 }
 0x676   : > { %v2776_v11 = vadd.f32 %v2775_v2, %v2734_v3 }
 0x678   : > { %2803 = vrot.lane.b32.xlu2 %v2776_v11, %s4112_s28 }
 0x67d   : > { %v2737_v56 = vpop.f32.mrf.mxu1 }
 0x67e   : > { %v2779_v22 = vadd.f32 %v2778_v21, %v2737_v56 }
 0x680   : > { %2805 = vrot.lane.b32.xlu0 %v2779_v22, %s4112_s28 }
 0x685   : > { %v2740_v28 = vpop.f32.mrf.mxu1 }
 0x686   : > { %v2782_v23 = vadd.f32 %v2781_v54, %v2740_v28 }
 0x688   : > { %2807 = vrot.lane.b32.xlu1 %v2782_v23, %s4112_s28 }
 0x68d   : > { %v2743_v26 = vpop.f32.mrf.mxu1 }
 0x68e   : > { %v2785_v14 = vadd.f32 %v2784_v12, %v2743_v26 }
 0x690   : > { %2809 = vrot.lane.b32.xlu2 %v2785_v14, %s4112_s28  ;;  %s5174_s28 = sld [smem:[#allocation43_spill]] }
 0x696   : > { %s2840_s14 = scalar_lea.hbm %s5174_s28, %s3095_s5  ;;  %s4028_s23 = scalar_lea.hbm %s5174_s28, 128 }
 0x697   : > { %s2843_s16 = sshll.u32 %s2840_s14, 4  ;;  %s2844_s16 = int_to_ptr.hbm [resolvable:$true] %s2843_s16 }
 0x698   : > { %s4022_s27 = sshra.s32 %s2844_s16, 4  ;;  %s4023_s27 = int_to_ptr.hbm [resolvable:$true] %s4022_s27 }
 0x699   : > { %s4024_s6 = scalar_lea.hbm %s4023_s27, 64  ;;  %p4029_p12 = scmp.lt.s32.totalorder %s4023_s27, %s5174_s28 }
 0x69a   : > { %p4025_p1 = scmp.ne.s32.totalorder %s4023_s27, %s4024_s6  ;;  %p4030_p7 = scmp.lt.s32.totalorder %s4028_s23, %s4024_s6 }
 0x69c   : > { %p4026_p3 = pnand %p4025_p1, %p4354_p5  ;;  %p4031_p8 = por %p4030_p7, %p4029_p12 }
 0x69e   : > { %p4027_p4 = pneg %p4026_p3 }
 0x6a0   : > { %p4032_p9 = pnand %p4031_p8, %p4027_p4 }
 0x6b3   : > { %v2798_v58 = vpop.permute.xlu2 %2797 }
 0x6b4   : > { %2821 = vst.msk [vmem:[%s4419_s4 + $0x8] sm:$0xff] %vm2819_vm12, %v2798_v58 }
 0x6c3   : > { %v2796_v15 = vpop.permute.xlu1 %2795 }
 0x6c4   : > { %2820 = vst.msk [vmem:[%s4419_s4] sm:$0xff] %vm2819_vm12, %v2796_v15 }
 0x6d2   : > { %v2804_v7 = vpop.permute.xlu2 %2803 }
 0x6d3   : > { %2824 = vst.msk [vmem:[%s4419_s4 + $0x20] sm:$0xff] %vm2819_vm12, %v2804_v7 }
 0x6d4   : > { %v2800_v59 = vpop.permute.xlu0 %2799 }
 0x6d5   : > { %2822 = vst.msk [vmem:[%s4419_s4 + $0x10] sm:$0xff] %vm2819_vm12, %v2800_v59 }
 0x6dc   : > { %v2802_v29 = vpop.permute.xlu1 %2801 }
 0x6dd   : > { %2823 = vst.msk [vmem:[%s4419_s4 + $0x18] sm:$0xff] %vm2819_vm12, %v2802_v29 }
 0x6ea   : > { %v2810_v32 = vpop.permute.xlu2 %2809 }
 0x6eb   : > { %2827 = vst.msk [vmem:[%s4419_s4 + $0x38] sm:$0xff] %vm2819_vm12, %v2810_v32 }
 0x6f2   : > { %v2806_v40 = vpop.permute.xlu0 %2805 }
 0x6f3   : > { %2825 = vst.msk [vmem:[%s4419_s4 + $0x28] sm:$0xff] %vm2819_vm12, %v2806_v40 }
 0x6fa   : > { %v2808_v34 = vpop.permute.xlu1 %2807 }
 0x6fb   : > { %2826 = vst.msk [vmem:[%s4419_s4 + $0x30] sm:$0xff] %vm2819_vm12, %v2808_v34 }
 0x6fc   : > { %4035 = shalt.err (!%p4032_p9)
}
 0x6fd   : > { %s4117_s10 = smov 128   ;;  %s4118_s4 = smov 8  }
 0x6fe   : > { %3158 = dma.vmem_to_hbm [thread:$0]  (%p4354_p5), %s2842_s3, 1024, %s2844_s16, %s2829_s2, %s4117_s10, %s4117_s10, %s4118_s4  }
 0x6ff PF: > { %s2858_s5 = sand.u32 1, %s4082_s0   ;;  %p5175_p10 = scmp.ge.s32.totalorder %s4094_s21, 2 }
 0x700   : > { %s2859_s17 = scalar_lea.sflag [#allocation5], %s2858_s5 }
 0x701   : > { %p3196_p13 = pnand %p5175_p10, %p4358_p6 }
 0x703   : > { %p3197_p11 = pneg %p3196_p13 }
 0x705   : > { %4077 = dma.done.wait (%p3197_p11), %s2859_s17, 1024  }
 0x706   : > { %4079 = vsyncadd (%p3197_p11), %s2859_s17, 4294966272  ;;  %p37_p0 = scmp.ge.s32.totalorder %s4328_s1, 4   ;;  %s5176_s0 = smov %s4086_s30 }
 0x707   : > { %s5177_s30 = smov %s4090_s20  ;;  %s5178_s20 = smov %s4339_s26 }
 0x708   : > { %s5179_s21 = smov %s4328_s1  ;;  %39 = sbr.rel (!%p37_p0) target bundleno = 26 (0x1a), region = 184 }
 0x70d   :  { %2865 = vsyncpa [#allocation4], 1 }
 0x70e   :  { %2867 = vsyncpa [#allocation4 + $0x1], 1 }
 0x70f   :  { %2868 = vsyncpa [#allocation7], 1 }
 0x710   :  { %2869 = vsyncpa [#allocation10], 1 }
 0x711   :  { %2870 = vsyncpa [#allocation13], 1 }
 0x712   :  { %2871 = vsyncpa [#allocation16], 1 }
 0x713   :  { %2872 = vsyncpa [#allocation19], 1 }
 0x714   :  { %2873 = vsyncpa [#allocation5], 1 }
 0x715   :  { %2875 = vsyncpa [#allocation5 + $0x1], 1 }

</bundles_post_ra>
